<compile_context>
chip_gen: v6e
topology: v6e:2x2x1
jax: 0.10.0
libtpu: 0.0.40
codegen_flags: <defaults>
</compile_context>

<pallas_src>
import math

import jax
import jax.numpy as jnp
from jax import lax
from jax.experimental import pallas as pl
from jax.experimental.pallas import tpu as pltpu


# ------------------------------ small helpers ------------------------------ #

def _round_up(x, m):
    return ((x + m - 1) // m) * m


def _vmem_limit_bytes():
    """~75% of physical VMEM (96 MiB on v5e/v6e's 128 MiB, 48 MiB on v7x's 64)."""
    try:
        cap = int(pltpu.get_tpu_info().vmem_capacity_bytes)
    except Exception:
        cap = 64 * 1024 * 1024
    return (cap * 3) // 4


def _pick_batch_group(b, n_rot, cin, cout, lin_pad, lq, vmem_limit):
    """Largest divisor of b (<= 8) whose double-buffered conv blocks fit ~1/3
    of the VMEM budget (headroom left for f32 accumulators / norm temps)."""
    per_img = 2 * 2 * (n_rot * cin * lin_pad + (n_rot + 1) * cout * lq)  # bf16, x2 dbl-buf
    budget = vmem_limit // 3
    g = 1
    for cand in range(1, min(b, 8) + 1):
        if b % cand == 0 and cand * per_img <= budget:
            g = cand
    return g


def _pick_s_tile(lq, n_rot, c, budget_bytes=16 * 1024 * 1024):
    """128-multiple lane tile of lq for the post kernel; per-column bytes count
    double-buffered psi/chi (bf16) and output (f32)."""
    per_col = 2 * c * (2 * n_rot + 2 + 4 * n_rot)
    ts = (budget_bytes // (per_col * 128)) * 128
    ts = max(128, min(lq, ts))
    while lq % ts:
        ts -= 128
    return ts


# ----------------------------- Pallas kernels ------------------------------ #

def _make_conv_kernel(kh_sz, kw_sz, wp, lq, n_rot, g_images):
    """Tap-accumulated conv on the flattened spatial grid.

    x_ref:   (G, n, Cin, Lin_pad)  bf16  -- padded image flattened over (Hp,Wp)
    w_ref:   (KH*KW, Cout, Cin)    bf16  -- weights per tap
    psi_ref: (G, n, Cout, Lq)      bf16  -- conv of each rotation slice
    chi_ref: (G, Cout, Lq)         bf16  -- conv of the rotation-norm image
    The output column q corresponds to padded-input position q (valid outputs
    live at q = r*Wp + c, r < OH, c < OW); the wrapper extracts that window.
    """
    def conv_one(w_ref, img):                        # img: (Cin, Lin_pad)
        acc = None
        for kh in range(kh_sz):
            for kw in range(kw_sz):
                off = kh * wp + kw
                part = jnp.dot(w_ref[kh * kw_sz + kw], img[:, off:off + lq],
                               preferred_element_type=jnp.float32)
                acc = part if acc is None else acc + part
        return acc                                   # (Cout, Lq) f32

    def kernel(x_ref, w_ref, psi_ref, chi_ref):
        for g in range(g_images):
            sq = None
            for i in range(n_rot):
                xi = x_ref[g, i]                     # (Cin, Lin_pad) bf16
                psi_ref[g, i] = conv_one(w_ref, xi).astype(psi_ref.dtype)
                xf = xi.astype(jnp.float32)
                sq = xf * xf if sq is None else sq + xf * xf
            xn = jnp.sqrt(sq).astype(xi.dtype)       # rotation-norm image
            chi_ref[g] = conv_one(w_ref, xn).astype(chi_ref.dtype)
    return kernel


def _rotating_post_kernel(psi_ref, chi_ref, rb_ref, scale_ref, shift_ref,
                          o_ref):
    """Rotation bias + magnitude + (pre-reduced) BatchNorm + ReLU + rescale.

    psi_ref:   (1, n, C, ts) bf16
    chi_ref:   (1, C, ts)    bf16
    rb_ref:    (n, C, 1)     f32
    scale_ref: (C, 1)        f32   gamma * rsqrt(var + eps)   (global stats)
    shift_ref: (C, 1)        f32   beta  - mean * scale       (global stats)
    o_ref:     (1, n, C, ts) f32
    """
    psi = psi_ref[0].astype(jnp.float32)             # (n, C, ts)
    chi = chi_ref[0].astype(jnp.float32)             # (C, ts)
    z = psi + rb_ref[...]                            # rotation bias
    mag_psi = jnp.sqrt(jnp.sum(psi * psi, axis=0))   # (C, ts)
    magnitude = 0.5 * (mag_psi + chi)
    magnitude = jnp.maximum(magnitude * scale_ref[...] + shift_ref[...], 0.0)
    inv = lax.rsqrt(jnp.sum(z * z, axis=0) + 1e-12)  # single EUP op
    o_ref[0] = z * (inv * magnitude)[None, :, :]


# ------------------------------- wrapper ------------------------------------ #

def rotating_conv2d_forward(x, params, stride=1, padding=0):
    """x: (b, n, Cin, H, W) float32  ->  (b, n, Cout, OH, OW) float32."""
    if stride != 1:
        # TODO(synk): stride > 1 needs strided lane gathers; not implemented.
        raise NotImplementedError("Pallas RotatingConv2d supports stride=1 only")

    b, n, cin, h, w = x.shape
    w_oihw = params["conv_weight"]                    # (Cout, Cin, KH, KW)
    cout, _, kh_sz, kw_sz = w_oihw.shape

    hp, wp = h + 2 * padding, w + 2 * padding
    oh, ow = hp - kh_sz + 1, wp - kw_sz + 1
    lin = hp * wp
    lq = _round_up(oh * wp, 128)                      # working output columns
    lin_pad = _round_up((kh_sz - 1) * wp + (kw_sz - 1) + lq, 128)

    # ---- single fused prep pass: pad + flatten + cast to bf16 ---------------
    x_p = x
    if padding:
        x_p = jnp.pad(x_p, ((0, 0), (0, 0), (0, 0),
                            (padding, padding), (padding, padding)))
    x_flat = x_p.reshape(b, n, cin, lin)
    x_flat = jnp.pad(x_flat, ((0, 0), (0, 0), (0, 0),
                              (0, lin_pad - lin))).astype(jnp.bfloat16)

    # weights per tap: (KH*KW, Cout, Cin)
    w_taps = jnp.transpose(w_oihw, (2, 3, 0, 1)).reshape(
        kh_sz * kw_sz, cout, cin).astype(jnp.bfloat16)

    vmem_limit = _vmem_limit_bytes()
    g = _pick_batch_group(b, n, cin, cout, lin_pad, lq, vmem_limit)

    conv_cost = pl.CostEstimate(
        flops=int(2 * cout * cin * kh_sz * kw_sz * lq * (n + 1) * b),
        transcendentals=int(b * cin * lin_pad),
        bytes_accessed=int(x_flat.size * 2 + w_taps.size * 2
                           + b * (n + 1) * cout * lq * 2))

    psi_full, chi_full = pl.pallas_call(
        _make_conv_kernel(kh_sz, kw_sz, wp, lq, n, g),
        out_shape=(jax.ShapeDtypeStruct((b, n, cout, lq), jnp.bfloat16),
                   jax.ShapeDtypeStruct((b, cout, lq), jnp.bfloat16)),
        grid=(b // g,),
        in_specs=[
            pl.BlockSpec((g, n, cin, lin_pad), lambda i: (i, 0, 0, 0)),
            pl.BlockSpec((kh_sz * kw_sz, cout, cin), lambda i: (0, 0, 0)),
        ],
        out_specs=(pl.BlockSpec((g, n, cout, lq), lambda i: (i, 0, 0, 0)),
                   pl.BlockSpec((g, cout, lq), lambda i: (i, 0, 0))),
        compiler_params=pltpu.CompilerParams(
            dimension_semantics=("parallel",),
            vmem_limit_bytes=vmem_limit),
        cost_estimate=conv_cost,
    )(x_flat, w_taps)

    # ---- global BatchNorm batch statistics: ONE fused pass over psi/chi -----
    used = oh * wp
    psi_v = psi_full[..., :used].reshape(b, n, cout, oh, wp)[..., :ow]
    chi_v = chi_full[..., :used].reshape(b, cout, oh, wp)[..., :ow]
    psi_v = psi_v.astype(jnp.float32)
    chi_v = chi_v.astype(jnp.float32)
    mag = 0.5 * (jnp.sqrt(jnp.sum(psi_v * psi_v, axis=1)) + chi_v)
    mean = jnp.mean(mag, axis=(0, 2, 3))
    mean_sq = jnp.mean(mag * mag, axis=(0, 2, 3))
    var = jnp.maximum(mean_sq - mean * mean, 0.0)     # single-pass variance
    scale = params["bn_gamma"] * lax.rsqrt(var + 1e-5)
    shift = params["bn_beta"] - mean * scale

    rb = params["r_b"].reshape(n, cout, 1).astype(jnp.float32)
    scale = scale.reshape(cout, 1)
    shift = shift.reshape(cout, 1)

    # ---- elementwise rotation post-processing (lane-dense, 128-aligned) -----
    ts = _pick_s_tile(lq, n, cout)
    post_cost = pl.CostEstimate(
        flops=int(b * n * cout * lq * 12),
        transcendentals=int(2 * b * cout * lq),
        bytes_accessed=int(psi_full.size * 2 + chi_full.size * 2
                           + b * n * cout * lq * 4))

    out_full = pl.pallas_call(
        _rotating_post_kernel,
        out_shape=jax.ShapeDtypeStruct((b, n, cout, lq), jnp.float32),
        grid=(b, lq // ts),
        in_specs=[
            pl.BlockSpec((1, n, cout, ts), lambda i, j: (i, 0, 0, j)),
            pl.BlockSpec((1, cout, ts), lambda i, j: (i, 0, j)),
            pl.BlockSpec((n, cout, 1), lambda i, j: (0, 0, 0)),
            pl.BlockSpec((cout, 1), lambda i, j: (0, 0)),
            pl.BlockSpec((cout, 1), lambda i, j: (0, 0)),
        ],
        out_specs=pl.BlockSpec((1, n, cout, ts), lambda i, j: (i, 0, 0, j)),
        compiler_params=pltpu.CompilerParams(
            dimension_semantics=("parallel", "parallel"),
            vmem_limit_bytes=vmem_limit),
        cost_estimate=post_cost,
    )(psi_full, chi_full, rb, scale, shift)

    # extract the valid (OH, OW) window from the full-grid layout (XLA slice)
    out = out_full[..., :used].reshape(b, n, cout, oh, wp)[..., :ow]
    return out


# ------------------------- deterministic parameters ------------------------ #

def init_params(key, in_channels, out_channels, n_rot, kernel_size=3):
    k_w, k_b = jax.random.split(key)
    fan_in = in_channels * kernel_size * kernel_size
    bound = 1.0 / math.sqrt(fan_in)
    conv_weight = jax.random.uniform(
        k_w, (out_channels, in_channels, kernel_size, kernel_size),
        jnp.float32, -bound, bound)
    r_b = jax.random.uniform(k_b, (n_rot, out_channels), jnp.float32,
                             -bound, bound)
    return dict(conv_weight=conv_weight, r_b=r_b,
                bn_gamma=jnp.ones((out_channels,), jnp.float32),
                bn_beta=jnp.zeros((out_channels,), jnp.float32))


# --------------------------- pure-JAX reference ----------------------------- #

def reference_forward(x, params, stride=1, padding=0):
    """Reference with the SAME deliberate precision choices as the kernel
    (bf16 conv operands / bf16 psi-chi storage, f32 accumulation), so the
    assert isolates kernel correctness from dtype policy."""
    b, n, cin, h, w = x.shape
    wgt = params["conv_weight"].astype(jnp.bfloat16)
    cout = wgt.shape[0]
    xb = x.astype(jnp.bfloat16)

    def conv(inp_bf16):
        return lax.conv_general_dilated(
            inp_bf16, wgt, (stride, stride), [(padding, padding)] * 2,
            dimension_numbers=("NCHW", "OIHW", "NCHW"),
            preferred_element_type=jnp.float32)

    psi = conv(xb.reshape(b * n, cin, h, w))
    oh, ow = psi.shape[2], psi.shape[3]
    psi = psi.astype(jnp.bfloat16).astype(jnp.float32).reshape(b, n, cout, oh, ow)
    xn = jnp.sqrt(jnp.sum(jnp.square(xb.astype(jnp.float32)), axis=1))
    chi = conv(xn.astype(jnp.bfloat16)).astype(jnp.bfloat16).astype(jnp.float32)

    z = psi + params["r_b"].reshape(1, n, cout, 1, 1)
    mag_psi = jnp.sqrt(jnp.sum(psi ** 2, axis=1))
    mag = 0.5 * (mag_psi + chi)
    mean = jnp.mean(mag, axis=(0, 2, 3), keepdims=True)
    var = jnp.mean((mag - mean) ** 2, axis=(0, 2, 3), keepdims=True)
    bn = (mag - mean) / jnp.sqrt(var + 1e-5)
    bn = bn * params["bn_gamma"].reshape(1, -1, 1, 1) \
        + params["bn_beta"].reshape(1, -1, 1, 1)
    mag = jnp.maximum(bn, 0.0)
    z_mag = jnp.sqrt(jnp.sum(z ** 2, axis=1, keepdims=True))
    return z / (z_mag + 1e-8) * mag[:, None]


# ---------------------------------- main ------------------------------------ #

if __name__ == "__main__":
    key = jax.random.PRNGKey(0)
    kx, kp = jax.random.split(key)

    b, n, cin, cout, hh, ww = 2, 2, 4, 8, 16, 16
    x = jax.random.normal(kx, (b, n, cin, hh, ww), jnp.float32)
    params = init_params(kp, cin, cout, n, kernel_size=3)

    fwd = jax.jit(rotating_conv2d_forward)
    out = jax.block_until_ready(fwd(x, params))

    assert out.shape == (b, n, cout, 14, 14), out.shape
    assert bool(jnp.all(jnp.isfinite(out)))

    ref = reference_forward(x, params)
    assert bool(jnp.allclose(out, ref, rtol=1e-2, atol=1e-3)), \
        float(jnp.max(jnp.abs(out - ref)))

    print("KERNEL_OK")
</pallas_src>

<mosaic_0001>
module attributes {stable_mosaic.version = 11 : i64} {
  func.func @kernel(%arg0: i32, %arg1: memref<2x2x4x384xbf16, #tpu.memory_space<vmem>>, %arg2: memref<9x8x4xbf16, #tpu.memory_space<vmem>>, %arg3: memref<2x2x8x256xbf16, #tpu.memory_space<vmem>>, %arg4: memref<2x8x256xbf16, #tpu.memory_space<vmem>>) attributes {dimension_semantics = [#tpu.dimension_semantics<parallel>], iteration_bounds = array<i64: 1>, scalar_prefetch = 0 : i64, scratch_operands = 0 : i64, tpu.core_type = #tpu.core_type<tc>, window_params = [{transform_indices = @transform_0, window_bounds = array<i64: 2, 2, 4, 384>}, {pipeline_mode = #tpu.pipeline_mode<synchronous>, transform_indices = @transform_1, window_bounds = array<i64: 9, 8, 4>}, {transform_indices = @transform_2, window_bounds = array<i64: 2, 2, 8, 256>}, {transform_indices = @transform_3, window_bounds = array<i64: 2, 8, 256>}]} {
    %c0 = arith.constant 0 : index
    %c0_0 = arith.constant 0 : index
    %c0_1 = arith.constant 0 : index
    %c0_2 = arith.constant 0 : index
    %0 = vector.load %arg1[%c0, %c0_0, %c0_1, %c0_2] : memref<2x2x4x384xbf16, #tpu.memory_space<vmem>>, vector<1x1x4x384xbf16>
    %1 = vector.shape_cast %0 : vector<1x1x4x384xbf16> to vector<4x384xbf16>
    %c0_3 = arith.constant 0 : index
    %c0_4 = arith.constant 0 : index
    %c0_5 = arith.constant 0 : index
    %2 = vector.load %arg2[%c0_3, %c0_4, %c0_5] : memref<9x8x4xbf16, #tpu.memory_space<vmem>>, vector<1x8x4xbf16>
    %3 = vector.shape_cast %2 : vector<1x8x4xbf16> to vector<8x4xbf16>
    %4 = vector.extract_strided_slice %1 {offsets = [0, 0], sizes = [4, 256], strides = [1, 1]} : vector<4x384xbf16> to vector<4x256xbf16>
    %cst = arith.constant dense<0.000000e+00> : vector<8x256xf32>
    %5 = tpu.matmul %3, %4, %cst {dimension_numbers = #tpu.dot_dimension_numbers<[1], [0], [0], [1], [0, 0, 1, 1], [], []>} : vector<8x4xbf16>, vector<4x256xbf16>, vector<8x256xf32> -> vector<8x256xf32>
    %c1 = arith.constant 1 : index
    %c0_6 = arith.constant 0 : index
    %c0_7 = arith.constant 0 : index
    %6 = vector.load %arg2[%c1, %c0_6, %c0_7] : memref<9x8x4xbf16, #tpu.memory_space<vmem>>, vector<1x8x4xbf16>
    %7 = vector.shape_cast %6 : vector<1x8x4xbf16> to vector<8x4xbf16>
    %8 = vector.extract_strided_slice %1 {offsets = [0, 1], sizes = [4, 256], strides = [1, 1]} : vector<4x384xbf16> to vector<4x256xbf16>
    %cst_8 = arith.constant dense<0.000000e+00> : vector<8x256xf32>
    %9 = tpu.matmul %7, %8, %cst_8 {dimension_numbers = #tpu.dot_dimension_numbers<[1], [0], [0], [1], [0, 0, 1, 1], [], []>} : vector<8x4xbf16>, vector<4x256xbf16>, vector<8x256xf32> -> vector<8x256xf32>
    %10 = arith.addf %5, %9 : vector<8x256xf32>
    %c2 = arith.constant 2 : index
    %c0_9 = arith.constant 0 : index
    %c0_10 = arith.constant 0 : index
    %11 = vector.load %arg2[%c2, %c0_9, %c0_10] : memref<9x8x4xbf16, #tpu.memory_space<vmem>>, vector<1x8x4xbf16>
    %12 = vector.shape_cast %11 : vector<1x8x4xbf16> to vector<8x4xbf16>
    %13 = vector.extract_strided_slice %1 {offsets = [0, 2], sizes = [4, 256], strides = [1, 1]} : vector<4x384xbf16> to vector<4x256xbf16>
    %cst_11 = arith.constant dense<0.000000e+00> : vector<8x256xf32>
    %14 = tpu.matmul %12, %13, %cst_11 {dimension_numbers = #tpu.dot_dimension_numbers<[1], [0], [0], [1], [0, 0, 1, 1], [], []>} : vector<8x4xbf16>, vector<4x256xbf16>, vector<8x256xf32> -> vector<8x256xf32>
    %15 = arith.addf %10, %14 : vector<8x256xf32>
    %c3 = arith.constant 3 : index
    %c0_12 = arith.constant 0 : index
    %c0_13 = arith.constant 0 : index
    %16 = vector.load %arg2[%c3, %c0_12, %c0_13] : memref<9x8x4xbf16, #tpu.memory_space<vmem>>, vector<1x8x4xbf16>
    %17 = vector.shape_cast %16 : vector<1x8x4xbf16> to vector<8x4xbf16>
    %18 = vector.extract_strided_slice %1 {offsets = [0, 16], sizes = [4, 256], strides = [1, 1]} : vector<4x384xbf16> to vector<4x256xbf16>
    %cst_14 = arith.constant dense<0.000000e+00> : vector<8x256xf32>
    %19 = tpu.matmul %17, %18, %cst_14 {dimension_numbers = #tpu.dot_dimension_numbers<[1], [0], [0], [1], [0, 0, 1, 1], [], []>} : vector<8x4xbf16>, vector<4x256xbf16>, vector<8x256xf32> -> vector<8x256xf32>
    %20 = arith.addf %15, %19 : vector<8x256xf32>
    %c4 = arith.constant 4 : index
    %c0_15 = arith.constant 0 : index
    %c0_16 = arith.constant 0 : index
    %21 = vector.load %arg2[%c4, %c0_15, %c0_16] : memref<9x8x4xbf16, #tpu.memory_space<vmem>>, vector<1x8x4xbf16>
    %22 = vector.shape_cast %21 : vector<1x8x4xbf16> to vector<8x4xbf16>
    %23 = vector.extract_strided_slice %1 {offsets = [0, 17], sizes = [4, 256], strides = [1, 1]} : vector<4x384xbf16> to vector<4x256xbf16>
    %cst_17 = arith.constant dense<0.000000e+00> : vector<8x256xf32>
    %24 = tpu.matmul %22, %23, %cst_17 {dimension_numbers = #tpu.dot_dimension_numbers<[1], [0], [0], [1], [0, 0, 1, 1], [], []>} : vector<8x4xbf16>, vector<4x256xbf16>, vector<8x256xf32> -> vector<8x256xf32>
    %25 = arith.addf %20, %24 : vector<8x256xf32>
    %c5 = arith.constant 5 : index
    %c0_18 = arith.constant 0 : index
    %c0_19 = arith.constant 0 : index
    %26 = vector.load %arg2[%c5, %c0_18, %c0_19] : memref<9x8x4xbf16, #tpu.memory_space<vmem>>, vector<1x8x4xbf16>
    %27 = vector.shape_cast %26 : vector<1x8x4xbf16> to vector<8x4xbf16>
    %28 = vector.extract_strided_slice %1 {offsets = [0, 18], sizes = [4, 256], strides = [1, 1]} : vector<4x384xbf16> to vector<4x256xbf16>
    %cst_20 = arith.constant dense<0.000000e+00> : vector<8x256xf32>
    %29 = tpu.matmul %27, %28, %cst_20 {dimension_numbers = #tpu.dot_dimension_numbers<[1], [0], [0], [1], [0, 0, 1, 1], [], []>} : vector<8x4xbf16>, vector<4x256xbf16>, vector<8x256xf32> -> vector<8x256xf32>
    %30 = arith.addf %25, %29 : vector<8x256xf32>
    %c6 = arith.constant 6 : index
    %c0_21 = arith.constant 0 : index
    %c0_22 = arith.constant 0 : index
    %31 = vector.load %arg2[%c6, %c0_21, %c0_22] : memref<9x8x4xbf16, #tpu.memory_space<vmem>>, vector<1x8x4xbf16>
    %32 = vector.shape_cast %31 : vector<1x8x4xbf16> to vector<8x4xbf16>
    %33 = vector.extract_strided_slice %1 {offsets = [0, 32], sizes = [4, 256], strides = [1, 1]} : vector<4x384xbf16> to vector<4x256xbf16>
    %cst_23 = arith.constant dense<0.000000e+00> : vector<8x256xf32>
    %34 = tpu.matmul %32, %33, %cst_23 {dimension_numbers = #tpu.dot_dimension_numbers<[1], [0], [0], [1], [0, 0, 1, 1], [], []>} : vector<8x4xbf16>, vector<4x256xbf16>, vector<8x256xf32> -> vector<8x256xf32>
    %35 = arith.addf %30, %34 : vector<8x256xf32>
    %c7 = arith.constant 7 : index
    %c0_24 = arith.constant 0 : index
    %c0_25 = arith.constant 0 : index
    %36 = vector.load %arg2[%c7, %c0_24, %c0_25] : memref<9x8x4xbf16, #tpu.memory_space<vmem>>, vector<1x8x4xbf16>
    %37 = vector.shape_cast %36 : vector<1x8x4xbf16> to vector<8x4xbf16>
    %38 = vector.extract_strided_slice %1 {offsets = [0, 33], sizes = [4, 256], strides = [1, 1]} : vector<4x384xbf16> to vector<4x256xbf16>
    %cst_26 = arith.constant dense<0.000000e+00> : vector<8x256xf32>
    %39 = tpu.matmul %37, %38, %cst_26 {dimension_numbers = #tpu.dot_dimension_numbers<[1], [0], [0], [1], [0, 0, 1, 1], [], []>} : vector<8x4xbf16>, vector<4x256xbf16>, vector<8x256xf32> -> vector<8x256xf32>
    %40 = arith.addf %35, %39 : vector<8x256xf32>
    %c8 = arith.constant 8 : index
    %c0_27 = arith.constant 0 : index
    %c0_28 = arith.constant 0 : index
    %41 = vector.load %arg2[%c8, %c0_27, %c0_28] : memref<9x8x4xbf16, #tpu.memory_space<vmem>>, vector<1x8x4xbf16>
    %42 = vector.shape_cast %41 : vector<1x8x4xbf16> to vector<8x4xbf16>
    %43 = vector.extract_strided_slice %1 {offsets = [0, 34], sizes = [4, 256], strides = [1, 1]} : vector<4x384xbf16> to vector<4x256xbf16>
    %cst_29 = arith.constant dense<0.000000e+00> : vector<8x256xf32>
    %44 = tpu.matmul %42, %43, %cst_29 {dimension_numbers = #tpu.dot_dimension_numbers<[1], [0], [0], [1], [0, 0, 1, 1], [], []>} : vector<8x4xbf16>, vector<4x256xbf16>, vector<8x256xf32> -> vector<8x256xf32>
    %45 = arith.addf %40, %44 : vector<8x256xf32>
    %46 = arith.truncf %45 : vector<8x256xf32> to vector<8x256xbf16>
    %c0_30 = arith.constant 0 : index
    %c0_31 = arith.constant 0 : index
    %c0_32 = arith.constant 0 : index
    %c0_33 = arith.constant 0 : index
    %47 = vector.load %arg3[%c0_30, %c0_31, %c0_32, %c0_33] : memref<2x2x8x256xbf16, #tpu.memory_space<vmem>>, vector<1x1x8x256xbf16>
    %48 = vector.shape_cast %47 : vector<1x1x8x256xbf16> to vector<8x256xbf16>
    %49 = vector.shape_cast %46 : vector<8x256xbf16> to vector<1x1x8x256xbf16>
    tpu.vector_store %arg3[%c0_30, %c0_31, %c0_32, %c0_33], %49 {strides = array<i32>} : memref<2x2x8x256xbf16, #tpu.memory_space<vmem>>, vector<1x1x8x256xbf16>,
    %50 = arith.extf %1 : vector<4x384xbf16> to vector<4x384xf32>
    %51 = arith.mulf %50, %50 : vector<4x384xf32>
    %c0_34 = arith.constant 0 : index
    %c1_35 = arith.constant 1 : index
    %c0_36 = arith.constant 0 : index
    %c0_37 = arith.constant 0 : index
    %52 = vector.load %arg1[%c0_34, %c1_35, %c0_36, %c0_37] : memref<2x2x4x384xbf16, #tpu.memory_space<vmem>>, vector<1x1x4x384xbf16>
    %53 = vector.shape_cast %52 : vector<1x1x4x384xbf16> to vector<4x384xbf16>
    %c0_38 = arith.constant 0 : index
    %c0_39 = arith.constant 0 : index
    %c0_40 = arith.constant 0 : index
    %54 = vector.load %arg2[%c0_38, %c0_39, %c0_40] : memref<9x8x4xbf16, #tpu.memory_space<vmem>>, vector<1x8x4xbf16>
    %55 = vector.shape_cast %54 : vector<1x8x4xbf16> to vector<8x4xbf16>
    %56 = vector.extract_strided_slice %53 {offsets = [0, 0], sizes = [4, 256], strides = [1, 1]} : vector<4x384xbf16> to vector<4x256xbf16>
    %cst_41 = arith.constant dense<0.000000e+00> : vector<8x256xf32>
    %57 = tpu.matmul %55, %56, %cst_41 {dimension_numbers = #tpu.dot_dimension_numbers<[1], [0], [0], [1], [0, 0, 1, 1], [], []>} : vector<8x4xbf16>, vector<4x256xbf16>, vector<8x256xf32> -> vector<8x256xf32>
    %c1_42 = arith.constant 1 : index
    %c0_43 = arith.constant 0 : index
    %c0_44 = arith.constant 0 : index
    %58 = vector.load %arg2[%c1_42, %c0_43, %c0_44] : memref<9x8x4xbf16, #tpu.memory_space<vmem>>, vector<1x8x4xbf16>
    %59 = vector.shape_cast %58 : vector<1x8x4xbf16> to vector<8x4xbf16>
    %60 = vector.extract_strided_slice %53 {offsets = [0, 1], sizes = [4, 256], strides = [1, 1]} : vector<4x384xbf16> to vector<4x256xbf16>
    %cst_45 = arith.constant dense<0.000000e+00> : vector<8x256xf32>
    %61 = tpu.matmul %59, %60, %cst_45 {dimension_numbers = #tpu.dot_dimension_numbers<[1], [0], [0], [1], [0, 0, 1, 1], [], []>} : vector<8x4xbf16>, vector<4x256xbf16>, vector<8x256xf32> -> vector<8x256xf32>
    %62 = arith.addf %57, %61 : vector<8x256xf32>
    %c2_46 = arith.constant 2 : index
    %c0_47 = arith.constant 0 : index
    %c0_48 = arith.constant 0 : index
    %63 = vector.load %arg2[%c2_46, %c0_47, %c0_48] : memref<9x8x4xbf16, #tpu.memory_space<vmem>>, vector<1x8x4xbf16>
    %64 = vector.shape_cast %63 : vector<1x8x4xbf16> to vector<8x4xbf16>
    %65 = vector.extract_strided_slice %53 {offsets = [0, 2], sizes = [4, 256], strides = [1, 1]} : vector<4x384xbf16> to vector<4x256xbf16>
    %cst_49 = arith.constant dense<0.000000e+00> : vector<8x256xf32>
    %66 = tpu.matmul %64, %65, %cst_49 {dimension_numbers = #tpu.dot_dimension_numbers<[1], [0], [0], [1], [0, 0, 1, 1], [], []>} : vector<8x4xbf16>, vector<4x256xbf16>, vector<8x256xf32> -> vector<8x256xf32>
    %67 = arith.addf %62, %66 : vector<8x256xf32>
    %c3_50 = arith.constant 3 : index
    %c0_51 = arith.constant 0 : index
    %c0_52 = arith.constant 0 : index
    %68 = vector.load %arg2[%c3_50, %c0_51, %c0_52] : memref<9x8x4xbf16, #tpu.memory_space<vmem>>, vector<1x8x4xbf16>
    %69 = vector.shape_cast %68 : vector<1x8x4xbf16> to vector<8x4xbf16>
    %70 = vector.extract_strided_slice %53 {offsets = [0, 16], sizes = [4, 256], strides = [1, 1]} : vector<4x384xbf16> to vector<4x256xbf16>
    %cst_53 = arith.constant dense<0.000000e+00> : vector<8x256xf32>
    %71 = tpu.matmul %69, %70, %cst_53 {dimension_numbers = #tpu.dot_dimension_numbers<[1], [0], [0], [1], [0, 0, 1, 1], [], []>} : vector<8x4xbf16>, vector<4x256xbf16>, vector<8x256xf32> -> vector<8x256xf32>
    %72 = arith.addf %67, %71 : vector<8x256xf32>
    %c4_54 = arith.constant 4 : index
    %c0_55 = arith.constant 0 : index
    %c0_56 = arith.constant 0 : index
    %73 = vector.load %arg2[%c4_54, %c0_55, %c0_56] : memref<9x8x4xbf16, #tpu.memory_space<vmem>>, vector<1x8x4xbf16>
    %74 = vector.shape_cast %73 : vector<1x8x4xbf16> to vector<8x4xbf16>
    %75 = vector.extract_strided_slice %53 {offsets = [0, 17], sizes = [4, 256], strides = [1, 1]} : vector<4x384xbf16> to vector<4x256xbf16>
    %cst_57 = arith.constant dense<0.000000e+00> : vector<8x256xf32>
    %76 = tpu.matmul %74, %75, %cst_57 {dimension_numbers = #tpu.dot_dimension_numbers<[1], [0], [0], [1], [0, 0, 1, 1], [], []>} : vector<8x4xbf16>, vector<4x256xbf16>, vector<8x256xf32> -> vector<8x256xf32>
    %77 = arith.addf %72, %76 : vector<8x256xf32>
    %c5_58 = arith.constant 5 : index
    %c0_59 = arith.constant 0 : index
    %c0_60 = arith.constant 0 : index
    %78 = vector.load %arg2[%c5_58, %c0_59, %c0_60] : memref<9x8x4xbf16, #tpu.memory_space<vmem>>, vector<1x8x4xbf16>
    %79 = vector.shape_cast %78 : vector<1x8x4xbf16> to vector<8x4xbf16>
    %80 = vector.extract_strided_slice %53 {offsets = [0, 18], sizes = [4, 256], strides = [1, 1]} : vector<4x384xbf16> to vector<4x256xbf16>
    %cst_61 = arith.constant dense<0.000000e+00> : vector<8x256xf32>
    %81 = tpu.matmul %79, %80, %cst_61 {dimension_numbers = #tpu.dot_dimension_numbers<[1], [0], [0], [1], [0, 0, 1, 1], [], []>} : vector<8x4xbf16>, vector<4x256xbf16>, vector<8x256xf32> -> vector<8x256xf32>
    %82 = arith.addf %77, %81 : vector<8x256xf32>
    %c6_62 = arith.constant 6 : index
    %c0_63 = arith.constant 0 : index
    %c0_64 = arith.constant 0 : index
    %83 = vector.load %arg2[%c6_62, %c0_63, %c0_64] : memref<9x8x4xbf16, #tpu.memory_space<vmem>>, vector<1x8x4xbf16>
    %84 = vector.shape_cast %83 : vector<1x8x4xbf16> to vector<8x4xbf16>
    %85 = vector.extract_strided_slice %53 {offsets = [0, 32], sizes = [4, 256], strides = [1, 1]} : vector<4x384xbf16> to vector<4x256xbf16>
    %cst_65 = arith.constant dense<0.000000e+00> : vector<8x256xf32>
    %86 = tpu.matmul %84, %85, %cst_65 {dimension_numbers = #tpu.dot_dimension_numbers<[1], [0], [0], [1], [0, 0, 1, 1], [], []>} : vector<8x4xbf16>, vector<4x256xbf16>, vector<8x256xf32> -> vector<8x256xf32>
    %87 = arith.addf %82, %86 : vector<8x256xf32>
    %c7_66 = arith.constant 7 : index
    %c0_67 = arith.constant 0 : index
    %c0_68 = arith.constant 0 : index
    %88 = vector.load %arg2[%c7_66, %c0_67, %c0_68] : memref<9x8x4xbf16, #tpu.memory_space<vmem>>, vector<1x8x4xbf16>
    %89 = vector.shape_cast %88 : vector<1x8x4xbf16> to vector<8x4xbf16>
    %90 = vector.extract_strided_slice %53 {offsets = [0, 33], sizes = [4, 256], strides = [1, 1]} : vector<4x384xbf16> to vector<4x256xbf16>
    %cst_69 = arith.constant dense<0.000000e+00> : vector<8x256xf32>
    %91 = tpu.matmul %89, %90, %cst_69 {dimension_numbers = #tpu.dot_dimension_numbers<[1], [0], [0], [1], [0, 0, 1, 1], [], []>} : vector<8x4xbf16>, vector<4x256xbf16>, vector<8x256xf32> -> vector<8x256xf32>
    %92 = arith.addf %87, %91 : vector<8x256xf32>
    %c8_70 = arith.constant 8 : index
    %c0_71 = arith.constant 0 : index
    %c0_72 = arith.constant 0 : index
    %93 = vector.load %arg2[%c8_70, %c0_71, %c0_72] : memref<9x8x4xbf16, #tpu.memory_space<vmem>>, vector<1x8x4xbf16>
    %94 = vector.shape_cast %93 : vector<1x8x4xbf16> to vector<8x4xbf16>
    %95 = vector.extract_strided_slice %53 {offsets = [0, 34], sizes = [4, 256], strides = [1, 1]} : vector<4x384xbf16> to vector<4x256xbf16>
    %cst_73 = arith.constant dense<0.000000e+00> : vector<8x256xf32>
    %96 = tpu.matmul %94, %95, %cst_73 {dimension_numbers = #tpu.dot_dimension_numbers<[1], [0], [0], [1], [0, 0, 1, 1], [], []>} : vector<8x4xbf16>, vector<4x256xbf16>, vector<8x256xf32> -> vector<8x256xf32>
    %97 = arith.addf %92, %96 : vector<8x256xf32>
    %98 = arith.truncf %97 : vector<8x256xf32> to vector<8x256xbf16>
    %c0_74 = arith.constant 0 : index
    %c1_75 = arith.constant 1 : index
    %c0_76 = arith.constant 0 : index
    %c0_77 = arith.constant 0 : index
    %99 = vector.load %arg3[%c0_74, %c1_75, %c0_76, %c0_77] : memref<2x2x8x256xbf16, #tpu.memory_space<vmem>>, vector<1x1x8x256xbf16>
    %100 = vector.shape_cast %99 : vector<1x1x8x256xbf16> to vector<8x256xbf16>
    %101 = vector.shape_cast %98 : vector<8x256xbf16> to vector<1x1x8x256xbf16>
    tpu.vector_store %arg3[%c0_74, %c1_75, %c0_76, %c0_77], %101 {strides = array<i32>} : memref<2x2x8x256xbf16, #tpu.memory_space<vmem>>, vector<1x1x8x256xbf16>,
    %102 = arith.extf %53 : vector<4x384xbf16> to vector<4x384xf32>
    %103 = arith.mulf %102, %102 : vector<4x384xf32>
    %104 = arith.addf %51, %103 : vector<4x384xf32>
    %105 = math.sqrt %104 : vector<4x384xf32>
    %106 = arith.truncf %105 : vector<4x384xf32> to vector<4x384xbf16>
    %c0_78 = arith.constant 0 : index
    %c0_79 = arith.constant 0 : index
    %c0_80 = arith.constant 0 : index
    %107 = vector.load %arg2[%c0_78, %c0_79, %c0_80] : memref<9x8x4xbf16, #tpu.memory_space<vmem>>, vector<1x8x4xbf16>
    %108 = vector.shape_cast %107 : vector<1x8x4xbf16> to vector<8x4xbf16>
    %109 = vector.extract_strided_slice %106 {offsets = [0, 0], sizes = [4, 256], strides = [1, 1]} : vector<4x384xbf16> to vector<4x256xbf16>
    %cst_81 = arith.constant dense<0.000000e+00> : vector<8x256xf32>
    %110 = tpu.matmul %108, %109, %cst_81 {dimension_numbers = #tpu.dot_dimension_numbers<[1], [0], [0], [1], [0, 0, 1, 1], [], []>} : vector<8x4xbf16>, vector<4x256xbf16>, vector<8x256xf32> -> vector<8x256xf32>
    %c1_82 = arith.constant 1 : index
    %c0_83 = arith.constant 0 : index
    %c0_84 = arith.constant 0 : index
    %111 = vector.load %arg2[%c1_82, %c0_83, %c0_84] : memref<9x8x4xbf16, #tpu.memory_space<vmem>>, vector<1x8x4xbf16>
    %112 = vector.shape_cast %111 : vector<1x8x4xbf16> to vector<8x4xbf16>
    %113 = vector.extract_strided_slice %106 {offsets = [0, 1], sizes = [4, 256], strides = [1, 1]} : vector<4x384xbf16> to vector<4x256xbf16>
    %cst_85 = arith.constant dense<0.000000e+00> : vector<8x256xf32>
    %114 = tpu.matmul %112, %113, %cst_85 {dimension_numbers = #tpu.dot_dimension_numbers<[1], [0], [0], [1], [0, 0, 1, 1], [], []>} : vector<8x4xbf16>, vector<4x256xbf16>, vector<8x256xf32> -> vector<8x256xf32>
    %115 = arith.addf %110, %114 : vector<8x256xf32>
    %c2_86 = arith.constant 2 : index
    %c0_87 = arith.constant 0 : index
    %c0_88 = arith.constant 0 : index
    %116 = vector.load %arg2[%c2_86, %c0_87, %c0_88] : memref<9x8x4xbf16, #tpu.memory_space<vmem>>, vector<1x8x4xbf16>
    %117 = vector.shape_cast %116 : vector<1x8x4xbf16> to vector<8x4xbf16>
    %118 = vector.extract_strided_slice %106 {offsets = [0, 2], sizes = [4, 256], strides = [1, 1]} : vector<4x384xbf16> to vector<4x256xbf16>
    %cst_89 = arith.constant dense<0.000000e+00> : vector<8x256xf32>
    %119 = tpu.matmul %117, %118, %cst_89 {dimension_numbers = #tpu.dot_dimension_numbers<[1], [0], [0], [1], [0, 0, 1, 1], [], []>} : vector<8x4xbf16>, vector<4x256xbf16>, vector<8x256xf32> -> vector<8x256xf32>
    %120 = arith.addf %115, %119 : vector<8x256xf32>
    %c3_90 = arith.constant 3 : index
    %c0_91 = arith.constant 0 : index
    %c0_92 = arith.constant 0 : index
    %121 = vector.load %arg2[%c3_90, %c0_91, %c0_92] : memref<9x8x4xbf16, #tpu.memory_space<vmem>>, vector<1x8x4xbf16>
    %122 = vector.shape_cast %121 : vector<1x8x4xbf16> to vector<8x4xbf16>
    %123 = vector.extract_strided_slice %106 {offsets = [0, 16], sizes = [4, 256], strides = [1, 1]} : vector<4x384xbf16> to vector<4x256xbf16>
    %cst_93 = arith.constant dense<0.000000e+00> : vector<8x256xf32>
    %124 = tpu.matmul %122, %123, %cst_93 {dimension_numbers = #tpu.dot_dimension_numbers<[1], [0], [0], [1], [0, 0, 1, 1], [], []>} : vector<8x4xbf16>, vector<4x256xbf16>, vector<8x256xf32> -> vector<8x256xf32>
    %125 = arith.addf %120, %124 : vector<8x256xf32>
    %c4_94 = arith.constant 4 : index
    %c0_95 = arith.constant 0 : index
    %c0_96 = arith.constant 0 : index
    %126 = vector.load %arg2[%c4_94, %c0_95, %c0_96] : memref<9x8x4xbf16, #tpu.memory_space<vmem>>, vector<1x8x4xbf16>
    %127 = vector.shape_cast %126 : vector<1x8x4xbf16> to vector<8x4xbf16>
    %128 = vector.extract_strided_slice %106 {offsets = [0, 17], sizes = [4, 256], strides = [1, 1]} : vector<4x384xbf16> to vector<4x256xbf16>
    %cst_97 = arith.constant dense<0.000000e+00> : vector<8x256xf32>
    %129 = tpu.matmul %127, %128, %cst_97 {dimension_numbers = #tpu.dot_dimension_numbers<[1], [0], [0], [1], [0, 0, 1, 1], [], []>} : vector<8x4xbf16>, vector<4x256xbf16>, vector<8x256xf32> -> vector<8x256xf32>
    %130 = arith.addf %125, %129 : vector<8x256xf32>
    %c5_98 = arith.constant 5 : index
    %c0_99 = arith.constant 0 : index
    %c0_100 = arith.constant 0 : index
    %131 = vector.load %arg2[%c5_98, %c0_99, %c0_100] : memref<9x8x4xbf16, #tpu.memory_space<vmem>>, vector<1x8x4xbf16>
    %132 = vector.shape_cast %131 : vector<1x8x4xbf16> to vector<8x4xbf16>
    %133 = vector.extract_strided_slice %106 {offsets = [0, 18], sizes = [4, 256], strides = [1, 1]} : vector<4x384xbf16> to vector<4x256xbf16>
    %cst_101 = arith.constant dense<0.000000e+00> : vector<8x256xf32>
    %134 = tpu.matmul %132, %133, %cst_101 {dimension_numbers = #tpu.dot_dimension_numbers<[1], [0], [0], [1], [0, 0, 1, 1], [], []>} : vector<8x4xbf16>, vector<4x256xbf16>, vector<8x256xf32> -> vector<8x256xf32>
    %135 = arith.addf %130, %134 : vector<8x256xf32>
    %c6_102 = arith.constant 6 : index
    %c0_103 = arith.constant 0 : index
    %c0_104 = arith.constant 0 : index
    %136 = vector.load %arg2[%c6_102, %c0_103, %c0_104] : memref<9x8x4xbf16, #tpu.memory_space<vmem>>, vector<1x8x4xbf16>
    %137 = vector.shape_cast %136 : vector<1x8x4xbf16> to vector<8x4xbf16>
    %138 = vector.extract_strided_slice %106 {offsets = [0, 32], sizes = [4, 256], strides = [1, 1]} : vector<4x384xbf16> to vector<4x256xbf16>
    %cst_105 = arith.constant dense<0.000000e+00> : vector<8x256xf32>
    %139 = tpu.matmul %137, %138, %cst_105 {dimension_numbers = #tpu.dot_dimension_numbers<[1], [0], [0], [1], [0, 0, 1, 1], [], []>} : vector<8x4xbf16>, vector<4x256xbf16>, vector<8x256xf32> -> vector<8x256xf32>
    %140 = arith.addf %135, %139 : vector<8x256xf32>
    %c7_106 = arith.constant 7 : index
    %c0_107 = arith.constant 0 : index
    %c0_108 = arith.constant 0 : index
    %141 = vector.load %arg2[%c7_106, %c0_107, %c0_108] : memref<9x8x4xbf16, #tpu.memory_space<vmem>>, vector<1x8x4xbf16>
    %142 = vector.shape_cast %141 : vector<1x8x4xbf16> to vector<8x4xbf16>
    %143 = vector.extract_strided_slice %106 {offsets = [0, 33], sizes = [4, 256], strides = [1, 1]} : vector<4x384xbf16> to vector<4x256xbf16>
    %cst_109 = arith.constant dense<0.000000e+00> : vector<8x256xf32>
    %144 = tpu.matmul %142, %143, %cst_109 {dimension_numbers = #tpu.dot_dimension_numbers<[1], [0], [0], [1], [0, 0, 1, 1], [], []>} : vector<8x4xbf16>, vector<4x256xbf16>, vector<8x256xf32> -> vector<8x256xf32>
    %145 = arith.addf %140, %144 : vector<8x256xf32>
    %c8_110 = arith.constant 8 : index
    %c0_111 = arith.constant 0 : index
    %c0_112 = arith.constant 0 : index
    %146 = vector.load %arg2[%c8_110, %c0_111, %c0_112] : memref<9x8x4xbf16, #tpu.memory_space<vmem>>, vector<1x8x4xbf16>
    %147 = vector.shape_cast %146 : vector<1x8x4xbf16> to vector<8x4xbf16>
    %148 = vector.extract_strided_slice %106 {offsets = [0, 34], sizes = [4, 256], strides = [1, 1]} : vector<4x384xbf16> to vector<4x256xbf16>
    %cst_113 = arith.constant dense<0.000000e+00> : vector<8x256xf32>
    %149 = tpu.matmul %147, %148, %cst_113 {dimension_numbers = #tpu.dot_dimension_numbers<[1], [0], [0], [1], [0, 0, 1, 1], [], []>} : vector<8x4xbf16>, vector<4x256xbf16>, vector<8x256xf32> -> vector<8x256xf32>
    %150 = arith.addf %145, %149 : vector<8x256xf32>
    %151 = arith.truncf %150 : vector<8x256xf32> to vector<8x256xbf16>
    %c0_114 = arith.constant 0 : index
    %c0_115 = arith.constant 0 : index
    %c0_116 = arith.constant 0 : index
    %152 = vector.load %arg4[%c0_114, %c0_115, %c0_116] : memref<2x8x256xbf16, #tpu.memory_space<vmem>>, vector<1x8x256xbf16>
    %153 = vector.shape_cast %152 : vector<1x8x256xbf16> to vector<8x256xbf16>
    %154 = vector.shape_cast %151 : vector<8x256xbf16> to vector<1x8x256xbf16>
    tpu.vector_store %arg4[%c0_114, %c0_115, %c0_116], %154 {strides = array<i32>} : memref<2x8x256xbf16, #tpu.memory_space<vmem>>, vector<1x8x256xbf16>,
    %c1_117 = arith.constant 1 : index
    %c0_118 = arith.constant 0 : index
    %c0_119 = arith.constant 0 : index
    %c0_120 = arith.constant 0 : index
    %155 = vector.load %arg1[%c1_117, %c0_118, %c0_119, %c0_120] : memref<2x2x4x384xbf16, #tpu.memory_space<vmem>>, vector<1x1x4x384xbf16>
    %156 = vector.shape_cast %155 : vector<1x1x4x384xbf16> to vector<4x384xbf16>
    %c0_121 = arith.constant 0 : index
    %c0_122 = arith.constant 0 : index
    %c0_123 = arith.constant 0 : index
    %157 = vector.load %arg2[%c0_121, %c0_122, %c0_123] : memref<9x8x4xbf16, #tpu.memory_space<vmem>>, vector<1x8x4xbf16>
    %158 = vector.shape_cast %157 : vector<1x8x4xbf16> to vector<8x4xbf16>
    %159 = vector.extract_strided_slice %156 {offsets = [0, 0], sizes = [4, 256], strides = [1, 1]} : vector<4x384xbf16> to vector<4x256xbf16>
    %cst_124 = arith.constant dense<0.000000e+00> : vector<8x256xf32>
    %160 = tpu.matmul %158, %159, %cst_124 {dimension_numbers = #tpu.dot_dimension_numbers<[1], [0], [0], [1], [0, 0, 1, 1], [], []>} : vector<8x4xbf16>, vector<4x256xbf16>, vector<8x256xf32> -> vector<8x256xf32>
    %c1_125 = arith.constant 1 : index
    %c0_126 = arith.constant 0 : index
    %c0_127 = arith.constant 0 : index
    %161 = vector.load %arg2[%c1_125, %c0_126, %c0_127] : memref<9x8x4xbf16, #tpu.memory_space<vmem>>, vector<1x8x4xbf16>
    %162 = vector.shape_cast %161 : vector<1x8x4xbf16> to vector<8x4xbf16>
    %163 = vector.extract_strided_slice %156 {offsets = [0, 1], sizes = [4, 256], strides = [1, 1]} : vector<4x384xbf16> to vector<4x256xbf16>
    %cst_128 = arith.constant dense<0.000000e+00> : vector<8x256xf32>
    %164 = tpu.matmul %162, %163, %cst_128 {dimension_numbers = #tpu.dot_dimension_numbers<[1], [0], [0], [1], [0, 0, 1, 1], [], []>} : vector<8x4xbf16>, vector<4x256xbf16>, vector<8x256xf32> -> vector<8x256xf32>
    %165 = arith.addf %160, %164 : vector<8x256xf32>
    %c2_129 = arith.constant 2 : index
    %c0_130 = arith.constant 0 : index
    %c0_131 = arith.constant 0 : index
    %166 = vector.load %arg2[%c2_129, %c0_130, %c0_131] : memref<9x8x4xbf16, #tpu.memory_space<vmem>>, vector<1x8x4xbf16>
    %167 = vector.shape_cast %166 : vector<1x8x4xbf16> to vector<8x4xbf16>
    %168 = vector.extract_strided_slice %156 {offsets = [0, 2], sizes = [4, 256], strides = [1, 1]} : vector<4x384xbf16> to vector<4x256xbf16>
    %cst_132 = arith.constant dense<0.000000e+00> : vector<8x256xf32>
    %169 = tpu.matmul %167, %168, %cst_132 {dimension_numbers = #tpu.dot_dimension_numbers<[1], [0], [0], [1], [0, 0, 1, 1], [], []>} : vector<8x4xbf16>, vector<4x256xbf16>, vector<8x256xf32> -> vector<8x256xf32>
    %170 = arith.addf %165, %169 : vector<8x256xf32>
    %c3_133 = arith.constant 3 : index
    %c0_134 = arith.constant 0 : index
    %c0_135 = arith.constant 0 : index
    %171 = vector.load %arg2[%c3_133, %c0_134, %c0_135] : memref<9x8x4xbf16, #tpu.memory_space<vmem>>, vector<1x8x4xbf16>
    %172 = vector.shape_cast %171 : vector<1x8x4xbf16> to vector<8x4xbf16>
    %173 = vector.extract_strided_slice %156 {offsets = [0, 16], sizes = [4, 256], strides = [1, 1]} : vector<4x384xbf16> to vector<4x256xbf16>
    %cst_136 = arith.constant dense<0.000000e+00> : vector<8x256xf32>
    %174 = tpu.matmul %172, %173, %cst_136 {dimension_numbers = #tpu.dot_dimension_numbers<[1], [0], [0], [1], [0, 0, 1, 1], [], []>} : vector<8x4xbf16>, vector<4x256xbf16>, vector<8x256xf32> -> vector<8x256xf32>
    %175 = arith.addf %170, %174 : vector<8x256xf32>
    %c4_137 = arith.constant 4 : index
    %c0_138 = arith.constant 0 : index
    %c0_139 = arith.constant 0 : index
    %176 = vector.load %arg2[%c4_137, %c0_138, %c0_139] : memref<9x8x4xbf16, #tpu.memory_space<vmem>>, vector<1x8x4xbf16>
    %177 = vector.shape_cast %176 : vector<1x8x4xbf16> to vector<8x4xbf16>
    %178 = vector.extract_strided_slice %156 {offsets = [0, 17], sizes = [4, 256], strides = [1, 1]} : vector<4x384xbf16> to vector<4x256xbf16>
    %cst_140 = arith.constant dense<0.000000e+00> : vector<8x256xf32>
    %179 = tpu.matmul %177, %178, %cst_140 {dimension_numbers = #tpu.dot_dimension_numbers<[1], [0], [0], [1], [0, 0, 1, 1], [], []>} : vector<8x4xbf16>, vector<4x256xbf16>, vector<8x256xf32> -> vector<8x256xf32>
    %180 = arith.addf %175, %179 : vector<8x256xf32>
    %c5_141 = arith.constant 5 : index
    %c0_142 = arith.constant 0 : index
    %c0_143 = arith.constant 0 : index
    %181 = vector.load %arg2[%c5_141, %c0_142, %c0_143] : memref<9x8x4xbf16, #tpu.memory_space<vmem>>, vector<1x8x4xbf16>
    %182 = vector.shape_cast %181 : vector<1x8x4xbf16> to vector<8x4xbf16>
    %183 = vector.extract_strided_slice %156 {offsets = [0, 18], sizes = [4, 256], strides = [1, 1]} : vector<4x384xbf16> to vector<4x256xbf16>
    %cst_144 = arith.constant dense<0.000000e+00> : vector<8x256xf32>
    %184 = tpu.matmul %182, %183, %cst_144 {dimension_numbers = #tpu.dot_dimension_numbers<[1], [0], [0], [1], [0, 0, 1, 1], [], []>} : vector<8x4xbf16>, vector<4x256xbf16>, vector<8x256xf32> -> vector<8x256xf32>
    %185 = arith.addf %180, %184 : vector<8x256xf32>
    %c6_145 = arith.constant 6 : index
    %c0_146 = arith.constant 0 : index
    %c0_147 = arith.constant 0 : index
    %186 = vector.load %arg2[%c6_145, %c0_146, %c0_147] : memref<9x8x4xbf16, #tpu.memory_space<vmem>>, vector<1x8x4xbf16>
    %187 = vector.shape_cast %186 : vector<1x8x4xbf16> to vector<8x4xbf16>
    %188 = vector.extract_strided_slice %156 {offsets = [0, 32], sizes = [4, 256], strides = [1, 1]} : vector<4x384xbf16> to vector<4x256xbf16>
    %cst_148 = arith.constant dense<0.000000e+00> : vector<8x256xf32>
    %189 = tpu.matmul %187, %188, %cst_148 {dimension_numbers = #tpu.dot_dimension_numbers<[1], [0], [0], [1], [0, 0, 1, 1], [], []>} : vector<8x4xbf16>, vector<4x256xbf16>, vector<8x256xf32> -> vector<8x256xf32>
    %190 = arith.addf %185, %189 : vector<8x256xf32>
    %c7_149 = arith.constant 7 : index
    %c0_150 = arith.constant 0 : index
    %c0_151 = arith.constant 0 : index
    %191 = vector.load %arg2[%c7_149, %c0_150, %c0_151] : memref<9x8x4xbf16, #tpu.memory_space<vmem>>, vector<1x8x4xbf16>
    %192 = vector.shape_cast %191 : vector<1x8x4xbf16> to vector<8x4xbf16>
    %193 = vector.extract_strided_slice %156 {offsets = [0, 33], sizes = [4, 256], strides = [1, 1]} : vector<4x384xbf16> to vector<4x256xbf16>
    %cst_152 = arith.constant dense<0.000000e+00> : vector<8x256xf32>
    %194 = tpu.matmul %192, %193, %cst_152 {dimension_numbers = #tpu.dot_dimension_numbers<[1], [0], [0], [1], [0, 0, 1, 1], [], []>} : vector<8x4xbf16>, vector<4x256xbf16>, vector<8x256xf32> -> vector<8x256xf32>
    %195 = arith.addf %190, %194 : vector<8x256xf32>
    %c8_153 = arith.constant 8 : index
    %c0_154 = arith.constant 0 : index
    %c0_155 = arith.constant 0 : index
    %196 = vector.load %arg2[%c8_153, %c0_154, %c0_155] : memref<9x8x4xbf16, #tpu.memory_space<vmem>>, vector<1x8x4xbf16>
    %197 = vector.shape_cast %196 : vector<1x8x4xbf16> to vector<8x4xbf16>
    %198 = vector.extract_strided_slice %156 {offsets = [0, 34], sizes = [4, 256], strides = [1, 1]} : vector<4x384xbf16> to vector<4x256xbf16>
    %cst_156 = arith.constant dense<0.000000e+00> : vector<8x256xf32>
    %199 = tpu.matmul %197, %198, %cst_156 {dimension_numbers = #tpu.dot_dimension_numbers<[1], [0], [0], [1], [0, 0, 1, 1], [], []>} : vector<8x4xbf16>, vector<4x256xbf16>, vector<8x256xf32> -> vector<8x256xf32>
    %200 = arith.addf %195, %199 : vector<8x256xf32>
    %201 = arith.truncf %200 : vector<8x256xf32> to vector<8x256xbf16>
    %c1_157 = arith.constant 1 : index
    %c0_158 = arith.constant 0 : index
    %c0_159 = arith.constant 0 : index
    %c0_160 = arith.constant 0 : index
    %202 = vector.load %arg3[%c1_157, %c0_158, %c0_159, %c0_160] : memref<2x2x8x256xbf16, #tpu.memory_space<vmem>>, vector<1x1x8x256xbf16>
    %203 = vector.shape_cast %202 : vector<1x1x8x256xbf16> to vector<8x256xbf16>
    %204 = vector.shape_cast %201 : vector<8x256xbf16> to vector<1x1x8x256xbf16>
    tpu.vector_store %arg3[%c1_157, %c0_158, %c0_159, %c0_160], %204 {strides = array<i32>} : memref<2x2x8x256xbf16, #tpu.memory_space<vmem>>, vector<1x1x8x256xbf16>,
    %205 = arith.extf %156 : vector<4x384xbf16> to vector<4x384xf32>
    %206 = arith.mulf %205, %205 : vector<4x384xf32>
    %c1_161 = arith.constant 1 : index
    %c1_162 = arith.constant 1 : index
    %c0_163 = arith.constant 0 : index
    %c0_164 = arith.constant 0 : index
    %207 = vector.load %arg1[%c1_161, %c1_162, %c0_163, %c0_164] : memref<2x2x4x384xbf16, #tpu.memory_space<vmem>>, vector<1x1x4x384xbf16>
    %208 = vector.shape_cast %207 : vector<1x1x4x384xbf16> to vector<4x384xbf16>
    %c0_165 = arith.constant 0 : index
    %c0_166 = arith.constant 0 : index
    %c0_167 = arith.constant 0 : index
    %209 = vector.load %arg2[%c0_165, %c0_166, %c0_167] : memref<9x8x4xbf16, #tpu.memory_space<vmem>>, vector<1x8x4xbf16>
    %210 = vector.shape_cast %209 : vector<1x8x4xbf16> to vector<8x4xbf16>
    %211 = vector.extract_strided_slice %208 {offsets = [0, 0], sizes = [4, 256], strides = [1, 1]} : vector<4x384xbf16> to vector<4x256xbf16>
    %cst_168 = arith.constant dense<0.000000e+00> : vector<8x256xf32>
    %212 = tpu.matmul %210, %211, %cst_168 {dimension_numbers = #tpu.dot_dimension_numbers<[1], [0], [0], [1], [0, 0, 1, 1], [], []>} : vector<8x4xbf16>, vector<4x256xbf16>, vector<8x256xf32> -> vector<8x256xf32>
    %c1_169 = arith.constant 1 : index
    %c0_170 = arith.constant 0 : index
    %c0_171 = arith.constant 0 : index
    %213 = vector.load %arg2[%c1_169, %c0_170, %c0_171] : memref<9x8x4xbf16, #tpu.memory_space<vmem>>, vector<1x8x4xbf16>
    %214 = vector.shape_cast %213 : vector<1x8x4xbf16> to vector<8x4xbf16>
    %215 = vector.extract_strided_slice %208 {offsets = [0, 1], sizes = [4, 256], strides = [1, 1]} : vector<4x384xbf16> to vector<4x256xbf16>
    %cst_172 = arith.constant dense<0.000000e+00> : vector<8x256xf32>
    %216 = tpu.matmul %214, %215, %cst_172 {dimension_numbers = #tpu.dot_dimension_numbers<[1], [0], [0], [1], [0, 0, 1, 1], [], []>} : vector<8x4xbf16>, vector<4x256xbf16>, vector<8x256xf32> -> vector<8x256xf32>
    %217 = arith.addf %212, %216 : vector<8x256xf32>
    %c2_173 = arith.constant 2 : index
    %c0_174 = arith.constant 0 : index
    %c0_175 = arith.constant 0 : index
    %218 = vector.load %arg2[%c2_173, %c0_174, %c0_175] : memref<9x8x4xbf16, #tpu.memory_space<vmem>>, vector<1x8x4xbf16>
    %219 = vector.shape_cast %218 : vector<1x8x4xbf16> to vector<8x4xbf16>
    %220 = vector.extract_strided_slice %208 {offsets = [0, 2], sizes = [4, 256], strides = [1, 1]} : vector<4x384xbf16> to vector<4x256xbf16>
    %cst_176 = arith.constant dense<0.000000e+00> : vector<8x256xf32>
    %221 = tpu.matmul %219, %220, %cst_176 {dimension_numbers = #tpu.dot_dimension_numbers<[1], [0], [0], [1], [0, 0, 1, 1], [], []>} : vector<8x4xbf16>, vector<4x256xbf16>, vector<8x256xf32> -> vector<8x256xf32>
    %222 = arith.addf %217, %221 : vector<8x256xf32>
    %c3_177 = arith.constant 3 : index
    %c0_178 = arith.constant 0 : index
    %c0_179 = arith.constant 0 : index
    %223 = vector.load %arg2[%c3_177, %c0_178, %c0_179] : memref<9x8x4xbf16, #tpu.memory_space<vmem>>, vector<1x8x4xbf16>
    %224 = vector.shape_cast %223 : vector<1x8x4xbf16> to vector<8x4xbf16>
    %225 = vector.extract_strided_slice %208 {offsets = [0, 16], sizes = [4, 256], strides = [1, 1]} : vector<4x384xbf16> to vector<4x256xbf16>
    %cst_180 = arith.constant dense<0.000000e+00> : vector<8x256xf32>
    %226 = tpu.matmul %224, %225, %cst_180 {dimension_numbers = #tpu.dot_dimension_numbers<[1], [0], [0], [1], [0, 0, 1, 1], [], []>} : vector<8x4xbf16>, vector<4x256xbf16>, vector<8x256xf32> -> vector<8x256xf32>
    %227 = arith.addf %222, %226 : vector<8x256xf32>
    %c4_181 = arith.constant 4 : index
    %c0_182 = arith.constant 0 : index
    %c0_183 = arith.constant 0 : index
    %228 = vector.load %arg2[%c4_181, %c0_182, %c0_183] : memref<9x8x4xbf16, #tpu.memory_space<vmem>>, vector<1x8x4xbf16>
    %229 = vector.shape_cast %228 : vector<1x8x4xbf16> to vector<8x4xbf16>
    %230 = vector.extract_strided_slice %208 {offsets = [0, 17], sizes = [4, 256], strides = [1, 1]} : vector<4x384xbf16> to vector<4x256xbf16>
    %cst_184 = arith.constant dense<0.000000e+00> : vector<8x256xf32>
    %231 = tpu.matmul %229, %230, %cst_184 {dimension_numbers = #tpu.dot_dimension_numbers<[1], [0], [0], [1], [0, 0, 1, 1], [], []>} : vector<8x4xbf16>, vector<4x256xbf16>, vector<8x256xf32> -> vector<8x256xf32>
    %232 = arith.addf %227, %231 : vector<8x256xf32>
    %c5_185 = arith.constant 5 : index
    %c0_186 = arith.constant 0 : index
    %c0_187 = arith.constant 0 : index
    %233 = vector.load %arg2[%c5_185, %c0_186, %c0_187] : memref<9x8x4xbf16, #tpu.memory_space<vmem>>, vector<1x8x4xbf16>
    %234 = vector.shape_cast %233 : vector<1x8x4xbf16> to vector<8x4xbf16>
    %235 = vector.extract_strided_slice %208 {offsets = [0, 18], sizes = [4, 256], strides = [1, 1]} : vector<4x384xbf16> to vector<4x256xbf16>
    %cst_188 = arith.constant dense<0.000000e+00> : vector<8x256xf32>
    %236 = tpu.matmul %234, %235, %cst_188 {dimension_numbers = #tpu.dot_dimension_numbers<[1], [0], [0], [1], [0, 0, 1, 1], [], []>} : vector<8x4xbf16>, vector<4x256xbf16>, vector<8x256xf32> -> vector<8x256xf32>
    %237 = arith.addf %232, %236 : vector<8x256xf32>
    %c6_189 = arith.constant 6 : index
    %c0_190 = arith.constant 0 : index
    %c0_191 = arith.constant 0 : index
    %238 = vector.load %arg2[%c6_189, %c0_190, %c0_191] : memref<9x8x4xbf16, #tpu.memory_space<vmem>>, vector<1x8x4xbf16>
    %239 = vector.shape_cast %238 : vector<1x8x4xbf16> to vector<8x4xbf16>
    %240 = vector.extract_strided_slice %208 {offsets = [0, 32], sizes = [4, 256], strides = [1, 1]} : vector<4x384xbf16> to vector<4x256xbf16>
    %cst_192 = arith.constant dense<0.000000e+00> : vector<8x256xf32>
    %241 = tpu.matmul %239, %240, %cst_192 {dimension_numbers = #tpu.dot_dimension_numbers<[1], [0], [0], [1], [0, 0, 1, 1], [], []>} : vector<8x4xbf16>, vector<4x256xbf16>, vector<8x256xf32> -> vector<8x256xf32>
    %242 = arith.addf %237, %241 : vector<8x256xf32>
    %c7_193 = arith.constant 7 : index
    %c0_194 = arith.constant 0 : index
    %c0_195 = arith.constant 0 : index
    %243 = vector.load %arg2[%c7_193, %c0_194, %c0_195] : memref<9x8x4xbf16, #tpu.memory_space<vmem>>, vector<1x8x4xbf16>
    %244 = vector.shape_cast %243 : vector<1x8x4xbf16> to vector<8x4xbf16>
    %245 = vector.extract_strided_slice %208 {offsets = [0, 33], sizes = [4, 256], strides = [1, 1]} : vector<4x384xbf16> to vector<4x256xbf16>
    %cst_196 = arith.constant dense<0.000000e+00> : vector<8x256xf32>
    %246 = tpu.matmul %244, %245, %cst_196 {dimension_numbers = #tpu.dot_dimension_numbers<[1], [0], [0], [1], [0, 0, 1, 1], [], []>} : vector<8x4xbf16>, vector<4x256xbf16>, vector<8x256xf32> -> vector<8x256xf32>
    %247 = arith.addf %242, %246 : vector<8x256xf32>
    %c8_197 = arith.constant 8 : index
    %c0_198 = arith.constant 0 : index
    %c0_199 = arith.constant 0 : index
    %248 = vector.load %arg2[%c8_197, %c0_198, %c0_199] : memref<9x8x4xbf16, #tpu.memory_space<vmem>>, vector<1x8x4xbf16>
    %249 = vector.shape_cast %248 : vector<1x8x4xbf16> to vector<8x4xbf16>
    %250 = vector.extract_strided_slice %208 {offsets = [0, 34], sizes = [4, 256], strides = [1, 1]} : vector<4x384xbf16> to vector<4x256xbf16>
    %cst_200 = arith.constant dense<0.000000e+00> : vector<8x256xf32>
    %251 = tpu.matmul %249, %250, %cst_200 {dimension_numbers = #tpu.dot_dimension_numbers<[1], [0], [0], [1], [0, 0, 1, 1], [], []>} : vector<8x4xbf16>, vector<4x256xbf16>, vector<8x256xf32> -> vector<8x256xf32>
    %252 = arith.addf %247, %251 : vector<8x256xf32>
    %253 = arith.truncf %252 : vector<8x256xf32> to vector<8x256xbf16>
    %c1_201 = arith.constant 1 : index
    %c1_202 = arith.constant 1 : index
    %c0_203 = arith.constant 0 : index
    %c0_204 = arith.constant 0 : index
    %254 = vector.load %arg3[%c1_201, %c1_202, %c0_203, %c0_204] : memref<2x2x8x256xbf16, #tpu.memory_space<vmem>>, vector<1x1x8x256xbf16>
    %255 = vector.shape_cast %254 : vector<1x1x8x256xbf16> to vector<8x256xbf16>
    %256 = vector.shape_cast %253 : vector<8x256xbf16> to vector<1x1x8x256xbf16>
    tpu.vector_store %arg3[%c1_201, %c1_202, %c0_203, %c0_204], %256 {strides = array<i32>} : memref<2x2x8x256xbf16, #tpu.memory_space<vmem>>, vector<1x1x8x256xbf16>,
    %257 = arith.extf %208 : vector<4x384xbf16> to vector<4x384xf32>
    %258 = arith.mulf %257, %257 : vector<4x384xf32>
    %259 = arith.addf %206, %258 : vector<4x384xf32>
    %260 = math.sqrt %259 : vector<4x384xf32>
    %261 = arith.truncf %260 : vector<4x384xf32> to vector<4x384xbf16>
    %c0_205 = arith.constant 0 : index
    %c0_206 = arith.constant 0 : index
    %c0_207 = arith.constant 0 : index
    %262 = vector.load %arg2[%c0_205, %c0_206, %c0_207] : memref<9x8x4xbf16, #tpu.memory_space<vmem>>, vector<1x8x4xbf16>
    %263 = vector.shape_cast %262 : vector<1x8x4xbf16> to vector<8x4xbf16>
    %264 = vector.extract_strided_slice %261 {offsets = [0, 0], sizes = [4, 256], strides = [1, 1]} : vector<4x384xbf16> to vector<4x256xbf16>
    %cst_208 = arith.constant dense<0.000000e+00> : vector<8x256xf32>
    %265 = tpu.matmul %263, %264, %cst_208 {dimension_numbers = #tpu.dot_dimension_numbers<[1], [0], [0], [1], [0, 0, 1, 1], [], []>} : vector<8x4xbf16>, vector<4x256xbf16>, vector<8x256xf32> -> vector<8x256xf32>
    %c1_209 = arith.constant 1 : index
    %c0_210 = arith.constant 0 : index
    %c0_211 = arith.constant 0 : index
    %266 = vector.load %arg2[%c1_209, %c0_210, %c0_211] : memref<9x8x4xbf16, #tpu.memory_space<vmem>>, vector<1x8x4xbf16>
    %267 = vector.shape_cast %266 : vector<1x8x4xbf16> to vector<8x4xbf16>
    %268 = vector.extract_strided_slice %261 {offsets = [0, 1], sizes = [4, 256], strides = [1, 1]} : vector<4x384xbf16> to vector<4x256xbf16>
    %cst_212 = arith.constant dense<0.000000e+00> : vector<8x256xf32>
    %269 = tpu.matmul %267, %268, %cst_212 {dimension_numbers = #tpu.dot_dimension_numbers<[1], [0], [0], [1], [0, 0, 1, 1], [], []>} : vector<8x4xbf16>, vector<4x256xbf16>, vector<8x256xf32> -> vector<8x256xf32>
    %270 = arith.addf %265, %269 : vector<8x256xf32>
    %c2_213 = arith.constant 2 : index
    %c0_214 = arith.constant 0 : index
    %c0_215 = arith.constant 0 : index
    %271 = vector.load %arg2[%c2_213, %c0_214, %c0_215] : memref<9x8x4xbf16, #tpu.memory_space<vmem>>, vector<1x8x4xbf16>
    %272 = vector.shape_cast %271 : vector<1x8x4xbf16> to vector<8x4xbf16>
    %273 = vector.extract_strided_slice %261 {offsets = [0, 2], sizes = [4, 256], strides = [1, 1]} : vector<4x384xbf16> to vector<4x256xbf16>
    %cst_216 = arith.constant dense<0.000000e+00> : vector<8x256xf32>
    %274 = tpu.matmul %272, %273, %cst_216 {dimension_numbers = #tpu.dot_dimension_numbers<[1], [0], [0], [1], [0, 0, 1, 1], [], []>} : vector<8x4xbf16>, vector<4x256xbf16>, vector<8x256xf32> -> vector<8x256xf32>
    %275 = arith.addf %270, %274 : vector<8x256xf32>
    %c3_217 = arith.constant 3 : index
    %c0_218 = arith.constant 0 : index
    %c0_219 = arith.constant 0 : index
    %276 = vector.load %arg2[%c3_217, %c0_218, %c0_219] : memref<9x8x4xbf16, #tpu.memory_space<vmem>>, vector<1x8x4xbf16>
    %277 = vector.shape_cast %276 : vector<1x8x4xbf16> to vector<8x4xbf16>
    %278 = vector.extract_strided_slice %261 {offsets = [0, 16], sizes = [4, 256], strides = [1, 1]} : vector<4x384xbf16> to vector<4x256xbf16>
    %cst_220 = arith.constant dense<0.000000e+00> : vector<8x256xf32>
    %279 = tpu.matmul %277, %278, %cst_220 {dimension_numbers = #tpu.dot_dimension_numbers<[1], [0], [0], [1], [0, 0, 1, 1], [], []>} : vector<8x4xbf16>, vector<4x256xbf16>, vector<8x256xf32> -> vector<8x256xf32>
    %280 = arith.addf %275, %279 : vector<8x256xf32>
    %c4_221 = arith.constant 4 : index
    %c0_222 = arith.constant 0 : index
    %c0_223 = arith.constant 0 : index
    %281 = vector.load %arg2[%c4_221, %c0_222, %c0_223] : memref<9x8x4xbf16, #tpu.memory_space<vmem>>, vector<1x8x4xbf16>
    %282 = vector.shape_cast %281 : vector<1x8x4xbf16> to vector<8x4xbf16>
    %283 = vector.extract_strided_slice %261 {offsets = [0, 17], sizes = [4, 256], strides = [1, 1]} : vector<4x384xbf16> to vector<4x256xbf16>
    %cst_224 = arith.constant dense<0.000000e+00> : vector<8x256xf32>
    %284 = tpu.matmul %282, %283, %cst_224 {dimension_numbers = #tpu.dot_dimension_numbers<[1], [0], [0], [1], [0, 0, 1, 1], [], []>} : vector<8x4xbf16>, vector<4x256xbf16>, vector<8x256xf32> -> vector<8x256xf32>
    %285 = arith.addf %280, %284 : vector<8x256xf32>
    %c5_225 = arith.constant 5 : index
    %c0_226 = arith.constant 0 : index
    %c0_227 = arith.constant 0 : index
    %286 = vector.load %arg2[%c5_225, %c0_226, %c0_227] : memref<9x8x4xbf16, #tpu.memory_space<vmem>>, vector<1x8x4xbf16>
    %287 = vector.shape_cast %286 : vector<1x8x4xbf16> to vector<8x4xbf16>
    %288 = vector.extract_strided_slice %261 {offsets = [0, 18], sizes = [4, 256], strides = [1, 1]} : vector<4x384xbf16> to vector<4x256xbf16>
    %cst_228 = arith.constant dense<0.000000e+00> : vector<8x256xf32>
    %289 = tpu.matmul %287, %288, %cst_228 {dimension_numbers = #tpu.dot_dimension_numbers<[1], [0], [0], [1], [0, 0, 1, 1], [], []>} : vector<8x4xbf16>, vector<4x256xbf16>, vector<8x256xf32> -> vector<8x256xf32>
    %290 = arith.addf %285, %289 : vector<8x256xf32>
    %c6_229 = arith.constant 6 : index
    %c0_230 = arith.constant 0 : index
    %c0_231 = arith.constant 0 : index
    %291 = vector.load %arg2[%c6_229, %c0_230, %c0_231] : memref<9x8x4xbf16, #tpu.memory_space<vmem>>, vector<1x8x4xbf16>
    %292 = vector.shape_cast %291 : vector<1x8x4xbf16> to vector<8x4xbf16>
    %293 = vector.extract_strided_slice %261 {offsets = [0, 32], sizes = [4, 256], strides = [1, 1]} : vector<4x384xbf16> to vector<4x256xbf16>
    %cst_232 = arith.constant dense<0.000000e+00> : vector<8x256xf32>
    %294 = tpu.matmul %292, %293, %cst_232 {dimension_numbers = #tpu.dot_dimension_numbers<[1], [0], [0], [1], [0, 0, 1, 1], [], []>} : vector<8x4xbf16>, vector<4x256xbf16>, vector<8x256xf32> -> vector<8x256xf32>
    %295 = arith.addf %290, %294 : vector<8x256xf32>
    %c7_233 = arith.constant 7 : index
    %c0_234 = arith.constant 0 : index
    %c0_235 = arith.constant 0 : index
    %296 = vector.load %arg2[%c7_233, %c0_234, %c0_235] : memref<9x8x4xbf16, #tpu.memory_space<vmem>>, vector<1x8x4xbf16>
    %297 = vector.shape_cast %296 : vector<1x8x4xbf16> to vector<8x4xbf16>
    %298 = vector.extract_strided_slice %261 {offsets = [0, 33], sizes = [4, 256], strides = [1, 1]} : vector<4x384xbf16> to vector<4x256xbf16>
    %cst_236 = arith.constant dense<0.000000e+00> : vector<8x256xf32>
    %299 = tpu.matmul %297, %298, %cst_236 {dimension_numbers = #tpu.dot_dimension_numbers<[1], [0], [0], [1], [0, 0, 1, 1], [], []>} : vector<8x4xbf16>, vector<4x256xbf16>, vector<8x256xf32> -> vector<8x256xf32>
    %300 = arith.addf %295, %299 : vector<8x256xf32>
    %c8_237 = arith.constant 8 : index
    %c0_238 = arith.constant 0 : index
    %c0_239 = arith.constant 0 : index
    %301 = vector.load %arg2[%c8_237, %c0_238, %c0_239] : memref<9x8x4xbf16, #tpu.memory_space<vmem>>, vector<1x8x4xbf16>
    %302 = vector.shape_cast %301 : vector<1x8x4xbf16> to vector<8x4xbf16>
    %303 = vector.extract_strided_slice %261 {offsets = [0, 34], sizes = [4, 256], strides = [1, 1]} : vector<4x384xbf16> to vector<4x256xbf16>
    %cst_240 = arith.constant dense<0.000000e+00> : vector<8x256xf32>
    %304 = tpu.matmul %302, %303, %cst_240 {dimension_numbers = #tpu.dot_dimension_numbers<[1], [0], [0], [1], [0, 0, 1, 1], [], []>} : vector<8x4xbf16>, vector<4x256xbf16>, vector<8x256xf32> -> vector<8x256xf32>
    %305 = arith.addf %300, %304 : vector<8x256xf32>
    %306 = arith.truncf %305 : vector<8x256xf32> to vector<8x256xbf16>
    %c1_241 = arith.constant 1 : index
    %c0_242 = arith.constant 0 : index
    %c0_243 = arith.constant 0 : index
    %307 = vector.load %arg4[%c1_241, %c0_242, %c0_243] : memref<2x8x256xbf16, #tpu.memory_space<vmem>>, vector<1x8x256xbf16>
    %308 = vector.shape_cast %307 : vector<1x8x256xbf16> to vector<8x256xbf16>
    %309 = vector.shape_cast %306 : vector<8x256xbf16> to vector<1x8x256xbf16>
    tpu.vector_store %arg4[%c1_241, %c0_242, %c0_243], %309 {strides = array<i32>} : memref<2x8x256xbf16, #tpu.memory_space<vmem>>, vector<1x8x256xbf16>,
    return
  }
  func.func @transform_0(%arg0: i32) -> (i32, i32, i32, i32) {
    %c0_i32 = arith.constant 0 : i32
    %c0_i32_0 = arith.constant 0 : i32
    %c0_i32_1 = arith.constant 0 : i32
    %c0_i32_2 = arith.constant 0 : i32
    return %arg0, %c0_i32, %c0_i32_0, %c0_i32_1 : i32, i32, i32, i32
  }
  func.func @transform_1(%arg0: i32) -> (i32, i32, i32) {
    %c0_i32 = arith.constant 0 : i32
    %c0_i32_0 = arith.constant 0 : i32
    %c0_i32_1 = arith.constant 0 : i32
    %c0_i32_2 = arith.constant 0 : i32
    return %c0_i32, %c0_i32_0, %c0_i32_1 : i32, i32, i32
  }
  func.func @transform_2(%arg0: i32) -> (i32, i32, i32, i32) {
    %c0_i32 = arith.constant 0 : i32
    %c0_i32_0 = arith.constant 0 : i32
    %c0_i32_1 = arith.constant 0 : i32
    %c0_i32_2 = arith.constant 0 : i32
    return %arg0, %c0_i32, %c0_i32_0, %c0_i32_1 : i32, i32, i32, i32
  }
  func.func @transform_3(%arg0: i32) -> (i32, i32, i32) {
    %c0_i32 = arith.constant 0 : i32
    %c0_i32_0 = arith.constant 0 : i32
    %c0_i32_1 = arith.constant 0 : i32
    return %arg0, %c0_i32, %c0_i32_0 : i32, i32, i32
  }
}

module attributes {stable_mosaic.version = 11 : i64} {
  func.func @_rotating_post_kernel(%arg0: i32, %arg1: i32, %arg2: memref<1x2x8x256xbf16, #tpu.memory_space<vmem>>, %arg3: memref<1x8x256xbf16, #tpu.memory_space<vmem>>, %arg4: memref<2x8x1xf32, #tpu.memory_space<vmem>>, %arg5: memref<8x1xf32, #tpu.memory_space<vmem>>, %arg6: memref<8x1xf32, #tpu.memory_space<vmem>>, %arg7: memref<1x2x8x256xf32, #tpu.memory_space<vmem>>) attributes {dimension_semantics = [#tpu.dimension_semantics<parallel>, #tpu.dimension_semantics<parallel>], iteration_bounds = array<i64: 2, 1>, scalar_prefetch = 0 : i64, scratch_operands = 0 : i64, tpu.core_type = #tpu.core_type<tc>, window_params = [{transform_indices = @transform_0, window_bounds = array<i64: 1, 2, 8, 256>}, {transform_indices = @transform_1, window_bounds = array<i64: 1, 8, 256>}, {pipeline_mode = #tpu.pipeline_mode<synchronous>, transform_indices = @transform_2, window_bounds = array<i64: 2, 8, 1>}, {pipeline_mode = #tpu.pipeline_mode<synchronous>, transform_indices = @transform_3, window_bounds = array<i64: 8, 1>}, {pipeline_mode = #tpu.pipeline_mode<synchronous>, transform_indices = @transform_4, window_bounds = array<i64: 8, 1>}, {transform_indices = @transform_5, window_bounds = array<i64: 1, 2, 8, 256>}]} {
    %c0 = arith.constant 0 : index
    %c0_0 = arith.constant 0 : index
    %c0_1 = arith.constant 0 : index
    %c0_2 = arith.constant 0 : index
    %0 = vector.load %arg2[%c0, %c0_0, %c0_1, %c0_2] : memref<1x2x8x256xbf16, #tpu.memory_space<vmem>>, vector<1x2x8x256xbf16>
    %1 = vector.shape_cast %0 : vector<1x2x8x256xbf16> to vector<2x8x256xbf16>
    %2 = arith.extf %1 : vector<2x8x256xbf16> to vector<2x8x256xf32>
    %c0_3 = arith.constant 0 : index
    %c0_4 = arith.constant 0 : index
    %c0_5 = arith.constant 0 : index
    %3 = vector.load %arg3[%c0_3, %c0_4, %c0_5] : memref<1x8x256xbf16, #tpu.memory_space<vmem>>, vector<1x8x256xbf16>
    %4 = vector.shape_cast %3 : vector<1x8x256xbf16> to vector<8x256xbf16>
    %5 = arith.extf %4 : vector<8x256xbf16> to vector<8x256xf32>
    %c0_6 = arith.constant 0 : index
    %c0_7 = arith.constant 0 : index
    %c0_8 = arith.constant 0 : index
    %6 = vector.load %arg4[%c0_6, %c0_7, %c0_8] : memref<2x8x1xf32, #tpu.memory_space<vmem>>, vector<2x8x1xf32>
    %7 = vector.broadcast %6 : vector<2x8x1xf32> to vector<2x8x256xf32>
    %8 = arith.addf %2, %7 : vector<2x8x256xf32>
    %9 = arith.mulf %2, %2 : vector<2x8x256xf32>
    %cst = arith.constant dense<0.000000e+00> : vector<8x256xf32>
    %10 = vector.multi_reduction <add>, %9, %cst [0] : vector<2x8x256xf32> to vector<8x256xf32>
    %11 = math.sqrt %10 : vector<8x256xf32>
    %12 = arith.addf %11, %5 : vector<8x256xf32>
    %cst_9 = arith.constant 5.000000e-01 : f32
    %13 = vector.broadcast %cst_9 : f32 to vector<8x256xf32>
    %14 = arith.mulf %13, %12 : vector<8x256xf32>
    %c0_10 = arith.constant 0 : index
    %c0_11 = arith.constant 0 : index
    %15 = vector.load %arg5[%c0_10, %c0_11] : memref<8x1xf32, #tpu.memory_space<vmem>>, vector<8x1xf32>
    %16 = vector.broadcast %15 : vector<8x1xf32> to vector<8x256xf32>
    %17 = arith.mulf %14, %16 : vector<8x256xf32>
    %c0_12 = arith.constant 0 : index
    %c0_13 = arith.constant 0 : index
    %18 = vector.load %arg6[%c0_12, %c0_13] : memref<8x1xf32, #tpu.memory_space<vmem>>, vector<8x1xf32>
    %19 = vector.broadcast %18 : vector<8x1xf32> to vector<8x256xf32>
    %20 = arith.addf %17, %19 : vector<8x256xf32>
    %cst_14 = arith.constant 0.000000e+00 : f32
    %21 = vector.broadcast %cst_14 : f32 to vector<8x256xf32>
    %22 = arith.maximumf %20, %21 : vector<8x256xf32>
    %23 = arith.mulf %8, %8 : vector<2x8x256xf32>
    %cst_15 = arith.constant dense<0.000000e+00> : vector<8x256xf32>
    %24 = vector.multi_reduction <add>, %23, %cst_15 [0] : vector<2x8x256xf32> to vector<8x256xf32>
    %cst_16 = arith.constant 9.99999996E-13 : f32
    %25 = vector.broadcast %cst_16 : f32 to vector<8x256xf32>
    %26 = arith.addf %24, %25 : vector<8x256xf32>
    %27 = math.rsqrt %26 : vector<8x256xf32>
    %28 = arith.mulf %27, %22 : vector<8x256xf32>
    %29 = vector.shape_cast %28 : vector<8x256xf32> to vector<1x8x256xf32>
    %30 = vector.broadcast %29 : vector<1x8x256xf32> to vector<2x8x256xf32>
    %31 = arith.mulf %8, %30 : vector<2x8x256xf32>
    %c0_17 = arith.constant 0 : index
    %c0_18 = arith.constant 0 : index
    %c0_19 = arith.constant 0 : index
    %c0_20 = arith.constant 0 : index
    %32 = vector.load %arg7[%c0_17, %c0_18, %c0_19, %c0_20] : memref<1x2x8x256xf32, #tpu.memory_space<vmem>>, vector<1x2x8x256xf32>
    %33 = vector.shape_cast %32 : vector<1x2x8x256xf32> to vector<2x8x256xf32>
    %34 = vector.shape_cast %31 : vector<2x8x256xf32> to vector<1x2x8x256xf32>
    tpu.vector_store %arg7[%c0_17, %c0_18, %c0_19, %c0_20], %34 {strides = array<i32>} : memref<1x2x8x256xf32, #tpu.memory_space<vmem>>, vector<1x2x8x256xf32>,
    return
  }
  func.func @transform_0(%arg0: i32, %arg1: i32) -> (i32, i32, i32, i32) {
    %c0_i32 = arith.constant 0 : i32
    %c0_i32_0 = arith.constant 0 : i32
    %c0_i32_1 = arith.constant 0 : i32
    return %arg0, %c0_i32, %c0_i32_0, %arg1 : i32, i32, i32, i32
  }
  func.func @transform_1(%arg0: i32, %arg1: i32) -> (i32, i32, i32) {
    %c0_i32 = arith.constant 0 : i32
    %c0_i32_0 = arith.constant 0 : i32
    return %arg0, %c0_i32, %arg1 : i32, i32, i32
  }
  func.func @transform_2(%arg0: i32, %arg1: i32) -> (i32, i32, i32) {
    %c0_i32 = arith.constant 0 : i32
    %c0_i32_0 = arith.constant 0 : i32
    %c0_i32_1 = arith.constant 0 : i32
    %c0_i32_2 = arith.constant 0 : i32
    return %c0_i32, %c0_i32_0, %c0_i32_1 : i32, i32, i32
  }
  func.func @transform_3(%arg0: i32, %arg1: i32) -> (i32, i32) {
    %c0_i32 = arith.constant 0 : i32
    %c0_i32_0 = arith.constant 0 : i32
    %c0_i32_1 = arith.constant 0 : i32
    return %c0_i32, %c0_i32_0 : i32, i32
  }
  func.func @transform_4(%arg0: i32, %arg1: i32) -> (i32, i32) {
    %c0_i32 = arith.constant 0 : i32
    %c0_i32_0 = arith.constant 0 : i32
    %c0_i32_1 = arith.constant 0 : i32
    return %c0_i32, %c0_i32_0 : i32, i32
  }
  func.func @transform_5(%arg0: i32, %arg1: i32) -> (i32, i32, i32, i32) {
    %c0_i32 = arith.constant 0 : i32
    %c0_i32_0 = arith.constant 0 : i32
    %c0_i32_1 = arith.constant 0 : i32
    return %arg0, %c0_i32, %c0_i32_0, %arg1 : i32, i32, i32, i32
  }
}

</mosaic_0001>

<bundles_post_ra>
// kernel: rotating_conv2d_forward.3
= control target key start
LH: loop header
LB: loop body
LE: loop exit
PB: predicated region body
PF: predicated region fallthrough
CT: control target
= control target key end

     0   :  { %s598_s18 = smov 0   ;;  %s600_s19 = smov 0   ;;  %s651_s0 = inlined_call_operand.vmem [shape: bf16[2,2,8,256], index: 0, kind: input, shape index: {}]   ;;  %s652_s1 = inlined_call_operand.vmem [shape: bf16[2,8,256], index: 1, kind: input, shape index: {}]   ;;  %s653_s2 = inlined_call_operand.vmem [shape: f32[2,8,1], index: 2, kind: input, shape index: {}]   ;;  %s654_s3 = inlined_call_operand.vmem [shape: f32[8,1], index: 3, kind: input, shape index: {}]   ;;  %s655_s4 = inlined_call_operand.vmem [shape: f32[8,1], index: 4, kind: input, shape index: {}]   ;;  %s656_s5 = inlined_call_operand.vmem [shape: f32[2,2,8,256], index: 5, kind: output, shape index: {}]  }
   0x1   :  { %s602_s20 = smov 0  }
   0x2 LB: > { %s27_s21 = sadd.s32 1, %s561_s19  ;;  %p496_p0 = scmp.ge.s32.totalorder %s565_s20, 1  ;;  %s565_s20 = sphi %s602_s20, %s15_s20   ;;  %s561_s19 = sphi %s600_s19, %s658_s19   ;;  %s557_s18 = sphi %s598_s18, %s657_s18  }
   0x3   : > { %p29_p1 = scmp.ge.s32.totalorder %s27_s21, 2  ;;  %p225_p2 = scmp.lt.s32.totalorder %s565_s20, 3 }
   0x5   : > { %s660_s21 = smov (%p29_p1, %s27_s21), 0  ;;  %p226_p3 = pnand %p496_p0, %p225_p2 }
   0x6   : > { %p271_p4 = scmp.lt.s32.totalorder (!%p226_p3), %s557_s18, 1 }
   0x7   : > { %229 = sbr.rel (%p226_p3) target bundleno = 170 (0xaa), region = 40 }
   0xc   : > { %v309_v0 = vld [vmem:[%s653_s2] sm:$0xff]  ;;  %v567_v2 = vmov 0   ;;  %v310_v3 = vld [vmem:[%s653_s2 + $0x8] sm:$0xff]  ;;  %s662_s18 = smov (!%p271_p4, %s557_s18), 1 }
   0xd   : > { %v349_v1 = vld [vmem:[%s654_s3] sm:$0xff]  ;;  %533 = vset.pattern.permute.xlu0 %v567_v2  ;;  %534 = vset.pattern.permute.xlu1 %v567_v2  ;;  %s505_s30 = sshll.u32 %s662_s18, 4  ;;  %s506_s9 = sshll.u32 %s662_s18, 3 }
   0xe   : > { %313 = vperm.xlu0 %533, %v309_v0   ;;  %352 = vperm.xlu1 %534, %v349_v1   ;;  %v357_v4 = vld [vmem:[%s655_s4] sm:$0xff]  ;;  %s278_s8 = scalar_lea.vmem %s651_s0, %s505_s30  ;;  %s288_s12 = scalar_lea.vmem %s652_s1, %s506_s9 }
   0xf   : > { %v300_v5 = vld [vmem:[%s278_s8] sm:$0xff]  ;;  %v301_v6 = vld [vmem:[%s278_s8 + $0x8] sm:$0xff]  ;;  %s507_s13 = sshll.u32 %s662_s18, 5 }
  0x10   : > { %v302_v7 = vunpack.c.l.bf16 %v300_v5  ;;  %v304_v8 = vunpack.c.l.bf16 %v301_v6  ;;  %v303_v9 = vunpack.c.h.bf16 %v300_v5  ;;  %v305_v10 = vunpack.c.h.bf16 %v301_v6  ;;  %v306_v22 = vld [vmem:[%s288_s12] sm:$0xff]  ;;  %s298_s16 = scalar_lea.vmem %s656_s5, %s507_s13 }
  0x11   : > { %v307_v32 = vunpack.c.l.bf16 %v306_v22  ;;  %v308_v33 = vunpack.c.h.bf16 %v306_v22 }
  0x12   : > { %318 = vperm.xlu0 %533, %v310_v3   ;;  %360 = vperm.xlu1 %534, %v357_v4   ;;  %v325_v11 = vmul.f32 %v302_v7, %v302_v7  ;;  %v327_v12 = vmul.f32 %v304_v8, %v304_v8  ;;  %v326_v13 = vmul.f32 %v303_v9, %v303_v9 }
  0x13   : > { %v328_v14 = vmul.f32 %v305_v10, %v305_v10 }
  0x14   : > { %v329_v15 = vadd.f32 %v327_v12, %v325_v11 }
  0x15   : > { %v330_v16 = vadd.f32 %v328_v14, %v326_v13 }
  0x16   : > { %535 = vrsqrt.f32 %v329_v15  ;;  %vm333_vm0 = vcmp.eq.f32.partialorder %v329_v15, inf  ;;  %vm335_vm2 = vcmp.eq.f32.partialorder %v329_v15, 0.0  ;;  %v336_v23 = vand.u32 2147483648, %v329_v15 }
  0x17   : > { %537 = vrsqrt.f32 %v330_v16  ;;  %vm340_vm1 = vcmp.eq.f32.partialorder %v330_v16, inf  ;;  %vm342_vm3 = vcmp.eq.f32.partialorder %v330_v16, 0.0  ;;  %v343_v24 = vand.u32 2147483648, %v330_v16 }
  0x23   : > { %v536_v17 = vpop.eup %535 }
  0x24   : > { %v538_v18 = vpop.eup %537  ;;  %v332_v19 = vmul.f32 %v536_v17, %v329_v15 }
  0x25   : > { %v339_v20 = vmul.f32 %v538_v18, %v330_v16 }
  0x26   : > { %v334_v27 = vsel %vm333_vm0, %v329_v15, %v332_v19 }
  0x27   : > { %v341_v28 = vsel %vm340_vm1, %v330_v16, %v339_v20  ;;  %v337_v34 = vsel %vm335_vm2, %v336_v23, %v334_v27 }
  0x28   : > { %v344_v35 = vsel %vm342_vm3, %v343_v24, %v341_v28  ;;  %v345_v42 = vadd.f32 %v337_v34, %v307_v32 }
  0x29   : > { %v346_v43 = vadd.f32 %v344_v35, %v308_v33 }
  0x2a   : > { %v347_v47 = vmul.f32 0.5, %v345_v42 }
  0x2b   : > { %v348_v48 = vmul.f32 0.5, %v346_v43 }
  0x89   : > { %v314_v21 = vpop.permute.xlu0 %313  ;;  %v353_v46 = vpop.permute.xlu1 %352 }
  0x8a   : > { %v321_v25 = vadd.f32 %v314_v21, %v302_v7  ;;  %v322_v26 = vadd.f32 %v314_v21, %v303_v9  ;;  %v355_v49 = vmul.f32 %v353_v46, %v347_v47  ;;  %v356_v50 = vmul.f32 %v353_v46, %v348_v48 }
  0x8c   : > { %v367_v36 = vmul.f32 %v321_v25, %v321_v25  ;;  %v368_v37 = vmul.f32 %v322_v26, %v322_v26 }
  0x8d   : > { %v319_v29 = vpop.permute.xlu0 %318  ;;  %v361_v51 = vpop.permute.xlu1 %360 }
  0x8e   : > { %v323_v30 = vadd.f32 %v319_v29, %v304_v8  ;;  %v324_v31 = vadd.f32 %v319_v29, %v305_v10  ;;  %v363_v52 = vadd.f32 %v361_v51, %v355_v49  ;;  %v364_v53 = vadd.f32 %v361_v51, %v356_v50 }
  0x90   : > { %v369_v38 = vmul.f32 %v323_v30, %v323_v30  ;;  %v370_v39 = vmul.f32 %v324_v31, %v324_v31  ;;  %v365_v54 = vmax.f32 %v363_v52, 0.0  ;;  %v366_v56 = vmax.f32 %v364_v53, 0.0 }
  0x92   : > { %v371_v40 = vadd.f32 %v369_v38, %v367_v36  ;;  %v372_v41 = vadd.f32 %v370_v39, %v368_v37 }
  0x94   : > { %v373_v44 = vadd.f32 1e-12, %v371_v40  ;;  %v374_v45 = vadd.f32 1e-12, %v372_v41 }
  0x96   : > { %539 = vrsqrt.f32 %v373_v44 }
  0x97   : > { %541 = vrsqrt.f32 %v374_v45 }
  0xa3   : > { %v540_v55 = vpop.eup %539 }
  0xa4   : > { %v542_v57 = vpop.eup %541  ;;  %v377_v58 = vmul.f32 %v540_v55, %v365_v54 }
  0xa5   : > { %v378_v59 = vmul.f32 %v542_v57, %v366_v56 }
  0xa6   : > { %v379_v60 = vmul.f32 %v377_v58, %v321_v25  ;;  %v381_v61 = vmul.f32 %v377_v58, %v323_v30 }
  0xa7   : > { %v380_v62 = vmul.f32 %v378_v59, %v322_v26  ;;  %v382_v63 = vmul.f32 %v378_v59, %v324_v31 }
  0xa8   : > { %383 = vst [vmem:[%s298_s16] sm:$0xff] %v379_v60  ;;  %385 = vst [vmem:[%s298_s16 + $0x10] sm:$0xff] %v381_v61 }
  0xa9   : > { %384 = vst [vmem:[%s298_s16 + $0x8] sm:$0xff] %v380_v62  ;;  %386 = vst [vmem:[%s298_s16 + $0x18] sm:$0xff] %v382_v63 }
  0xaa PF: > { %s15_s20 = sadd.s32 1, %s565_s20   ;;  %s657_s18 = smov %s561_s19 }
  0xab   : > { %p12_p5 = scmp.ge.s32.totalorder %s15_s20, 4   ;;  %s658_s19 = smov %s660_s21 }
  0xad   :  { %14 = sbr.rel (!%p12_p5) target bundleno = 2 (0x2), region = 73 }

// kernel: rotating_conv2d_forward.2
= control target key start
LH: loop header
LB: loop body
LE: loop exit
PB: predicated region body
PF: predicated region fallthrough
CT: control target
= control target key end

     0   :  { %v23_v0 = vlaneseq  ;;  %v3658_v2 = vmov 1983009808   ;;  %v3659_v8 = vmov 0   ;;  %s3660_s14 = smov 127   ;;  %vm48_vm0 = vcmask 1041408   ;;  %s3661_s15 = smov 126   ;;  %s4545_s0 = inlined_call_operand.vmem [shape: bf16[2,2,4,384], index: 0, kind: input, shape index: {}]   ;;  %s4546_s1 = inlined_call_operand.vmem [shape: bf16[9,8,4], index: 1, kind: input, shape index: {}]   ;;  %s4547_s2 = inlined_call_operand.vmem [shape: bf16[2,2,8,256], index: 2, kind: output, shape index: {0}]   ;;  %s4548_s3 = inlined_call_operand.vmem [shape: bf16[2,8,256], index: 3, kind: output, shape index: {1}]  }
   0x1   :  { %v3691_v1 = vld [vmem:[%s4545_s0] sm:$0x3f]  ;;  %v21_v3 = vunpack.c.l.s4 %v3658_v2  ;;  %87 = vmatprep.mubr.bf16.mxu0 %v3659_v8  ;;  %137 = vmatprep.mubr.bf16.mxu1 %v3659_v8  ;;  %vm44_vm1 = vcmask 31744   ;;  %s3662_s18 = smov 112   ;;  %s3663_s19 = smov 111   ;;  %vm41_vm6 = vcmask 1039360  }
   0x2   :  { %v24_v4 = vshrl.u32 %v23_v0, 7  ;;  %v19_v6 = vcombine.high %v3691_v1, %v3691_v1  ;;  %v15_v13 = vld [vmem:[%s4546_s1] sm:$0xf]  ;;  %s3664_s20 = smov 110   ;;  %s3665_s21 = smov 96   ;;  %v596_v19 = vunpack.c.l.bf16 %v3691_v1  ;;  %v597_v24 = vunpack.c.h.bf16 %v3691_v1 }
   0x3   :  { %v22_v5 = vunpack.c.0.s8 %v21_v3  ;;  %s3666_s22 = smov 95   ;;  %v3488_v14 = vld [vmem:[%s4545_s0 + $0x6] sm:$0x3f]  ;;  %s3667_s25 = smov 94   ;;  %vm154_vm7 = vcmask 1031168   ;;  %vm217_vm8 = vcmask 916480  }
   0x4   :  { %v605_v17 = vcombine.high %v3488_v14, %v3488_v14  ;;  %v1166_v20 = vunpack.c.l.bf16 %v3488_v14  ;;  %v598_v21 = vmul.f32 %v596_v19, %v596_v19  ;;  %v1167_v25 = vunpack.c.h.bf16 %v3488_v14  ;;  %v3461_v52 = vld [vmem:[%s4546_s1 + $0x4] sm:$0xf]  ;;  %v3466_v61 = vld [vmem:[%s4546_s1 + $0x8] sm:$0xf]  ;;  %v3856_v0 = vld [vmem:[%s4545_s0 + $0xc] sm:$0x3f] }
   0x5   :  { %v3695_v7 = vsub.s32 %v22_v5, %v24_v4  ;;  %v599_v26 = vmul.f32 %v597_v24, %v597_v24  ;;  %vm280_vm9 = vcmask 908288   ;;  %v3469_v3 = vld [vmem:[%s4546_s1 + $0xc] sm:$0xf]  ;;  %vm343_vm10 = vcmask 900096  }
   0x6   :  { %v1168_v22 = vmul.f32 %v1166_v20, %v1166_v20  ;;  %v1169_v27 = vmul.f32 %v1167_v25, %v1167_v25  ;;  %vm406_vm11 = vcmask 785408   ;;  %v3475_v25 = vld [vmem:[%s4546_s1 + $0x14] sm:$0xf]  ;;  %vm469_vm12 = vcmask 777216  }
   0x7   :  { %v26_v9 = vrot.slane %v3691_v1, %v3695_v7  ;;  %v33_v10 = vrot.slane %v19_v6, %v3695_v7  ;;  %v3735_v15 = vrot.slane %v3488_v14, %v3695_v7  ;;  %v619_v18 = vrot.slane %v605_v17, %v3695_v7 }
   0x8   :  { %v1170_v23 = vadd.f32 %v1168_v22, %v598_v21  ;;  %v1171_v28 = vadd.f32 %v1169_v27, %v599_v26  ;;  %v1746_v14 = vcombine.high %v3856_v0, %v3856_v0  ;;  %vm532_vm13 = vcmask 769024  }
   0x9   :  { %35 = vrot.lane.b32.xlu0 %v26_v9, %s3660_s14  ;;  %39 = vrot.lane.b32.xlu1 %v33_v10, %s3660_s14  ;;  %v34_v11 = vcombine.high %v26_v9, %v26_v9  ;;  %v100_v12 = vsel %vm48_vm0, %v26_v9, 0  ;;  %v3741_v16 = vcombine.high %v3735_v15, %v3735_v15 }
   0xa   :  { %3650 = vrsqrt.f32 %v1170_v23  ;;  %vm1174_vm2 = vcmp.eq.f32.partialorder %v1170_v23, inf  ;;  %v1177_v31 = vand.u32 2147483648, %v1170_v23  ;;  %vm1176_vm3 = vcmp.eq.f32.partialorder %v1170_v23, 0.0 }
   0xb   :  { %3464 = vmatprep.subr.msk.bf16.mxu1 %vm48_vm0, %v34_v11  ;;  %3652 = vrsqrt.f32 %v1171_v28  ;;  %vm1181_vm4 = vcmp.eq.f32.partialorder %v1171_v28, inf  ;;  %v1184_v37 = vand.u32 2147483648, %v1171_v28  ;;  %vm1183_vm5 = vcmp.eq.f32.partialorder %v1171_v28, 0.0 }
   0xc   :  { %120 = vmatpush1.bf16.msra.mxu1 %v100_v12  ;;  %v3472_v12 = vld [vmem:[%s4546_s1 + $0x10] sm:$0xf]  ;;  %v3898_v21 = vrot.slane %v1746_v14, %v3695_v7 }
   0xd   :  { %37 = vrot.lane.b32.xlu0 %v34_v11, %s3660_s14  ;;  %148 = vrot.lane.b32.xlu1 %v26_v9, %s3661_s15 }
   0xf   :  { %3465 = vmatmul.mubr.msk.bf16.vlgmr.msra.gmra.mxu1 %vm44_vm1, %v15_v13 }
  0x10   :  { %261 = vmatprep.mubr.bf16.mxu1 %v3659_v8 }
  0x11   :  { %150 = vrot.lane.b32.xlu0 %v34_v11, %s3661_s15  ;;  %152 = vrot.lane.b32.xlu1 %v33_v10, %s3661_s15 }
  0x15   :  { %211 = vrot.lane.b32.xlu0 %v26_v9, %s3662_s18  ;;  %213 = vrot.lane.b32.xlu1 %v34_v11, %s3662_s18 }
  0x17   :  { %v3651_v29 = vpop.eup %3650 }
  0x18   :  { %v1173_v30 = vmul.f32 %v3651_v29, %v1170_v23  ;;  %v3653_v33 = vpop.eup %3652 }
  0x19   :  { %215 = vrot.lane.b32.xlu0 %v33_v10, %s3662_s18  ;;  %274 = vrot.lane.b32.xlu1 %v26_v9, %s3663_s19  ;;  %v1180_v35 = vmul.f32 %v3653_v33, %v1171_v28 }
  0x1a   :  { %v1175_v32 = vsel %vm1174_vm2, %v1170_v23, %v1173_v30 }
  0x1b   :  { %v1178_v34 = vsel %vm1176_vm3, %v1177_v31, %v1175_v32  ;;  %v1182_v38 = vsel %vm1181_vm4, %v1171_v28, %v1180_v35  ;;  %v3478_v31 = vld [vmem:[%s4546_s1 + $0x18] sm:$0xf] }
  0x1c   :  { %v1187_v36 = vcombine.high %v1178_v34, %v1178_v34  ;;  %v3786_v39 = vpack.c.bf16 %v1178_v34, %v1178_v34  ;;  %v1185_v41 = vsel %vm1183_vm5, %v1184_v37, %v1182_v38 }
  0x1d   :  { %276 = vrot.lane.b32.xlu0 %v34_v11, %s3663_s19  ;;  %278 = vrot.lane.b32.xlu1 %v33_v10, %s3663_s19  ;;  %v3794_v42 = vpack.c.bf16 %v1185_v41, %v1185_v41  ;;  %v3481_v41 = vld [vmem:[%s4546_s1 + $0x1c] sm:$0xf] }
  0x1e   :  { %v3788_v40 = vpack.c.bf16 %v1187_v36, %v1187_v36 }
  0x21   :  { %337 = vrot.lane.b32.xlu0 %v26_v9, %s3664_s20  ;;  %339 = vrot.lane.b32.xlu1 %v34_v11, %s3664_s20 }
  0x25   :  { %341 = vrot.lane.b32.xlu0 %v33_v10, %s3664_s20  ;;  %400 = vrot.lane.b32.xlu1 %v26_v9, %s3665_s21 }
  0x29   :  { %402 = vrot.lane.b32.xlu0 %v34_v11, %s3665_s21  ;;  %404 = vrot.lane.b32.xlu1 %v33_v10, %s3665_s21 }
  0x2d   :  { %463 = vrot.lane.b32.xlu0 %v26_v9, %s3666_s22  ;;  %465 = vrot.lane.b32.xlu1 %v34_v11, %s3666_s22 }
  0x31   :  { %467 = vrot.lane.b32.xlu0 %v33_v10, %s3666_s22  ;;  %526 = vrot.lane.b32.xlu1 %v26_v9, %s3667_s25  ;;  %v3871_v9 = vrot.slane %v3856_v0, %v3695_v7 }
  0x33   :  { %v3885_v13 = vcombine.high %v3871_v9, %v3871_v9 }
  0x35   :  { %528 = vrot.lane.b32.xlu0 %v34_v11, %s3667_s25  ;;  %530 = vrot.lane.b32.xlu1 %v33_v10, %s3667_s25 }
  0x39   :  { %621 = vrot.lane.b32.xlu0 %v3735_v15, %s3660_s14  ;;  %623 = vrot.lane.b32.xlu1 %v3741_v16, %s3660_s14 }
  0x3d   :  { %625 = vrot.lane.b32.xlu0 %v619_v18, %s3660_s14  ;;  %730 = vrot.lane.b32.xlu1 %v3735_v15, %s3661_s15 }
  0x41   :  { %732 = vrot.lane.b32.xlu0 %v3741_v16, %s3661_s15  ;;  %734 = vrot.lane.b32.xlu1 %v619_v18, %s3661_s15 }
  0x45   :  { %791 = vrot.lane.b32.xlu0 %v3735_v15, %s3662_s18  ;;  %793 = vrot.lane.b32.xlu1 %v3741_v16, %s3662_s18 }
  0x49   :  { %795 = vrot.lane.b32.xlu0 %v619_v18, %s3662_s18  ;;  %852 = vrot.lane.b32.xlu1 %v3735_v15, %s3663_s19 }
  0x4d   :  { %854 = vrot.lane.b32.xlu0 %v3741_v16, %s3663_s19  ;;  %856 = vrot.lane.b32.xlu1 %v619_v18, %s3663_s19 }
  0x51   :  { %913 = vrot.lane.b32.xlu0 %v3735_v15, %s3664_s20  ;;  %915 = vrot.lane.b32.xlu1 %v3741_v16, %s3664_s20 }
  0x55   :  { %917 = vrot.lane.b32.xlu0 %v619_v18, %s3664_s20  ;;  %974 = vrot.lane.b32.xlu1 %v3735_v15, %s3665_s21 }
  0x59   :  { %976 = vrot.lane.b32.xlu0 %v3741_v16, %s3665_s21  ;;  %978 = vrot.lane.b32.xlu1 %v619_v18, %s3665_s21 }
  0x5d   :  { %1035 = vrot.lane.b32.xlu0 %v3735_v15, %s3666_s22  ;;  %1037 = vrot.lane.b32.xlu1 %v3741_v16, %s3666_s22 }
  0x61   :  { %1039 = vrot.lane.b32.xlu0 %v619_v18, %s3666_s22  ;;  %1096 = vrot.lane.b32.xlu1 %v3735_v15, %s3667_s25 }
  0x65   :  { %1098 = vrot.lane.b32.xlu0 %v3741_v16, %s3667_s25  ;;  %1100 = vrot.lane.b32.xlu1 %v619_v18, %s3667_s25 }
  0x69   :  { %1197 = vrot.lane.b32.xlu0 %v3786_v39, %s3660_s14  ;;  %1199 = vrot.lane.b32.xlu1 %v3788_v40, %s3660_s14 }
  0x6d   :  { %1201 = vrot.lane.b32.xlu0 %v3794_v42, %s3660_s14  ;;  %1306 = vrot.lane.b32.xlu1 %v3786_v39, %s3661_s15 }
  0x71   :  { %1308 = vrot.lane.b32.xlu0 %v3788_v40, %s3661_s15  ;;  %1310 = vrot.lane.b32.xlu1 %v3794_v42, %s3661_s15 }
  0x75   :  { %1367 = vrot.lane.b32.xlu0 %v3786_v39, %s3662_s18  ;;  %1369 = vrot.lane.b32.xlu1 %v3788_v40, %s3662_s18 }
  0x79   :  { %1371 = vrot.lane.b32.xlu0 %v3794_v42, %s3662_s18  ;;  %1428 = vrot.lane.b32.xlu1 %v3786_v39, %s3663_s19 }
  0x7b   :  { %v36_v43 = vpop.permute.xlu0 %35  ;;  %v40_v44 = vpop.permute.xlu1 %39 }
  0x7d   :  { %1430 = vrot.lane.b32.xlu0 %v3788_v40, %s3663_s19  ;;  %1432 = vrot.lane.b32.xlu1 %v3794_v42, %s3663_s19 }
  0x7f   :  { %v38_v45 = vpop.permute.xlu0 %37  ;;  %v149_v46 = vpop.permute.xlu1 %148 }
  0x80   :  { %v43_v47 = vsel %vm41_vm6, %v38_v45, %v40_v44  ;;  %v42_v48 = vsel %vm41_vm6, %v36_v43, %v38_v45 }
  0x81   :  { %1489 = vrot.lane.b32.xlu0 %v3786_v39, %s3664_s20  ;;  %1491 = vrot.lane.b32.xlu1 %v3788_v40, %s3664_s20  ;;  %v50_v49 = vsel %vm48_vm0, %v42_v48, 0  ;;  %v683_v48 = vsel %vm48_vm0, %v3735_v15, 0 }
  0x82   :  { %3462 = vmatprep.subr.msk.bf16.mxu0 %vm48_vm0, %v43_v47  ;;  %v3484_v47 = vld [vmem:[%s4546_s1 + $0x20] sm:$0xf] }
  0x83   :  { %70 = vmatpush1.bf16.msra.mxu0 %v50_v49  ;;  %v151_v50 = vpop.permute.xlu0 %150  ;;  %v153_v51 = vpop.permute.xlu1 %152 }
  0x84   :  { %v155_v53 = vsel %vm154_vm7, %v149_v46, %v151_v50  ;;  %v156_v54 = vsel %vm154_vm7, %v151_v50, %v153_v51 }
  0x85   :  { %1493 = vrot.lane.b32.xlu0 %v3794_v42, %s3664_s20  ;;  %1550 = vrot.lane.b32.xlu1 %v3786_v39, %s3665_s21  ;;  %v161_v55 = vsel %vm48_vm0, %v155_v53, 0 }
  0x86   :  { %3467 = vmatprep.subr.msk.bf16.mxu0 %vm48_vm0, %v156_v54  ;;  %3463 = vmatmul.mubr.msk.bf16.vlgmr.msra.gmra.mxu0 %vm44_vm1, %v3461_v52  ;;  %v3489_v54 = vld [vmem:[%s4546_s1 + $0x4] sm:$0xf] }
  0x87   :  { %181 = vmatpush1.bf16.msra.mxu0 %v161_v55  ;;  %v212_v56 = vpop.permute.xlu0 %211  ;;  %v214_v57 = vpop.permute.xlu1 %213  ;;  %198 = vmatprep.mubr.bf16.mxu0 %v3659_v8 }
  0x88   :  { %v218_v58 = vsel %vm217_vm8, %v212_v56, %v214_v57 }
  0x89   :  { %1552 = vrot.lane.b32.xlu0 %v3788_v40, %s3665_s21  ;;  %1554 = vrot.lane.b32.xlu1 %v3794_v42, %s3665_s21  ;;  %v224_v63 = vsel %vm48_vm0, %v218_v58, 0 }
  0x8b   :  { %v216_v59 = vpop.permute.xlu0 %215  ;;  %v275_v60 = vpop.permute.xlu1 %274 }
  0x8c   :  { %v219_v62 = vsel %vm217_vm8, %v214_v57, %v216_v59  ;;  %v602_v57 = vld [vmem:[%s4546_s1] sm:$0xf] }
  0x8d   :  { %1611 = vrot.lane.b32.xlu0 %v3786_v39, %s3666_s22  ;;  %1613 = vrot.lane.b32.xlu1 %v3788_v40, %s3666_s22 }
  0x8e   :  { %3470 = vmatprep.subr.msk.bf16.mxu1 %vm48_vm0, %v219_v62  ;;  %3468 = vmatmul.mubr.msk.bf16.vlgmr.msra.gmra.mxu0 %vm44_vm1, %v3466_v61 }
  0x8f   :  { %244 = vmatpush1.bf16.msra.mxu1 %v224_v63  ;;  %v277_v1 = vpop.permute.xlu0 %276  ;;  %v279_v2 = vpop.permute.xlu1 %278  ;;  %324 = vmatprep.mubr.bf16.mxu0 %v3659_v8 }
  0x90   :  { %v281_v4 = vsel %vm280_vm9, %v275_v60, %v277_v1  ;;  %v282_v5 = vsel %vm280_vm9, %v277_v1, %v279_v2  ;;  %v3494_v1 = vld [vmem:[%s4546_s1 + $0x8] sm:$0xf] }
  0x91   :  { %1615 = vrot.lane.b32.xlu0 %v3794_v42, %s3666_s22  ;;  %1672 = vrot.lane.b32.xlu1 %v3786_v39, %s3667_s25  ;;  %v287_v6 = vsel %vm48_vm0, %v281_v4, 0  ;;  %v4003_v4 = vld [vmem:[%s4545_s0 + $0x12] sm:$0x3f] }
  0x92   :  { %3473 = vmatprep.subr.msk.bf16.mxu0 %vm48_vm0, %v282_v5  ;;  %3471 = vmatmul.mubr.msk.bf16.vlgmr.msra.gmra.mxu1 %vm44_vm1, %v3469_v3 }
  0x93   :  { %307 = vmatpush1.bf16.msra.mxu0 %v287_v6  ;;  %v338_v10 = vpop.permute.xlu0 %337  ;;  %v340_v11 = vpop.permute.xlu1 %339  ;;  %387 = vmatprep.mubr.bf16.mxu1 %v3659_v8 }
  0x94   :  { %v344_v17 = vsel %vm343_vm10, %v338_v10, %v340_v11  ;;  %v3497_v10 = vld [vmem:[%s4546_s1 + $0xc] sm:$0xf] }
  0x95   :  { %1674 = vrot.lane.b32.xlu0 %v3788_v40, %s3667_s25  ;;  %1676 = vrot.lane.b32.xlu1 %v3794_v42, %s3667_s25  ;;  %v350_v22 = vsel %vm48_vm0, %v344_v17, 0  ;;  %v4018_v17 = vrot.slane %v4003_v4, %v3695_v7 }
  0x96   :  { %3474 = vmatmul.mubr.msk.bf16.vlgmr.msra.gmra.mxu0 %vm44_vm1, %v3472_v12 }
  0x97   :  { %v342_v18 = vpop.permute.xlu0 %341  ;;  %v401_v19 = vpop.permute.xlu1 %400  ;;  %450 = vmatprep.mubr.bf16.mxu0 %v3659_v8 }
  0x98   :  { %v345_v20 = vsel %vm343_vm10, %v340_v11, %v342_v18 }
  0x99   :  { %1762 = vrot.lane.b32.xlu0 %v3871_v9, %s3660_s14  ;;  %1764 = vrot.lane.b32.xlu1 %v3885_v13, %s3660_s14 }
  0x9a   :  { %3476 = vmatprep.subr.msk.bf16.mxu1 %vm48_vm0, %v345_v20  ;;  %v3500_v20 = vld [vmem:[%s4546_s1 + $0x10] sm:$0xf] }
  0x9b   :  { %370 = vmatpush1.bf16.msra.mxu1 %v350_v22  ;;  %v403_v23 = vpop.permute.xlu0 %402  ;;  %v405_v24 = vpop.permute.xlu1 %404  ;;  %v4032_v22 = vcombine.high %v4018_v17, %v4018_v17 }
  0x9c   :  { %v407_v26 = vsel %vm406_vm11, %v401_v19, %v403_v23  ;;  %v408_v27 = vsel %vm406_vm11, %v403_v23, %v405_v24  ;;  %v2316_v23 = vcombine.high %v4003_v4, %v4003_v4 }
  0x9d   :  { %1766 = vrot.lane.b32.xlu0 %v3898_v21, %s3660_s14  ;;  %1871 = vrot.lane.b32.xlu1 %v3871_v9, %s3661_s15  ;;  %v413_v28 = vsel %vm48_vm0, %v407_v26, 0 }
  0x9e   :  { %3479 = vmatprep.subr.msk.bf16.mxu0 %vm48_vm0, %v408_v27  ;;  %3477 = vmatmul.mubr.msk.bf16.vlgmr.msra.gmra.mxu1 %vm44_vm1, %v3475_v25 }
  0x9f   :  { %433 = vmatpush1.bf16.msra.mxu0 %v413_v28  ;;  %v464_v29 = vpop.permute.xlu0 %463  ;;  %v466_v30 = vpop.permute.xlu1 %465  ;;  %513 = vmatprep.mubr.bf16.mxu1 %v3659_v8 }
  0xa0   :  { %v470_v32 = vsel %vm469_vm12, %v464_v29, %v466_v30  ;;  %v2307_v29 = vunpack.c.l.bf16 %v3856_v0 }
  0xa1   :  { %1873 = vrot.lane.b32.xlu0 %v3885_v13, %s3661_s15  ;;  %1875 = vrot.lane.b32.xlu1 %v3898_v21, %s3661_s15  ;;  %v476_v36 = vsel %vm48_vm0, %v470_v32, 0 }
  0xa2   :  { %3480 = vmatmul.mubr.msk.bf16.vlgmr.msra.gmra.mxu0 %vm44_vm1, %v3478_v31 }
  0xa3   :  { %v468_v33 = vpop.permute.xlu0 %467  ;;  %v527_v34 = vpop.permute.xlu1 %526  ;;  %576 = vmatprep.mubr.bf16.mxu0 %v3659_v8 }
  0xa4   :  { %v471_v35 = vsel %vm469_vm12, %v466_v30, %v468_v33  ;;  %v2877_v30 = vunpack.c.l.bf16 %v4003_v4  ;;  %v3503_v33 = vld [vmem:[%s4546_s1 + $0x14] sm:$0xf] }
  0xa5   :  { %1932 = vrot.lane.b32.xlu0 %v3871_v9, %s3662_s18  ;;  %1934 = vrot.lane.b32.xlu1 %v3885_v13, %s3662_s18 }
  0xa6   :  { %3482 = vmatprep.subr.msk.bf16.mxu1 %vm48_vm0, %v471_v35 }
  0xa7   :  { %496 = vmatpush1.bf16.msra.mxu1 %v476_v36  ;;  %v529_v37 = vpop.permute.xlu0 %528  ;;  %v531_v38 = vpop.permute.xlu1 %530  ;;  %v2309_v36 = vmul.f32 %v2307_v29, %v2307_v29 }
  0xa8   :  { %v533_v42 = vsel %vm532_vm13, %v527_v34, %v529_v37  ;;  %v534_v43 = vsel %vm532_vm13, %v529_v37, %v531_v38  ;;  %v2879_v37 = vmul.f32 %v2877_v30, %v2877_v30 }
  0xa9   :  { %1936 = vrot.lane.b32.xlu0 %v3898_v21, %s3662_s18  ;;  %1993 = vrot.lane.b32.xlu1 %v3871_v9, %s3663_s19  ;;  %v539_v44 = vsel %vm48_vm0, %v533_v42, 0  ;;  %v3506_v42 = vld [vmem:[%s4546_s1 + $0x18] sm:$0xf] }
  0xaa   :  { %3485 = vmatprep.subr.msk.bf16.mxu0 %vm48_vm0, %v534_v43  ;;  %3483 = vmatmul.mubr.msk.bf16.vlgmr.msra.gmra.mxu1 %vm44_vm1, %v3481_v41  ;;  %v4072_v43 = vadd.f32 %v2879_v37, %v2309_v36 }
  0xab   :  { %559 = vmatpush1.bf16.msra.mxu0 %v539_v44  ;;  %v622_v45 = vpop.permute.xlu0 %621  ;;  %v624_v46 = vpop.permute.xlu1 %623  ;;  %670 = vmatprep.mubr.bf16.mxu1 %v3659_v8 }
  0xac   :  { %3492 = vmatprep.subr.msk.bf16.mxu0 %vm48_vm0, %v3741_v16  ;;  %v627_v49 = vsel %vm41_vm6, %v622_v45, %v624_v46  ;;  %3654 = vrsqrt.f32 %v4072_v43  ;;  %vm2885_vm14 = vcmp.eq.f32.partialorder %v4072_v43, inf  ;;  %vm2887_vm15 = vcmp.eq.f32.partialorder %v4072_v43, 0.0 }
  0xad   :  { %1995 = vrot.lane.b32.xlu0 %v3885_v13, %s3663_s19  ;;  %1997 = vrot.lane.b32.xlu1 %v3898_v21, %s3663_s19  ;;  %v633_v15 = vsel %vm48_vm0, %v627_v49, 0 }
  0xae   :  { %3486 = vmatmul.mubr.msk.bf16.vlgmr.msra.gmra.mxu0 %vm44_vm1, %v3484_v47  ;;  %v2308_v47 = vunpack.c.h.bf16 %v3856_v0  ;;  %v3509_v0 = vld [vmem:[%s4546_s1 + $0x1c] sm:$0xf] }
  0xaf   :  { %v626_v50 = vpop.permute.xlu0 %625  ;;  %v731_v51 = vpop.permute.xlu1 %730  ;;  %703 = vmatpush1.bf16.msra.mxu0 %v683_v48  ;;  %720 = vmatprep.mubr.bf16.mxu0 %v3659_v8  ;;  %v2878_v48 = vunpack.c.h.bf16 %v4003_v4 }
  0xb0   :  { %v628_v16 = vsel %vm41_vm6, %v624_v46, %v626_v50 }
  0xb1   :  { %2054 = vrot.lane.b32.xlu0 %v3871_v9, %s3664_s20  ;;  %2056 = vrot.lane.b32.xlu1 %v3885_v13, %s3664_s20 }
  0xb2   :  { %3490 = vmatprep.subr.msk.bf16.mxu1 %vm48_vm0, %v628_v16 }
  0xb3   :  { %653 = vmatpush1.bf16.msra.mxu1 %v633_v15  ;;  %v733_v52 = vpop.permute.xlu0 %732  ;;  %v735_v53 = vpop.permute.xlu1 %734  ;;  %v2310_v15 = vmul.f32 %v2308_v47, %v2308_v47 }
  0xb4   :  { %v736_v55 = vsel %vm154_vm7, %v731_v51, %v733_v52  ;;  %v737_v56 = vsel %vm154_vm7, %v733_v52, %v735_v53  ;;  %v2880_v52 = vmul.f32 %v2878_v48, %v2878_v48 }
  0xb5   :  { %2058 = vrot.lane.b32.xlu0 %v3898_v21, %s3664_s20  ;;  %2115 = vrot.lane.b32.xlu1 %v3871_v9, %s3665_s21  ;;  %v742_v58 = vsel %vm48_vm0, %v736_v55, 0 }
  0xb6   :  { %3495 = vmatprep.subr.msk.bf16.mxu1 %vm48_vm0, %v737_v56  ;;  %3491 = vmatmul.mubr.msk.bf16.vlgmr.msra.gmra.mxu1 %vm44_vm1, %v3489_v54 }
  0xb7   :  { %762 = vmatpush1.bf16.msra.mxu1 %v742_v58  ;;  %v792_v59 = vpop.permute.xlu0 %791  ;;  %v794_v60 = vpop.permute.xlu1 %793  ;;  %3493 = vmatmul.mubr.msk.bf16.vlgmr.msra.gmra.mxu0 %vm44_vm1, %v602_v57  ;;  %v3512_v58 = vld [vmem:[%s4546_s1 + $0x20] sm:$0xf] }
  0xb8   :  { %779 = vmatprep.mubr.bf16.mxu1 %v3659_v8  ;;  %840 = vmatprep.mubr.bf16.mxu0 %v3659_v8  ;;  %v797_v61 = vsel %vm217_vm8, %v792_v59, %v794_v60  ;;  %v4102_v59 = vadd.f32 %v2880_v52, %v2310_v15 }
  0xb9   :  { %2117 = vrot.lane.b32.xlu0 %v3885_v13, %s3665_s21  ;;  %2119 = vrot.lane.b32.xlu1 %v3898_v21, %s3665_s21  ;;  %v803_v3 = vsel %vm48_vm0, %v797_v61, 0  ;;  %v3655_v4 = vpop.eup %3654 }
  0xba   :  { %3656 = vrsqrt.f32 %v4102_v59  ;;  %vm2892_vm2 = vcmp.eq.f32.partialorder %v4102_v59, inf  ;;  %vm2894_vm3 = vcmp.eq.f32.partialorder %v4102_v59, 0.0 }
  0xbb   :  { %v796_v62 = vpop.permute.xlu0 %795  ;;  %v853_v63 = vpop.permute.xlu1 %852 }
  0xbc   :  { %v798_v2 = vsel %vm217_vm8, %v794_v60, %v796_v62  ;;  %v1259_v60 = vsel %vm48_vm0, %v3786_v39, 0 }
  0xbd   :  { %2176 = vrot.lane.b32.xlu0 %v3871_v9, %s3666_s22  ;;  %2178 = vrot.lane.b32.xlu1 %v3885_v13, %s3666_s22 }
  0xbe   :  { %3498 = vmatprep.subr.msk.bf16.mxu0 %vm48_vm0, %v798_v2  ;;  %3496 = vmatmul.mubr.msk.bf16.vlgmr.msra.gmra.mxu1 %vm44_vm1, %v3494_v1 }
  0xbf   :  { %823 = vmatpush1.bf16.msra.mxu0 %v803_v3  ;;  %v855_v5 = vpop.permute.xlu0 %854  ;;  %v857_v6 = vpop.permute.xlu1 %856  ;;  %901 = vmatprep.mubr.bf16.mxu1 %v3659_v8  ;;  %v3517_v3 = vld [vmem:[%s4546_s1 + $0x4] sm:$0xf] }
  0xc0   :  { %v858_v11 = vsel %vm280_vm9, %v853_v63, %v855_v5  ;;  %v859_v12 = vsel %vm280_vm9, %v855_v5, %v857_v6 }
  0xc1   :  { %2180 = vrot.lane.b32.xlu0 %v3898_v21, %s3666_s22  ;;  %2237 = vrot.lane.b32.xlu1 %v3871_v9, %s3667_s25  ;;  %v864_v14 = vsel %vm48_vm0, %v858_v11, 0 }
  0xc2   :  { %3501 = vmatprep.subr.msk.bf16.mxu1 %vm48_vm0, %v859_v12  ;;  %3499 = vmatmul.mubr.msk.bf16.vlgmr.msra.gmra.mxu0 %vm44_vm1, %v3497_v10  ;;  %v1192_v10 = vld [vmem:[%s4546_s1] sm:$0xf] }
  0xc3   :  { %884 = vmatpush1.bf16.msra.mxu1 %v864_v14  ;;  %v914_v18 = vpop.permute.xlu0 %913  ;;  %v916_v19 = vpop.permute.xlu1 %915  ;;  %962 = vmatprep.mubr.bf16.mxu0 %v3659_v8 }
  0xc4   :  { %v919_v24 = vsel %vm343_vm10, %v914_v18, %v916_v19  ;;  %v2884_v18 = vmul.f32 %v3655_v4, %v4072_v43 }
  0xc5   :  { %2239 = vrot.lane.b32.xlu0 %v3885_v13, %s3667_s25  ;;  %2241 = vrot.lane.b32.xlu1 %v3898_v21, %s3667_s25  ;;  %v4045_v21 = vrot.slane %v2316_v23, %v3695_v7  ;;  %v925_v28 = vsel %vm48_vm0, %v919_v24, 0 }
  0xc6   :  { %3502 = vmatmul.mubr.msk.bf16.vlgmr.msra.gmra.mxu1 %vm44_vm1, %v3500_v20 }
  0xc7   :  { %v918_v25 = vpop.permute.xlu0 %917  ;;  %v975_v26 = vpop.permute.xlu1 %974  ;;  %1023 = vmatprep.mubr.bf16.mxu1 %v3659_v8 }
  0xc8   :  { %v920_v27 = vsel %vm343_vm10, %v916_v19, %v918_v25  ;;  %v2888_v19 = vand.u32 2147483648, %v4072_v43  ;;  %v3522_v25 = vld [vmem:[%s4546_s1 + $0x8] sm:$0xf] }
  0xc9   :  { %2332 = vrot.lane.b32.xlu0 %v4018_v17, %s3660_s14  ;;  %2334 = vrot.lane.b32.xlu1 %v4032_v22, %s3660_s14 }
  0xca   :  { %3504 = vmatprep.subr.msk.bf16.mxu0 %vm48_vm0, %v920_v27  ;;  %v3657_v27 = vpop.eup %3656 }
  0xcb   :  { %945 = vmatpush1.bf16.msra.mxu0 %v925_v28  ;;  %v977_v31 = vpop.permute.xlu0 %976  ;;  %v979_v32 = vpop.permute.xlu1 %978 }
  0xcc   :  { %v980_v34 = vsel %vm406_vm11, %v975_v26, %v977_v31  ;;  %v981_v7 = vsel %vm406_vm11, %v977_v31, %v979_v32  ;;  %v2886_v26 = vsel %vm2885_vm14, %v4072_v43, %v2884_v18  ;;  %v3540_v18 = vld [vmem:[%s4546_s1 + $0x20] sm:$0xf] }
  0xcd   :  { %2336 = vrot.lane.b32.xlu0 %v4045_v21, %s3660_s14  ;;  %2441 = vrot.lane.b32.xlu1 %v4018_v17, %s3661_s15  ;;  %v986_v35 = vsel %vm48_vm0, %v980_v34, 0  ;;  %v2889_v30 = vsel %vm2887_vm15, %v2888_v19, %v2886_v26  ;;  %v2891_v34 = vmul.f32 %v3657_v27, %v4102_v59  ;;  %v1824_v19 = vsel %vm48_vm0, %v3871_v9, 0  ;;  %v3545_v27 = vld [vmem:[%s4546_s1 + $0x4] sm:$0xf] }
  0xce   :  { %3507 = vmatprep.subr.msk.bf16.mxu1 %vm48_vm0, %v981_v7  ;;  %3505 = vmatmul.mubr.msk.bf16.vlgmr.msra.gmra.mxu0 %vm44_vm1, %v3503_v33  ;;  %v3525_v33 = vld [vmem:[%s4546_s1 + $0xc] sm:$0xf]  ;;  %v2898_v37 = vcombine.high %v2889_v30, %v2889_v30 }
  0xcf   :  { %1006 = vmatpush1.bf16.msra.mxu1 %v986_v35  ;;  %v1036_v38 = vpop.permute.xlu0 %1035  ;;  %v1038_v41 = vpop.permute.xlu1 %1037  ;;  %1084 = vmatprep.mubr.bf16.mxu0 %v3659_v8  ;;  %v2893_v43 = vsel %vm2892_vm2, %v4102_v59, %v2891_v34 }
  0xd0   :  { %v1041_v44 = vsel %vm469_vm12, %v1036_v38, %v1038_v41  ;;  %v2895_v38 = vand.u32 2147483648, %v4102_v59 }
  0xd1   :  { %2443 = vrot.lane.b32.xlu0 %v4032_v22, %s3661_s15  ;;  %2445 = vrot.lane.b32.xlu1 %v4045_v21, %s3661_s15  ;;  %v1047_v50 = vsel %vm48_vm0, %v1041_v44, 0  ;;  %v3528_v44 = vld [vmem:[%s4546_s1 + $0x10] sm:$0xf] }
  0xd2   :  { %3508 = vmatmul.mubr.msk.bf16.vlgmr.msra.gmra.mxu1 %vm44_vm1, %v3506_v42  ;;  %v2896_v47 = vsel %vm2894_vm3, %v2895_v38, %v2893_v43  ;;  %v3553_v43 = vld [vmem:[%s4546_s1 + $0xc] sm:$0xf] }
  0xd3   :  { %v1040_v45 = vpop.permute.xlu0 %1039  ;;  %v1097_v46 = vpop.permute.xlu1 %1096  ;;  %1145 = vmatprep.mubr.bf16.mxu1 %v3659_v8 }
  0xd4   :  { %v1042_v49 = vsel %vm469_vm12, %v1038_v41, %v1040_v45  ;;  %v4188_v45 = vpack.c.bf16 %v2889_v30, %v2889_v30  ;;  %v1743_v30 = vld [vmem:[%s4546_s1] sm:$0xf] }
  0xd5   :  { %2502 = vrot.lane.b32.xlu0 %v4018_v17, %s3662_s18  ;;  %2504 = vrot.lane.b32.xlu1 %v4032_v22, %s3662_s18 }
  0xd6   :  { %3510 = vmatprep.subr.msk.bf16.mxu0 %vm48_vm0, %v1042_v49 }
  0xd7   :  { %1067 = vmatpush1.bf16.msra.mxu0 %v1047_v50  ;;  %v1099_v51 = vpop.permute.xlu0 %1098  ;;  %v1101_v16 = vpop.permute.xlu1 %1100 }
  0xd8   :  { %v1102_v53 = vsel %vm532_vm13, %v1097_v46, %v1099_v51  ;;  %v1103_v54 = vsel %vm532_vm13, %v1099_v51, %v1101_v16  ;;  %v4190_v46 = vpack.c.bf16 %v2898_v37, %v2898_v37 }
  0xd9   :  { %v1108_v55 = vsel %vm48_vm0, %v1102_v53, 0  ;;  %2506 = vrot.lane.b32.xlu0 %v4045_v21, %s3662_s18  ;;  %2563 = vrot.lane.b32.xlu1 %v4018_v17, %s3663_s19  ;;  %v3531_v53 = vld [vmem:[%s4546_s1 + $0x14] sm:$0xf] }
  0xda   :  { %3513 = vmatprep.subr.msk.bf16.mxu1 %vm48_vm0, %v1103_v54  ;;  %3511 = vmatmul.mubr.msk.bf16.vlgmr.msra.gmra.mxu0 %vm44_vm1, %v3509_v0  ;;  %v4204_v0 = vpop.f32.mrf.mxu1 }
  0xdb   :  { %1128 = vmatpush1.bf16.msra.mxu1 %v1108_v55  ;;  %v1198_v56 = vpop.permute.xlu0 %1197  ;;  %v1200_v57 = vpop.permute.xlu1 %1199  ;;  %1246 = vmatprep.mubr.bf16.mxu0 %v3659_v8 }
  0xdc   :  { %3520 = vmatprep.subr.msk.bf16.mxu1 %vm48_vm0, %v3788_v40  ;;  %v1203_v61 = vsel %vm41_vm6, %v1198_v56, %v1200_v57  ;;  %v4211_v56 = vpop.f32.mrf.mxu1 }
  0xdd   :  { %2565 = vrot.lane.b32.xlu0 %v4032_v22, %s3663_s19  ;;  %2567 = vrot.lane.b32.xlu1 %v4045_v21, %s3663_s19  ;;  %v1209_v39 = vsel %vm48_vm0, %v1203_v61, 0  ;;  %v3534_v61 = vld [vmem:[%s4546_s1 + $0x18] sm:$0xf] }
  0xde   :  { %3514 = vmatmul.mubr.msk.bf16.vlgmr.msra.gmra.mxu1 %vm44_vm1, %v3512_v58  ;;  %v143_v58 = vpop.f32.mrf.mxu1 }
  0xdf   :  { %v1202_v62 = vpop.permute.xlu0 %1201  ;;  %v1307_v63 = vpop.permute.xlu1 %1306  ;;  %1279 = vmatpush1.bf16.msra.mxu1 %v1259_v60  ;;  %1296 = vmatprep.mubr.bf16.mxu1 %v3659_v8 }
  0xe0   :  { %v1204_v40 = vsel %vm41_vm6, %v1200_v57, %v1202_v62  ;;  %v144_v62 = vpop.f32.mrf.mxu1 }
  0xe1   :  { %2624 = vrot.lane.b32.xlu0 %v4018_v17, %s3664_s20  ;;  %2626 = vrot.lane.b32.xlu1 %v4032_v22, %s3664_s20 }
  0xe2   :  { %3518 = vmatprep.subr.msk.bf16.mxu0 %vm48_vm0, %v1204_v40 }
  0xe3   :  { %1229 = vmatpush1.bf16.msra.mxu0 %v1209_v39  ;;  %v1309_v1 = vpop.permute.xlu0 %1308  ;;  %v1311_v2 = vpop.permute.xlu1 %1310 }
  0xe4   :  { %v1312_v5 = vsel %vm154_vm7, %v1307_v63, %v1309_v1  ;;  %v1313_v6 = vsel %vm154_vm7, %v1309_v1, %v1311_v2 }
  0xe5   :  { %v1318_v11 = vsel %vm48_vm0, %v1312_v5, 0  ;;  %2628 = vrot.lane.b32.xlu0 %v4045_v21, %s3664_s20  ;;  %2685 = vrot.lane.b32.xlu1 %v4018_v17, %s3665_s21  ;;  %v3537_v5 = vld [vmem:[%s4546_s1 + $0x1c] sm:$0xf] }
  0xe6   :  { %3523 = vmatprep.subr.msk.bf16.mxu0 %vm48_vm0, %v1313_v6  ;;  %3519 = vmatmul.mubr.msk.bf16.vlgmr.msra.gmra.mxu0 %vm44_vm1, %v3517_v3 }
  0xe7   :  { %1338 = vmatpush1.bf16.msra.mxu0 %v1318_v11  ;;  %v1368_v12 = vpop.permute.xlu0 %1367  ;;  %v1370_v14 = vpop.permute.xlu1 %1369  ;;  %3521 = vmatmul.mubr.msk.bf16.vlgmr.msra.gmra.mxu1 %vm44_vm1, %v1192_v10 }
  0xe8   :  { %1355 = vmatprep.mubr.bf16.mxu0 %v3659_v8  ;;  %1416 = vmatprep.mubr.bf16.mxu1 %v3659_v8  ;;  %v1373_v20 = vsel %vm217_vm8, %v1368_v12, %v1370_v14 }
  0xe9   :  { %2687 = vrot.lane.b32.xlu0 %v4032_v22, %s3665_s21  ;;  %2689 = vrot.lane.b32.xlu1 %v4045_v21, %s3665_s21  ;;  %v1379_v29 = vsel %vm48_vm0, %v1373_v20, 0 }
  0xeb   :  { %v1372_v23 = vpop.permute.xlu0 %1371  ;;  %v1429_v24 = vpop.permute.xlu1 %1428 }
  0xec   :  { %v1374_v28 = vsel %vm217_vm8, %v1370_v14, %v1372_v23 }
  0xed   :  { %2746 = vrot.lane.b32.xlu0 %v4018_v17, %s3666_s22  ;;  %2748 = vrot.lane.b32.xlu1 %v4032_v22, %s3666_s22 }
  0xee   :  { %3526 = vmatprep.subr.msk.bf16.mxu1 %vm48_vm0, %v1374_v28  ;;  %3524 = vmatmul.mubr.msk.bf16.vlgmr.msra.gmra.mxu0 %vm44_vm1, %v3522_v25 }
  0xef   :  { %1399 = vmatpush1.bf16.msra.mxu1 %v1379_v29  ;;  %v1431_v31 = vpop.permute.xlu0 %1430  ;;  %v1433_v32 = vpop.permute.xlu1 %1432  ;;  %1477 = vmatprep.mubr.bf16.mxu0 %v3659_v8 }
  0xf0   :  { %v1434_v7 = vsel %vm280_vm9, %v1429_v24, %v1431_v31  ;;  %v1435_v35 = vsel %vm280_vm9, %v1431_v31, %v1433_v32 }
  0xf1   :  { %v1440_v36 = vsel %vm48_vm0, %v1434_v7, 0  ;;  %2750 = vrot.lane.b32.xlu0 %v4045_v21, %s3666_s22  ;;  %2807 = vrot.lane.b32.xlu1 %v4018_v17, %s3667_s25 }
  0xf2   :  { %3529 = vmatprep.subr.msk.bf16.mxu0 %vm48_vm0, %v1435_v35  ;;  %3527 = vmatmul.mubr.msk.bf16.vlgmr.msra.gmra.mxu1 %vm44_vm1, %v3525_v33 }
  0xf3   :  { %1460 = vmatpush1.bf16.msra.mxu0 %v1440_v36  ;;  %v1490_v41 = vpop.permute.xlu0 %1489  ;;  %v1492_v42 = vpop.permute.xlu1 %1491  ;;  %1538 = vmatprep.mubr.bf16.mxu1 %v3659_v8  ;;  %v3550_v36 = vld [vmem:[%s4546_s1 + $0x8] sm:$0xf] }
  0xf4   :  { %v1495_v48 = vsel %vm343_vm10, %v1490_v41, %v1492_v42 }
  0xf5   :  { %2809 = vrot.lane.b32.xlu0 %v4032_v22, %s3667_s25  ;;  %2811 = vrot.lane.b32.xlu1 %v4045_v21, %s3667_s25  ;;  %v4200_v21 = vpack.c.bf16 %v2896_v47, %v2896_v47  ;;  %v1501_v16 = vsel %vm48_vm0, %v1495_v48, 0 }
  0xf6   :  { %3530 = vmatmul.mubr.msk.bf16.vlgmr.msra.gmra.mxu0 %vm44_vm1, %v3528_v44 }
  0xf7   :  { %v1494_v49 = vpop.permute.xlu0 %1493  ;;  %v1551_v50 = vpop.permute.xlu1 %1550  ;;  %1599 = vmatprep.mubr.bf16.mxu0 %v3659_v8 }
  0xf8   :  { %v1496_v51 = vsel %vm343_vm10, %v1492_v42, %v1494_v49 }
  0xf9   :  { %2908 = vrot.lane.b32.xlu0 %v4188_v45, %s3660_s14  ;;  %2910 = vrot.lane.b32.xlu1 %v4190_v46, %s3660_s14 }
  0xfa   :  { %3532 = vmatprep.subr.msk.bf16.mxu1 %vm48_vm0, %v1496_v51  ;;  %v3556_v51 = vld [vmem:[%s4546_s1 + $0x10] sm:$0xf] }
  0xfb   :  { %1521 = vmatpush1.bf16.msra.mxu1 %v1501_v16  ;;  %v1553_v15 = vpop.permute.xlu0 %1552  ;;  %v1555_v52 = vpop.permute.xlu1 %1554 }
  0xfc   :  { %v1556_v54 = vsel %vm406_vm11, %v1551_v50, %v1553_v15  ;;  %v1557_v55 = vsel %vm406_vm11, %v1553_v15, %v1555_v52 }
  0xfd   :  { %v1562_v57 = vsel %vm48_vm0, %v1556_v54, 0  ;;  %2912 = vrot.lane.b32.xlu0 %v4200_v21, %s3660_s14  ;;  %3017 = vrot.lane.b32.xlu1 %v4188_v45, %s3661_s15 }
  0xfe   :  { %3535 = vmatprep.subr.msk.bf16.mxu0 %vm48_vm0, %v1557_v55  ;;  %3533 = vmatmul.mubr.msk.bf16.vlgmr.msra.gmra.mxu1 %vm44_vm1, %v3531_v53  ;;  %v3559_v55 = vld [vmem:[%s4546_s1 + $0x14] sm:$0xf] }
  0xff   :  { %1582 = vmatpush1.bf16.msra.mxu0 %v1562_v57  ;;  %v1612_v59 = vpop.permute.xlu0 %1611  ;;  %v1614_v60 = vpop.permute.xlu1 %1613  ;;  %1660 = vmatprep.mubr.bf16.mxu1 %v3659_v8 }
 0x100   :  { %v1617_v63 = vsel %vm469_vm12, %v1612_v59, %v1614_v60 }
 0x101   :  { %3019 = vrot.lane.b32.xlu0 %v4190_v46, %s3661_s15  ;;  %3021 = vrot.lane.b32.xlu1 %v4200_v21, %s3661_s15  ;;  %v1623_v2 = vsel %vm48_vm0, %v1617_v63, 0 }
 0x102   :  { %3536 = vmatmul.mubr.msk.bf16.vlgmr.msra.gmra.mxu0 %vm44_vm1, %v3534_v61  ;;  %v3562_v61 = vld [vmem:[%s4546_s1 + $0x18] sm:$0xf] }
 0x103   :  { %v1616_v40 = vpop.permute.xlu0 %1615  ;;  %v1673_v39 = vpop.permute.xlu1 %1672  ;;  %1721 = vmatprep.mubr.bf16.mxu0 %v3659_v8 }
 0x104   :  { %v1618_v1 = vsel %vm469_vm12, %v1614_v60, %v1616_v40 }
 0x105   :  { %3078 = vrot.lane.b32.xlu0 %v4188_v45, %s3662_s18  ;;  %3080 = vrot.lane.b32.xlu1 %v4190_v46, %s3662_s18 }
 0x106   :  { %3538 = vmatprep.subr.msk.bf16.mxu1 %vm48_vm0, %v1618_v1 }
 0x107   :  { %1643 = vmatpush1.bf16.msra.mxu1 %v1623_v2  ;;  %v1675_v3 = vpop.permute.xlu0 %1674  ;;  %v1677_v4 = vpop.permute.xlu1 %1676 }
 0x108   :  { %v1678_v6 = vsel %vm532_vm13, %v1673_v39, %v1675_v3  ;;  %v1679_v10 = vsel %vm532_vm13, %v1675_v3, %v1677_v4  ;;  %v3565_v4 = vld [vmem:[%s4546_s1 + $0x1c] sm:$0xf] }
 0x109   :  { %v1684_v11 = vsel %vm48_vm0, %v1678_v6, 0  ;;  %3082 = vrot.lane.b32.xlu0 %v4200_v21, %s3662_s18  ;;  %3139 = vrot.lane.b32.xlu1 %v4188_v45, %s3663_s19 }
 0x10a   :  { %3541 = vmatprep.subr.msk.bf16.mxu0 %vm48_vm0, %v1679_v10  ;;  %3539 = vmatmul.mubr.msk.bf16.vlgmr.msra.gmra.mxu1 %vm44_vm1, %v3537_v5 }
 0x10b   :  { %1704 = vmatpush1.bf16.msra.mxu0 %v1684_v11  ;;  %v1763_v12 = vpop.permute.xlu0 %1762  ;;  %v1765_v14 = vpop.permute.xlu1 %1764  ;;  %1811 = vmatprep.mubr.bf16.mxu1 %v3659_v8 }
 0x10c   :  { %3548 = vmatprep.subr.msk.bf16.mxu0 %vm48_vm0, %v3885_v13  ;;  %v1768_v20 = vsel %vm41_vm6, %v1763_v12, %v1765_v14 }
 0x10d   :  { %3141 = vrot.lane.b32.xlu0 %v4190_v46, %s3663_s19  ;;  %3143 = vrot.lane.b32.xlu1 %v4200_v21, %s3663_s19  ;;  %v1774_v9 = vsel %vm48_vm0, %v1768_v20, 0  ;;  %v2394_v20 = vsel %vm48_vm0, %v4018_v17, 0  ;;  %v3574_v17 = vld [vmem:[%s4546_s1 + $0x4] sm:$0xf] }
 0x10e   :  { %3542 = vmatmul.mubr.msk.bf16.vlgmr.msra.gmra.mxu0 %vm44_vm1, %v3540_v18 }
 0x10f   :  { %v1767_v23 = vpop.permute.xlu0 %1766  ;;  %v1872_v24 = vpop.permute.xlu1 %1871  ;;  %1844 = vmatpush1.bf16.msra.mxu0 %v1824_v19  ;;  %1861 = vmatprep.mubr.bf16.mxu0 %v3659_v8 }
 0x110   :  { %v1769_v13 = vsel %vm41_vm6, %v1765_v14, %v1767_v23  ;;  %v3568_v14 = vld [vmem:[%s4546_s1 + $0x20] sm:$0xf] }
 0x111   :  { %3200 = vrot.lane.b32.xlu0 %v4188_v45, %s3664_s20  ;;  %3202 = vrot.lane.b32.xlu1 %v4190_v46, %s3664_s20 }
 0x112   :  { %3546 = vmatprep.subr.msk.bf16.mxu1 %vm48_vm0, %v1769_v13 }
 0x113   :  { %1794 = vmatpush1.bf16.msra.mxu1 %v1774_v9  ;;  %v1874_v25 = vpop.permute.xlu0 %1873  ;;  %v1876_v26 = vpop.permute.xlu1 %1875 }
 0x114   :  { %v1877_v28 = vsel %vm154_vm7, %v1872_v24, %v1874_v25  ;;  %v1878_v29 = vsel %vm154_vm7, %v1874_v25, %v1876_v26 }
 0x115   :  { %v1883_v31 = vsel %vm48_vm0, %v1877_v28, 0  ;;  %3204 = vrot.lane.b32.xlu0 %v4200_v21, %s3664_s20  ;;  %3261 = vrot.lane.b32.xlu1 %v4188_v45, %s3665_s21 }
 0x116   :  { %3551 = vmatprep.subr.msk.bf16.mxu1 %vm48_vm0, %v1878_v29  ;;  %3547 = vmatmul.mubr.msk.bf16.vlgmr.msra.gmra.mxu1 %vm44_vm1, %v3545_v27  ;;  %v2313_v27 = vld [vmem:[%s4546_s1] sm:$0xf] }
 0x117   :  { %1903 = vmatpush1.bf16.msra.mxu1 %v1883_v31  ;;  %v1933_v32 = vpop.permute.xlu0 %1932  ;;  %v1935_v33 = vpop.permute.xlu1 %1934  ;;  %3549 = vmatmul.mubr.msk.bf16.vlgmr.msra.gmra.mxu0 %vm44_vm1, %v1743_v30 }
 0x118   :  { %1920 = vmatprep.mubr.bf16.mxu1 %v3659_v8  ;;  %1981 = vmatprep.mubr.bf16.mxu0 %v3659_v8  ;;  %v1938_v34 = vsel %vm217_vm8, %v1933_v32, %v1935_v33 }
 0x119   :  { %3263 = vrot.lane.b32.xlu0 %v4190_v46, %s3665_s21  ;;  %3265 = vrot.lane.b32.xlu1 %v4200_v21, %s3665_s21  ;;  %v1944_v38 = vsel %vm48_vm0, %v1938_v34, 0 }
 0x11b   :  { %v1937_v7 = vpop.permute.xlu0 %1936  ;;  %v1994_v35 = vpop.permute.xlu1 %1993 }
 0x11c   :  { %v1939_v37 = vsel %vm217_vm8, %v1935_v33, %v1937_v7 }
 0x11d   :  { %3322 = vrot.lane.b32.xlu0 %v4188_v45, %s3666_s22  ;;  %3324 = vrot.lane.b32.xlu1 %v4190_v46, %s3666_s22 }
 0x11e   :  { %3554 = vmatprep.subr.msk.bf16.mxu0 %vm48_vm0, %v1939_v37  ;;  %3552 = vmatmul.mubr.msk.bf16.vlgmr.msra.gmra.mxu1 %vm44_vm1, %v3550_v36 }
 0x11f   :  { %1964 = vmatpush1.bf16.msra.mxu0 %v1944_v38  ;;  %v1996_v41 = vpop.permute.xlu0 %1995  ;;  %v1998_v42 = vpop.permute.xlu1 %1997  ;;  %2042 = vmatprep.mubr.bf16.mxu1 %v3659_v8 }
 0x120   :  { %v1999_v44 = vsel %vm280_vm9, %v1994_v35, %v1996_v41  ;;  %v2000_v47 = vsel %vm280_vm9, %v1996_v41, %v1998_v42  ;;  %v3579_v35 = vld [vmem:[%s4546_s1 + $0x8] sm:$0xf] }
 0x121   :  { %v2005_v48 = vsel %vm48_vm0, %v1999_v44, 0  ;;  %3326 = vrot.lane.b32.xlu0 %v4200_v21, %s3666_s22  ;;  %3383 = vrot.lane.b32.xlu1 %v4188_v45, %s3667_s25  ;;  %v3582_v44 = vld [vmem:[%s4546_s1 + $0xc] sm:$0xf] }
 0x122   :  { %3557 = vmatprep.subr.msk.bf16.mxu1 %vm48_vm0, %v2000_v47  ;;  %3555 = vmatmul.mubr.msk.bf16.vlgmr.msra.gmra.mxu0 %vm44_vm1, %v3553_v43 }
 0x123   :  { %2025 = vmatpush1.bf16.msra.mxu1 %v2005_v48  ;;  %v2055_v49 = vpop.permute.xlu0 %2054  ;;  %v2057_v50 = vpop.permute.xlu1 %2056  ;;  %2103 = vmatprep.mubr.bf16.mxu0 %v3659_v8 }
 0x124   :  { %v2060_v16 = vsel %vm343_vm10, %v2055_v49, %v2057_v50 }
 0x125   :  { %3385 = vrot.lane.b32.xlu0 %v4190_v46, %s3667_s25  ;;  %3387 = vrot.lane.b32.xlu1 %v4200_v21, %s3667_s25  ;;  %v2066_v54 = vsel %vm48_vm0, %v2060_v16, 0 }
 0x126   :  { %3558 = vmatmul.mubr.msk.bf16.vlgmr.msra.gmra.mxu1 %vm44_vm1, %v3556_v51 }
 0x127   :  { %v2059_v15 = vpop.permute.xlu0 %2058  ;;  %v2116_v52 = vpop.permute.xlu1 %2115  ;;  %2164 = vmatprep.mubr.bf16.mxu1 %v3659_v8 }
 0x128   :  { %v2061_v53 = vsel %vm343_vm10, %v2057_v50, %v2059_v15 }
 0x129   :  { %3560 = vmatprep.subr.msk.bf16.mxu0 %vm48_vm0, %v2061_v53 }
 0x12a   :  { %2086 = vmatpush1.bf16.msra.mxu0 %v2066_v54 }
 0x12b   :  { %v2118_v21 = vpop.permute.xlu0 %2117  ;;  %v2120_v57 = vpop.permute.xlu1 %2119 }
 0x12c   :  { %v2121_v58 = vsel %vm406_vm11, %v2116_v52, %v2118_v21  ;;  %v2122_v59 = vsel %vm406_vm11, %v2118_v21, %v2120_v57  ;;  %v3585_v52 = vld [vmem:[%s4546_s1 + $0x10] sm:$0xf] }
 0x12d   :  { %v2127_v60 = vsel %vm48_vm0, %v2121_v58, 0  ;;  %3563 = vmatprep.subr.msk.bf16.mxu1 %vm48_vm0, %v2122_v59  ;;  %3561 = vmatmul.mubr.msk.bf16.vlgmr.msra.gmra.mxu0 %vm44_vm1, %v3559_v55 }
 0x12e   :  { %2147 = vmatpush1.bf16.msra.mxu1 %v2127_v60  ;;  %2225 = vmatprep.mubr.bf16.mxu0 %v3659_v8 }
 0x12f   :  { %v2177_v62 = vpop.permute.xlu0 %2176  ;;  %v2179_v63 = vpop.permute.xlu1 %2178 }
 0x130   :  { %v2182_v40 = vsel %vm469_vm12, %v2177_v62, %v2179_v63 }
 0x131   :  { %3564 = vmatmul.mubr.msk.bf16.vlgmr.msra.gmra.mxu1 %vm44_vm1, %v3562_v61  ;;  %v2188_v3 = vsel %vm48_vm0, %v2182_v40, 0 }
 0x132   :  { %2286 = vmatprep.mubr.bf16.mxu1 %v3659_v8 }
 0x133   :  { %v2181_v39 = vpop.permute.xlu0 %2180  ;;  %v2238_v1 = vpop.permute.xlu1 %2237 }
 0x134   :  { %v2183_v2 = vsel %vm469_vm12, %v2179_v63, %v2181_v39 }
 0x135   :  { %3566 = vmatprep.subr.msk.bf16.mxu0 %vm48_vm0, %v2183_v2 }
 0x136   :  { %2208 = vmatpush1.bf16.msra.mxu0 %v2188_v3 }
 0x137   :  { %v2240_v5 = vpop.permute.xlu0 %2239  ;;  %v2242_v6 = vpop.permute.xlu1 %2241 }
 0x138   :  { %v2243_v10 = vsel %vm532_vm13, %v2238_v1, %v2240_v5  ;;  %v2244_v11 = vsel %vm532_vm13, %v2240_v5, %v2242_v6 }
 0x139   :  { %v2249_v12 = vsel %vm48_vm0, %v2243_v10, 0  ;;  %3569 = vmatprep.subr.msk.bf16.mxu1 %vm48_vm0, %v2244_v11  ;;  %3567 = vmatmul.mubr.msk.bf16.vlgmr.msra.gmra.mxu0 %vm44_vm1, %v3565_v4 }
 0x13a   :  { %2269 = vmatpush1.bf16.msra.mxu1 %v2249_v12  ;;  %2381 = vmatprep.mubr.bf16.mxu0 %v3659_v8 }
 0x13b   :  { %v2333_v18 = vpop.permute.xlu0 %2332  ;;  %v2335_v19 = vpop.permute.xlu1 %2334  ;;  %3577 = vmatprep.subr.msk.bf16.mxu1 %vm48_vm0, %v4032_v22 }
 0x13c   :  { %v2338_v23 = vsel %vm41_vm6, %v2333_v18, %v2335_v19 }
 0x13d   :  { %3570 = vmatmul.mubr.msk.bf16.vlgmr.msra.gmra.mxu1 %vm44_vm1, %v3568_v14  ;;  %v2344_v25 = vsel %vm48_vm0, %v2338_v23, 0 }
 0x13e   :  { %2414 = vmatpush1.bf16.msra.mxu1 %v2394_v20  ;;  %2431 = vmatprep.mubr.bf16.mxu1 %v3659_v8 }
 0x13f   :  { %v2337_v24 = vpop.permute.xlu0 %2336  ;;  %v2442_v13 = vpop.permute.xlu1 %2441 }
 0x140   :  { %v2339_v9 = vsel %vm41_vm6, %v2335_v19, %v2337_v24  ;;  %v3591_v24 = vld [vmem:[%s4546_s1 + $0x18] sm:$0xf] }
 0x141   :  { %3575 = vmatprep.subr.msk.bf16.mxu0 %vm48_vm0, %v2339_v9 }
 0x142   :  { %2364 = vmatpush1.bf16.msra.mxu0 %v2344_v25 }
 0x143   :  { %v2444_v22 = vpop.permute.xlu0 %2443  ;;  %v2446_v26 = vpop.permute.xlu1 %2445 }
 0x144   :  { %v2447_v28 = vsel %vm154_vm7, %v2442_v13, %v2444_v22  ;;  %v2448_v29 = vsel %vm154_vm7, %v2444_v22, %v2446_v26 }
 0x145   :  { %v2453_v30 = vsel %vm48_vm0, %v2447_v28, 0  ;;  %3580 = vmatprep.subr.msk.bf16.mxu0 %vm48_vm0, %v2448_v29  ;;  %3576 = vmatmul.mubr.msk.bf16.vlgmr.msra.gmra.mxu0 %vm44_vm1, %v3574_v17 }
 0x146   :  { %2473 = vmatpush1.bf16.msra.mxu0 %v2453_v30  ;;  %3578 = vmatmul.mubr.msk.bf16.vlgmr.msra.gmra.mxu1 %vm44_vm1, %v2313_v27  ;;  %v89_v31 = vpop.f32.mrf.mxu0 }
 0x147   :  { %v2503_v32 = vpop.permute.xlu0 %2502  ;;  %v2505_v33 = vpop.permute.xlu1 %2504  ;;  %2490 = vmatprep.mubr.bf16.mxu0 %v3659_v8  ;;  %2551 = vmatprep.mubr.bf16.mxu1 %v3659_v8  ;;  %v140_v57 = vadd.f32 %v4204_v0, %v89_v31 }
 0x148   :  { %v91_v34 = vpop.f32.mrf.mxu0  ;;  %v2508_v7 = vsel %vm217_vm8, %v2503_v32, %v2505_v33 }
 0x149   :  { %v2514_v43 = vsel %vm48_vm0, %v2508_v7, 0  ;;  %v142_v60 = vadd.f32 %v4211_v56, %v91_v34  ;;  %v3588_v56 = vld [vmem:[%s4546_s1 + $0x14] sm:$0xf] }
 0x14a   :  { %v93_v36 = vpop.f32.mrf.mxu0 }
 0x14b   :  { %v2507_v37 = vpop.permute.xlu0 %2506  ;;  %v2564_v38 = vpop.permute.xlu1 %2563 }
 0x14c   :  { %v2509_v41 = vsel %vm217_vm8, %v2505_v33, %v2507_v37  ;;  %v94_v42 = vpop.f32.mrf.mxu0  ;;  %v3594_v37 = vld [vmem:[%s4546_s1 + $0x1c] sm:$0xf] }
 0x14d   :  { %3583 = vmatprep.subr.msk.bf16.mxu1 %vm48_vm0, %v2509_v41  ;;  %3581 = vmatmul.mubr.msk.bf16.vlgmr.msra.gmra.mxu0 %vm44_vm1, %v3579_v35 }
 0x14e   :  { %2534 = vmatpush1.bf16.msra.mxu1 %v2514_v43  ;;  %2612 = vmatprep.mubr.bf16.mxu0 %v3659_v8  ;;  %v200_v47 = vpop.f32.mrf.mxu0 }
 0x14f   :  { %v2566_v48 = vpop.permute.xlu0 %2565  ;;  %v2568_v49 = vpop.permute.xlu1 %2567  ;;  %v207_v1 = vadd.f32 %v200_v47, %v140_v57 }
 0x150   :  { %v2569_v50 = vsel %vm280_vm9, %v2564_v38, %v2566_v48  ;;  %v2570_v51 = vsel %vm280_vm9, %v2566_v48, %v2568_v49  ;;  %v202_v16 = vpop.f32.mrf.mxu0 }
 0x151   :  { %v2575_v15 = vsel %vm48_vm0, %v2569_v50, 0  ;;  %3586 = vmatprep.subr.msk.bf16.mxu0 %vm48_vm0, %v2570_v51  ;;  %3584 = vmatmul.mubr.msk.bf16.vlgmr.msra.gmra.mxu1 %vm44_vm1, %v3582_v44  ;;  %v208_v5 = vadd.f32 %v202_v16, %v142_v60  ;;  %v3597_v51 = vld [vmem:[%s4546_s1 + $0x20] sm:$0xf] }
 0x152   :  { %2595 = vmatpush1.bf16.msra.mxu0 %v2575_v15  ;;  %2673 = vmatprep.mubr.bf16.mxu1 %v3659_v8  ;;  %v263_v53 = vpop.f32.mrf.mxu1  ;;  %v204_v54 = vpop.f32.mrf.mxu0 }
 0x153   :  { %v2625_v55 = vpop.permute.xlu0 %2624  ;;  %v2627_v21 = vpop.permute.xlu1 %2626  ;;  %v270_v12 = vadd.f32 %v263_v53, %v207_v1  ;;  %v2970_v53 = vsel %vm48_vm0, %v4188_v45, 0  ;;  %v3602_v1 = vld [vmem:[%s4546_s1 + $0x4] sm:$0xf] }
 0x154   :  { %v265_v58 = vpop.f32.mrf.mxu1  ;;  %v205_v59 = vpop.f32.mrf.mxu0  ;;  %v2630_v61 = vsel %vm343_vm10, %v2625_v55, %v2627_v21 }
 0x155   :  { %3587 = vmatmul.mubr.msk.bf16.vlgmr.msra.gmra.mxu0 %vm44_vm1, %v3585_v52  ;;  %v2636_v0 = vsel %vm48_vm0, %v2630_v61, 0  ;;  %v271_v23 = vadd.f32 %v265_v58, %v208_v5 }
 0x156   :  { %2734 = vmatprep.mubr.bf16.mxu0 %v3659_v8  ;;  %v267_v62 = vpop.f32.mrf.mxu1  ;;  %v326_v63 = vpop.f32.mrf.mxu0 }
 0x157   :  { %v2629_v40 = vpop.permute.xlu0 %2628  ;;  %v2686_v39 = vpop.permute.xlu1 %2685  ;;  %v333_v17 = vadd.f32 %v326_v63, %v270_v12 }
 0x158   :  { %v2631_v2 = vsel %vm343_vm10, %v2627_v21, %v2629_v40  ;;  %v268_v3 = vpop.f32.mrf.mxu1  ;;  %v328_v4 = vpop.f32.mrf.mxu0 }
 0x159   :  { %3589 = vmatprep.subr.msk.bf16.mxu1 %vm48_vm0, %v2631_v2  ;;  %v334_v26 = vadd.f32 %v328_v4, %v271_v23 }
 0x15a   :  { %2656 = vmatpush1.bf16.msra.mxu1 %v2636_v0  ;;  %v330_v6 = vpop.f32.mrf.mxu0  ;;  %v2903_v0 = vld [vmem:[%s4546_s1] sm:$0xf] }
 0x15b   :  { %v2688_v10 = vpop.permute.xlu0 %2687  ;;  %v2690_v11 = vpop.permute.xlu1 %2689 }
 0x15c   :  { %v2691_v14 = vsel %vm406_vm11, %v2686_v39, %v2688_v10  ;;  %v2692_v18 = vsel %vm406_vm11, %v2688_v10, %v2690_v11  ;;  %v331_v19 = vpop.f32.mrf.mxu0 }
 0x15d   :  { %v2697_v20 = vsel %vm48_vm0, %v2691_v14, 0  ;;  %3592 = vmatprep.subr.msk.bf16.mxu0 %vm48_vm0, %v2692_v18  ;;  %3590 = vmatmul.mubr.msk.bf16.vlgmr.msra.gmra.mxu1 %vm44_vm1, %v3588_v56 }
 0x15e   :  { %2717 = vmatpush1.bf16.msra.mxu0 %v2697_v20  ;;  %2795 = vmatprep.mubr.bf16.mxu1 %v3659_v8  ;;  %v389_v13 = vpop.f32.mrf.mxu1 }
 0x15f   :  { %v2747_v9 = vpop.permute.xlu0 %2746  ;;  %v2749_v25 = vpop.permute.xlu1 %2748  ;;  %v396_v32 = vadd.f32 %v389_v13, %v333_v17 }
 0x160   :  { %v391_v22 = vpop.f32.mrf.mxu1  ;;  %v2752_v27 = vsel %vm469_vm12, %v2747_v9, %v2749_v25 }
 0x161   :  { %3593 = vmatmul.mubr.msk.bf16.vlgmr.msra.gmra.mxu0 %vm44_vm1, %v3591_v24  ;;  %v2758_v35 = vsel %vm48_vm0, %v2752_v27, 0  ;;  %v397_v36 = vadd.f32 %v391_v22, %v334_v26  ;;  %v3607_v24 = vld [vmem:[%s4546_s1 + $0x8] sm:$0xf] }
 0x162   :  { %2856 = vmatprep.mubr.bf16.mxu0 %v3659_v8  ;;  %v393_v28 = vpop.f32.mrf.mxu1  ;;  %v452_v29 = vpop.f32.mrf.mxu0 }
 0x163   :  { %v2751_v30 = vpop.permute.xlu0 %2750  ;;  %v2808_v31 = vpop.permute.xlu1 %2807  ;;  %v459_v43 = vadd.f32 %v452_v29, %v396_v32  ;;  %v3610_v29 = vld [vmem:[%s4546_s1 + $0xc] sm:$0xf] }
 0x164   :  { %v2753_v33 = vsel %vm469_vm12, %v2749_v25, %v2751_v30  ;;  %v394_v34 = vpop.f32.mrf.mxu1  ;;  %v454_v7 = vpop.f32.mrf.mxu0 }
 0x165   :  { %3595 = vmatprep.subr.msk.bf16.mxu1 %vm48_vm0, %v2753_v33  ;;  %v460_v50 = vadd.f32 %v454_v7, %v397_v36 }
 0x166   :  { %2778 = vmatpush1.bf16.msra.mxu1 %v2758_v35  ;;  %v456_v38 = vpop.f32.mrf.mxu0 }
 0x167   :  { %v2810_v41 = vpop.permute.xlu0 %2809  ;;  %v2812_v42 = vpop.permute.xlu1 %2811 }
 0x168   :  { %v2813_v44 = vsel %vm532_vm13, %v2808_v31, %v2810_v41  ;;  %v2814_v47 = vsel %vm532_vm13, %v2810_v41, %v2812_v42  ;;  %v457_v48 = vpop.f32.mrf.mxu0 }
 0x169   :  { %v2819_v49 = vsel %vm48_vm0, %v2813_v44, 0  ;;  %3598 = vmatprep.subr.msk.bf16.mxu0 %vm48_vm0, %v2814_v47  ;;  %3596 = vmatmul.mubr.msk.bf16.vlgmr.msra.gmra.mxu1 %vm44_vm1, %v3594_v37  ;;  %v3613_v37 = vld [vmem:[%s4546_s1 + $0x10] sm:$0xf] }
 0x16a   :  { %2839 = vmatpush1.bf16.msra.mxu0 %v2819_v49  ;;  %2957 = vmatprep.mubr.bf16.mxu1 %v3659_v8  ;;  %v515_v16 = vpop.f32.mrf.mxu1 }
 0x16b   :  { %v2909_v15 = vpop.permute.xlu0 %2908  ;;  %v2911_v52 = vpop.permute.xlu1 %2910  ;;  %3605 = vmatprep.subr.msk.bf16.mxu0 %vm48_vm0, %v4190_v46  ;;  %v522_v54 = vadd.f32 %v515_v16, %v459_v43 }
 0x16c   :  { %v517_v55 = vpop.f32.mrf.mxu1  ;;  %v2914_v57 = vsel %vm41_vm6, %v2909_v15, %v2911_v52 }
 0x16d   :  { %3599 = vmatmul.mubr.msk.bf16.vlgmr.msra.gmra.mxu0 %vm44_vm1, %v3597_v51  ;;  %v523_v21 = vadd.f32 %v517_v55, %v460_v50  ;;  %v2920_v45 = vsel %vm48_vm0, %v2914_v57, 0 }
 0x16e   :  { %2990 = vmatpush1.bf16.msra.mxu0 %v2970_v53  ;;  %3007 = vmatprep.mubr.bf16.mxu0 %v3659_v8  ;;  %v519_v58 = vpop.f32.mrf.mxu1  ;;  %v578_v59 = vpop.f32.mrf.mxu0 }
 0x16f   :  { %v2913_v60 = vpop.permute.xlu0 %2912  ;;  %v3018_v61 = vpop.permute.xlu1 %3017  ;;  %v585_v62 = vadd.f32 %v578_v59, %v522_v54  ;;  %v3616_v59 = vld [vmem:[%s4546_s1 + $0x14] sm:$0xf] }
 0x170   :  { %v2915_v46 = vsel %vm41_vm6, %v2911_v52, %v2913_v60  ;;  %v520_v63 = vpop.f32.mrf.mxu1  ;;  %v580_v40 = vpop.f32.mrf.mxu0 }
 0x171   :  { %3603 = vmatprep.subr.msk.bf16.mxu1 %vm48_vm0, %v2915_v46  ;;  %v586_v39 = vadd.f32 %v580_v40, %v523_v21 }
 0x172   :  { %2940 = vmatpush1.bf16.msra.mxu1 %v2920_v45  ;;  %v582_v2 = vpop.f32.mrf.mxu0 }
 0x173   :  { %v3020_v3 = vpop.permute.xlu0 %3019  ;;  %v3022_v4 = vpop.permute.xlu1 %3021  ;;  %v3630_v5 = vpack.c.bf16 %v586_v39, %v585_v62  ;;  %v3619_v2 = vld [vmem:[%s4546_s1 + $0x18] sm:$0xf] }
 0x174   :  { %v3023_v56 = vsel %vm154_vm7, %v3018_v61, %v3020_v3  ;;  %v3024_v6 = vsel %vm154_vm7, %v3020_v3, %v3022_v4  ;;  %v583_v10 = vpop.f32.mrf.mxu0 }
 0x175   :  { %v3029_v11 = vsel %vm48_vm0, %v3023_v56, 0  ;;  %3608 = vmatprep.subr.msk.bf16.mxu1 %vm48_vm0, %v3024_v6  ;;  %3604 = vmatmul.mubr.msk.bf16.vlgmr.msra.gmra.mxu1 %vm44_vm1, %v3602_v1  ;;  %595 = vst [vmem:[%s4547_s2] sm:$0xff] %v3630_v5 }
 0x176   :  { %3049 = vmatpush1.bf16.msra.mxu1 %v3029_v11  ;;  %3606 = vmatmul.mubr.msk.bf16.vlgmr.msra.gmra.mxu0 %vm44_vm1, %v2903_v0  ;;  %v672_v12 = vpop.f32.mrf.mxu1 }
 0x177   :  { %v3079_v14 = vpop.permute.xlu0 %3078  ;;  %v3081_v18 = vpop.permute.xlu1 %3080  ;;  %3066 = vmatprep.mubr.bf16.mxu1 %v3659_v8  ;;  %3127 = vmatprep.mubr.bf16.mxu0 %v3659_v8 }
 0x178   :  { %v674_v19 = vpop.f32.mrf.mxu1  ;;  %v722_v20 = vpop.f32.mrf.mxu0  ;;  %v3084_v23 = vsel %vm217_vm8, %v3079_v14, %v3081_v18 }
 0x179   :  { %v3090_v28 = vsel %vm48_vm0, %v3084_v23, 0  ;;  %v723_v44 = vadd.f32 %v722_v20, %v672_v12 }
 0x17a   :  { %v676_v13 = vpop.f32.mrf.mxu1  ;;  %v724_v9 = vpop.f32.mrf.mxu0 }
 0x17b   :  { %v3083_v25 = vpop.permute.xlu0 %3082  ;;  %v3140_v17 = vpop.permute.xlu1 %3139  ;;  %v725_v49 = vadd.f32 %v724_v9, %v674_v19 }
 0x17c   :  { %v3085_v22 = vsel %vm217_vm8, %v3081_v18, %v3083_v25  ;;  %v677_v26 = vpop.f32.mrf.mxu1  ;;  %v726_v27 = vpop.f32.mrf.mxu0  ;;  %v3622_v25 = vld [vmem:[%s4546_s1 + $0x1c] sm:$0xf] }
 0x17d   :  { %3611 = vmatprep.subr.msk.bf16.mxu0 %vm48_vm0, %v3085_v22  ;;  %3609 = vmatmul.mubr.msk.bf16.vlgmr.msra.gmra.mxu1 %vm44_vm1, %v3607_v24 }
 0x17e   :  { %3110 = vmatpush1.bf16.msra.mxu0 %v3090_v28  ;;  %3188 = vmatprep.mubr.bf16.mxu1 %v3659_v8  ;;  %v781_v30 = vpop.f32.mrf.mxu1  ;;  %v727_v31 = vpop.f32.mrf.mxu0 }
 0x17f   :  { %v3142_v32 = vpop.permute.xlu0 %3141  ;;  %v3144_v33 = vpop.permute.xlu1 %3143  ;;  %v788_v53 = vadd.f32 %v781_v30, %v723_v44 }
 0x180   :  { %v3145_v34 = vsel %vm280_vm9, %v3140_v17, %v3142_v32  ;;  %v3146_v7 = vsel %vm280_vm9, %v3142_v32, %v3144_v33  ;;  %v783_v35 = vpop.f32.mrf.mxu1  ;;  %v3625_v32 = vld [vmem:[%s4546_s1 + $0x20] sm:$0xf] }
 0x181   :  { %v3151_v36 = vsel %vm48_vm0, %v3145_v34, 0  ;;  %3614 = vmatprep.subr.msk.bf16.mxu1 %vm48_vm0, %v3146_v7  ;;  %3612 = vmatmul.mubr.msk.bf16.vlgmr.msra.gmra.mxu0 %vm44_vm1, %v3610_v29  ;;  %v789_v58 = vadd.f32 %v783_v35, %v725_v49 }
 0x182   :  { %3171 = vmatpush1.bf16.msra.mxu1 %v3151_v36  ;;  %3249 = vmatprep.mubr.bf16.mxu0 %v3659_v8  ;;  %v785_v38 = vpop.f32.mrf.mxu1  ;;  %v842_v41 = vpop.f32.mrf.mxu0 }
 0x183   :  { %v3201_v42 = vpop.permute.xlu0 %3200  ;;  %v3203_v43 = vpop.permute.xlu1 %3202  ;;  %v849_v46 = vadd.f32 %v842_v41, %v788_v53 }
 0x184   :  { %v786_v47 = vpop.f32.mrf.mxu1  ;;  %v844_v48 = vpop.f32.mrf.mxu0  ;;  %v3206_v50 = vsel %vm343_vm10, %v3201_v42, %v3203_v43 }
 0x185   :  { %3615 = vmatmul.mubr.msk.bf16.vlgmr.msra.gmra.mxu1 %vm44_vm1, %v3613_v37  ;;  %v3212_v57 = vsel %vm48_vm0, %v3206_v50, 0  ;;  %v850_v1 = vadd.f32 %v844_v48, %v789_v58 }
 0x186   :  { %3310 = vmatprep.mubr.bf16.mxu1 %v3659_v8  ;;  %v903_v51 = vpop.f32.mrf.mxu1  ;;  %v846_v16 = vpop.f32.mrf.mxu0 }
 0x187   :  { %v3205_v15 = vpop.permute.xlu0 %3204  ;;  %v3262_v52 = vpop.permute.xlu1 %3261  ;;  %v910_v5 = vadd.f32 %v903_v51, %v849_v46 }
 0x188   :  { %v3207_v54 = vsel %vm343_vm10, %v3203_v43, %v3205_v15  ;;  %v905_v55 = vpop.f32.mrf.mxu1  ;;  %v847_v21 = vpop.f32.mrf.mxu0 }
 0x189   :  { %3617 = vmatprep.subr.msk.bf16.mxu0 %vm48_vm0, %v3207_v54  ;;  %v911_v6 = vadd.f32 %v905_v55, %v850_v1 }
 0x18a   :  { %3232 = vmatpush1.bf16.msra.mxu0 %v3212_v57  ;;  %v907_v60 = vpop.f32.mrf.mxu1 }
 0x18b   :  { %v3264_v61 = vpop.permute.xlu0 %3263  ;;  %v3266_v62 = vpop.permute.xlu1 %3265 }
 0x18c   :  { %v3267_v63 = vsel %vm406_vm11, %v3262_v52, %v3264_v61  ;;  %v3268_v40 = vsel %vm406_vm11, %v3264_v61, %v3266_v62  ;;  %v908_v45 = vpop.f32.mrf.mxu1 }
 0x18d   :  { %v3273_v39 = vsel %vm48_vm0, %v3267_v63, 0  ;;  %3618 = vmatmul.mubr.msk.bf16.vlgmr.msra.gmra.mxu0 %vm44_vm1, %v3616_v59  ;;  %3620 = vmatprep.subr.msk.bf16.mxu1 %vm48_vm0, %v3268_v40 }
 0x18e   :  { %3293 = vmatpush1.bf16.msra.mxu1 %v3273_v39  ;;  %3371 = vmatprep.mubr.bf16.mxu0 %v3659_v8  ;;  %v964_v3 = vpop.f32.mrf.mxu0 }
 0x18f   :  { %v3323_v4 = vpop.permute.xlu0 %3322  ;;  %v3325_v0 = vpop.permute.xlu1 %3324  ;;  %v971_v19 = vadd.f32 %v964_v3, %v910_v5 }
 0x190   :  { %v966_v56 = vpop.f32.mrf.mxu0  ;;  %v3328_v10 = vsel %vm469_vm12, %v3323_v4, %v3325_v0 }
 0x191   :  { %3621 = vmatmul.mubr.msk.bf16.vlgmr.msra.gmra.mxu1 %vm44_vm1, %v3619_v2  ;;  %v3334_v13 = vsel %vm48_vm0, %v3328_v10, 0  ;;  %v972_v9 = vadd.f32 %v966_v56, %v911_v6 }
 0x192   :  { %3432 = vmatprep.mubr.bf16.mxu1 %v3659_v8  ;;  %v1025_v11 = vpop.f32.mrf.mxu1  ;;  %v968_v12 = vpop.f32.mrf.mxu0 }
 0x193   :  { %v3327_v14 = vpop.permute.xlu0 %3326  ;;  %v3384_v18 = vpop.permute.xlu1 %3383  ;;  %v1032_v26 = vadd.f32 %v1025_v11, %v971_v19 }
 0x194   :  { %v3329_v20 = vsel %vm469_vm12, %v3325_v0, %v3327_v14  ;;  %v1027_v23 = vpop.f32.mrf.mxu1  ;;  %v969_v24 = vpop.f32.mrf.mxu0 }
 0x195   :  { %3623 = vmatprep.subr.msk.bf16.mxu0 %vm48_vm0, %v3329_v20  ;;  %v1033_v31 = vadd.f32 %v1027_v23, %v972_v9 }
 0x196   :  { %3354 = vmatpush1.bf16.msra.mxu0 %v3334_v13  ;;  %v1029_v8 = vpop.f32.mrf.mxu1 }
 0x197   :  { %v3386_v17 = vpop.permute.xlu0 %3385  ;;  %v3388_v22 = vpop.permute.xlu1 %3387 }
 0x198   :  { %v3389_v27 = vsel %vm532_vm13, %v3384_v18, %v3386_v17  ;;  %v3390_v28 = vsel %vm532_vm13, %v3386_v17, %v3388_v22  ;;  %v1030_v29 = vpop.f32.mrf.mxu1 }
 0x199   :  { %v3395_v30 = vsel %vm48_vm0, %v3389_v27, 0  ;;  %3624 = vmatmul.mubr.msk.bf16.vlgmr.msra.gmra.mxu0 %vm44_vm1, %v3622_v25  ;;  %3626 = vmatprep.subr.msk.bf16.mxu1 %vm48_vm0, %v3390_v28 }
 0x19a   :  { %3415 = vmatpush1.bf16.msra.mxu1 %v3395_v30  ;;  %v1086_v33 = vpop.f32.mrf.mxu0 }
 0x19b   :  { %v1093_v34 = vadd.f32 %v1086_v33, %v1032_v26 }
 0x19c   :  { %v1088_v7 = vpop.f32.mrf.mxu0 }
 0x19d   :  { %3627 = vmatmul.mubr.msk.bf16.vlgmr.msra.gmra.mxu1 %vm44_vm1, %v3625_v32  ;;  %v1094_v35 = vadd.f32 %v1088_v7, %v1033_v31 }
 0x19e   :  { %v1147_v36 = vpop.f32.mrf.mxu1  ;;  %v1090_v37 = vpop.f32.mrf.mxu0 }
 0x19f   :  { %v1154_v38 = vadd.f32 %v1147_v36, %v1093_v34 }
 0x1a0   :  { %v1149_v41 = vpop.f32.mrf.mxu1  ;;  %v1091_v42 = vpop.f32.mrf.mxu0 }
 0x1a1   :  { %v1155_v43 = vadd.f32 %v1149_v41, %v1094_v35 }
 0x1a2   :  { %v1151_v44 = vpop.f32.mrf.mxu1 }
 0x1a3   :  { %v3631_v47 = vpack.c.bf16 %v1155_v43, %v1154_v38 }
 0x1a4   :  { %v1152_v48 = vpop.f32.mrf.mxu1 }
 0x1a5   :  { %3516 = vst [vmem:[%s4547_s2 + $0x8] sm:$0xff] %v3631_v47 }
 0x1a6   :  { %v1248_v49 = vpop.f32.mrf.mxu0 }
 0x1a7   :  { %v1298_v50 = vpop.f32.mrf.mxu1 }
 0x1a8   :  { %v1250_v51 = vpop.f32.mrf.mxu0  ;;  %v1299_v59 = vadd.f32 %v1298_v50, %v1248_v49 }
 0x1a9   :  { %v1300_v16 = vpop.f32.mrf.mxu1 }
 0x1aa   :  { %v1252_v15 = vpop.f32.mrf.mxu0  ;;  %v1301_v62 = vadd.f32 %v1300_v16, %v1250_v51 }
 0x1ab   :  { %v1302_v52 = vpop.f32.mrf.mxu1 }
 0x1ac   :  { %v1253_v53 = vpop.f32.mrf.mxu0 }
 0x1ad   :  { %v1303_v54 = vpop.f32.mrf.mxu1 }
 0x1ae   :  { %v1357_v55 = vpop.f32.mrf.mxu0 }
 0x1af   :  { %v1364_v40 = vadd.f32 %v1357_v55, %v1299_v59 }
 0x1b0   :  { %v1359_v21 = vpop.f32.mrf.mxu0 }
 0x1b1   :  { %v1365_v1 = vadd.f32 %v1359_v21, %v1301_v62 }
 0x1b2   :  { %v1418_v57 = vpop.f32.mrf.mxu1  ;;  %v1361_v58 = vpop.f32.mrf.mxu0 }
 0x1b3   :  { %v1425_v3 = vadd.f32 %v1418_v57, %v1364_v40 }
 0x1b4   :  { %v1420_v60 = vpop.f32.mrf.mxu1  ;;  %v1362_v61 = vpop.f32.mrf.mxu0 }
 0x1b5   :  { %v1426_v0 = vadd.f32 %v1420_v60, %v1365_v1 }
 0x1b6   :  { %v1422_v46 = vpop.f32.mrf.mxu1  ;;  %v1479_v63 = vpop.f32.mrf.mxu0 }
 0x1b7   :  { %v1486_v56 = vadd.f32 %v1479_v63, %v1425_v3 }
 0x1b8   :  { %v1423_v45 = vpop.f32.mrf.mxu1  ;;  %v1481_v39 = vpop.f32.mrf.mxu0 }
 0x1b9   :  { %v1487_v10 = vadd.f32 %v1481_v39, %v1426_v0 }
 0x1ba   :  { %v1483_v2 = vpop.f32.mrf.mxu0 }
 0x1bc   :  { %v1484_v4 = vpop.f32.mrf.mxu0 }
 0x1be   :  { %v1540_v5 = vpop.f32.mrf.mxu1 }
 0x1bf   :  { %v1547_v14 = vadd.f32 %v1540_v5, %v1486_v56 }
 0x1c0   :  { %v1542_v6 = vpop.f32.mrf.mxu1 }
 0x1c1   :  { %v1548_v20 = vadd.f32 %v1542_v6, %v1487_v10 }
 0x1c2   :  { %v1544_v11 = vpop.f32.mrf.mxu1  ;;  %v1601_v12 = vpop.f32.mrf.mxu0 }
 0x1c3   :  { %v1608_v24 = vadd.f32 %v1601_v12, %v1547_v14 }
 0x1c4   :  { %v1545_v18 = vpop.f32.mrf.mxu1  ;;  %v1603_v19 = vpop.f32.mrf.mxu0 }
 0x1c5   :  { %v1609_v9 = vadd.f32 %v1603_v19, %v1548_v20 }
 0x1c6   :  { %v1605_v23 = vpop.f32.mrf.mxu0 }
 0x1c8   :  { %v1606_v13 = vpop.f32.mrf.mxu0 }
 0x1ca   :  { %v1662_v25 = vpop.f32.mrf.mxu1 }
 0x1cb   :  { %v1669_v8 = vadd.f32 %v1662_v25, %v1608_v24 }
 0x1cc   :  { %v1664_v17 = vpop.f32.mrf.mxu1 }
 0x1cd   :  { %v1670_v22 = vadd.f32 %v1664_v17, %v1609_v9 }
 0x1ce   :  { %v1666_v26 = vpop.f32.mrf.mxu1  ;;  %v1723_v27 = vpop.f32.mrf.mxu0 }
 0x1cf   :  { %v1730_v28 = vadd.f32 %v1723_v27, %v1669_v8 }
 0x1d0   :  { %v1667_v29 = vpop.f32.mrf.mxu1  ;;  %v1725_v30 = vpop.f32.mrf.mxu0 }
 0x1d1   :  { %v1731_v31 = vadd.f32 %v1725_v30, %v1670_v22 }
 0x1d2   :  { %v1727_v32 = vpop.f32.mrf.mxu0 }
 0x1d3   :  { %v3632_v33 = vpack.c.bf16 %v1731_v31, %v1730_v28 }
 0x1d4   :  { %v1728_v34 = vpop.f32.mrf.mxu0 }
 0x1d5   :  { %1740 = vst [vmem:[%s4548_s3] sm:$0xff] %v3632_v33 }
 0x1d6   :  { %v1813_v7 = vpop.f32.mrf.mxu1 }
 0x1d7   :  { %v1863_v35 = vpop.f32.mrf.mxu0 }
 0x1d8   :  { %v1815_v36 = vpop.f32.mrf.mxu1  ;;  %v1864_v48 = vadd.f32 %v1863_v35, %v1813_v7 }
 0x1d9   :  { %v1865_v37 = vpop.f32.mrf.mxu0 }
 0x1da   :  { %v1817_v38 = vpop.f32.mrf.mxu1  ;;  %v1866_v51 = vadd.f32 %v1865_v37, %v1815_v36 }
 0x1db   :  { %v1867_v41 = vpop.f32.mrf.mxu0 }
 0x1dc   :  { %v1818_v42 = vpop.f32.mrf.mxu1 }
 0x1dd   :  { %v1868_v43 = vpop.f32.mrf.mxu0 }
 0x1de   :  { %v1922_v44 = vpop.f32.mrf.mxu1 }
 0x1df   :  { %v1929_v52 = vadd.f32 %v1922_v44, %v1864_v48 }
 0x1e0   :  { %v1924_v47 = vpop.f32.mrf.mxu1 }
 0x1e1   :  { %v1930_v55 = vadd.f32 %v1924_v47, %v1866_v51 }
 0x1e2   :  { %v1926_v49 = vpop.f32.mrf.mxu1  ;;  %v1983_v50 = vpop.f32.mrf.mxu0 }
 0x1e3   :  { %v1990_v58 = vadd.f32 %v1983_v50, %v1929_v52 }
 0x1e4   :  { %v1927_v16 = vpop.f32.mrf.mxu1  ;;  %v1985_v15 = vpop.f32.mrf.mxu0 }
 0x1e5   :  { %v1991_v60 = vadd.f32 %v1985_v15, %v1930_v55 }
 0x1e6   :  { %v2044_v53 = vpop.f32.mrf.mxu1  ;;  %v1987_v54 = vpop.f32.mrf.mxu0 }
 0x1e7   :  { %v2051_v46 = vadd.f32 %v2044_v53, %v1990_v58 }
 0x1e8   :  { %v2046_v21 = vpop.f32.mrf.mxu1  ;;  %v1988_v57 = vpop.f32.mrf.mxu0 }
 0x1e9   :  { %v2052_v40 = vadd.f32 %v2046_v21, %v1991_v60 }
 0x1ea   :  { %v2048_v59 = vpop.f32.mrf.mxu1 }
 0x1ec   :  { %v2049_v61 = vpop.f32.mrf.mxu1 }
 0x1ed   :  { %v2105_v62 = vpop.f32.mrf.mxu0 }
 0x1ee   :  { %v2112_v1 = vadd.f32 %v2105_v62, %v2051_v46 }
 0x1ef   :  { %v2107_v63 = vpop.f32.mrf.mxu0 }
 0x1f0   :  { %v2113_v4 = vadd.f32 %v2107_v63, %v2052_v40 }
 0x1f1   :  { %v2166_v45 = vpop.f32.mrf.mxu1  ;;  %v2109_v39 = vpop.f32.mrf.mxu0 }
 0x1f2   :  { %v2173_v5 = vadd.f32 %v2166_v45, %v2112_v1 }
 0x1f3   :  { %v2168_v2 = vpop.f32.mrf.mxu1  ;;  %v2110_v3 = vpop.f32.mrf.mxu0 }
 0x1f4   :  { %v2174_v6 = vadd.f32 %v2168_v2, %v2113_v4 }
 0x1f5   :  { %v2170_v0 = vpop.f32.mrf.mxu1 }
 0x1f7   :  { %v2171_v56 = vpop.f32.mrf.mxu1 }
 0x1f9   :  { %v2227_v10 = vpop.f32.mrf.mxu0 }
 0x1fa   :  { %v2234_v11 = vadd.f32 %v2227_v10, %v2173_v5 }
 0x1fb   :  { %v2229_v12 = vpop.f32.mrf.mxu0 }
 0x1fc   :  { %v2235_v14 = vadd.f32 %v2229_v12, %v2174_v6 }
 0x1fd   :  { %v2288_v18 = vpop.f32.mrf.mxu1  ;;  %v2231_v19 = vpop.f32.mrf.mxu0 }
 0x1fe   :  { %v2295_v20 = vadd.f32 %v2288_v18, %v2234_v11 }
 0x1ff   :  { %v2290_v23 = vpop.f32.mrf.mxu1  ;;  %v2232_v24 = vpop.f32.mrf.mxu0 }
 0x200   :  { %v2296_v13 = vadd.f32 %v2290_v23, %v2235_v14 }
 0x201   :  { %v2292_v9 = vpop.f32.mrf.mxu1 }
 0x202   :  { %v3633_v25 = vpack.c.bf16 %v2296_v13, %v2295_v20 }
 0x203   :  { %v2293_v8 = vpop.f32.mrf.mxu1 }
 0x204   :  { %3572 = vst [vmem:[%s4547_s2 + $0x10] sm:$0xff] %v3633_v25 }
 0x205   :  { %v2383_v17 = vpop.f32.mrf.mxu0 }
 0x206   :  { %v2433_v22 = vpop.f32.mrf.mxu1 }
 0x207   :  { %v2385_v26 = vpop.f32.mrf.mxu0  ;;  %v2434_v43 = vadd.f32 %v2433_v22, %v2383_v17 }
 0x208   :  { %v2435_v27 = vpop.f32.mrf.mxu1 }
 0x209   :  { %v2387_v28 = vpop.f32.mrf.mxu0  ;;  %v2436_v44 = vadd.f32 %v2435_v27, %v2385_v26 }
 0x20a   :  { %v2437_v29 = vpop.f32.mrf.mxu1 }
 0x20b   :  { %v2388_v30 = vpop.f32.mrf.mxu0 }
 0x20c   :  { %v2438_v31 = vpop.f32.mrf.mxu1 }
 0x20d   :  { %v2492_v32 = vpop.f32.mrf.mxu0 }
 0x20e   :  { %v2499_v49 = vadd.f32 %v2492_v32, %v2434_v43 }
 0x20f   :  { %v2494_v33 = vpop.f32.mrf.mxu0 }
 0x210   :  { %v2500_v50 = vadd.f32 %v2494_v33, %v2436_v44 }
 0x211   :  { %v2496_v34 = vpop.f32.mrf.mxu0  ;;  %v2553_v7 = vpop.f32.mrf.mxu1 }
 0x212   :  { %v2560_v15 = vadd.f32 %v2553_v7, %v2499_v49 }
 0x213   :  { %v2497_v35 = vpop.f32.mrf.mxu0  ;;  %v2555_v36 = vpop.f32.mrf.mxu1 }
 0x214   :  { %v2561_v52 = vadd.f32 %v2555_v36, %v2500_v50 }
 0x215   :  { %v2614_v37 = vpop.f32.mrf.mxu0  ;;  %v2557_v38 = vpop.f32.mrf.mxu1 }
 0x216   :  { %v2621_v57 = vadd.f32 %v2614_v37, %v2560_v15 }
 0x217   :  { %v2616_v41 = vpop.f32.mrf.mxu0  ;;  %v2558_v42 = vpop.f32.mrf.mxu1 }
 0x218   :  { %v2622_v58 = vadd.f32 %v2616_v41, %v2561_v52 }
 0x219   :  { %v2618_v47 = vpop.f32.mrf.mxu0 }
 0x21b   :  { %v2619_v48 = vpop.f32.mrf.mxu0 }
 0x21d   :  { %v2675_v51 = vpop.f32.mrf.mxu1 }
 0x21e   :  { %v2682_v61 = vadd.f32 %v2675_v51, %v2621_v57 }
 0x21f   :  { %v2677_v16 = vpop.f32.mrf.mxu1 }
 0x220   :  { %v2683_v62 = vadd.f32 %v2677_v16, %v2622_v58 }
 0x221   :  { %v2736_v53 = vpop.f32.mrf.mxu0  ;;  %v2679_v54 = vpop.f32.mrf.mxu1 }
 0x222   :  { %v2743_v40 = vadd.f32 %v2736_v53, %v2682_v61 }
 0x223   :  { %v2738_v55 = vpop.f32.mrf.mxu0  ;;  %v2680_v21 = vpop.f32.mrf.mxu1 }
 0x224   :  { %v2744_v45 = vadd.f32 %v2738_v55, %v2683_v62 }
 0x225   :  { %v2740_v59 = vpop.f32.mrf.mxu0 }
 0x227   :  { %v2741_v60 = vpop.f32.mrf.mxu0 }
 0x229   :  { %v2797_v46 = vpop.f32.mrf.mxu1 }
 0x22a   :  { %v2804_v2 = vadd.f32 %v2797_v46, %v2743_v40 }
 0x22b   :  { %v2799_v63 = vpop.f32.mrf.mxu1 }
 0x22c   :  { %v2805_v3 = vadd.f32 %v2799_v63, %v2744_v45 }
 0x22d   :  { %v2858_v39 = vpop.f32.mrf.mxu0  ;;  %v2801_v1 = vpop.f32.mrf.mxu1 }
 0x22e   :  { %v2865_v5 = vadd.f32 %v2858_v39, %v2804_v2 }
 0x22f   :  { %v2860_v4 = vpop.f32.mrf.mxu0  ;;  %v2802_v0 = vpop.f32.mrf.mxu1 }
 0x230   :  { %v2866_v56 = vadd.f32 %v2860_v4, %v2805_v3 }
 0x231   :  { %v2862_v6 = vpop.f32.mrf.mxu0 }
 0x232   :  { %v3634_v10 = vpack.c.bf16 %v2866_v56, %v2865_v5 }
 0x233   :  { %v2863_v11 = vpop.f32.mrf.mxu0 }
 0x234   :  { %3601 = vst [vmem:[%s4547_s2 + $0x18] sm:$0xff] %v3634_v10 }
 0x235   :  { %v2959_v12 = vpop.f32.mrf.mxu1 }
 0x236   :  { %v3009_v14 = vpop.f32.mrf.mxu0 }
 0x237   :  { %v2961_v18 = vpop.f32.mrf.mxu1  ;;  %v3010_v34 = vadd.f32 %v3009_v14, %v2959_v12 }
 0x238   :  { %v3011_v19 = vpop.f32.mrf.mxu0 }
 0x239   :  { %v2963_v20 = vpop.f32.mrf.mxu1  ;;  %v3012_v35 = vadd.f32 %v3011_v19, %v2961_v18 }
 0x23a   :  { %v3013_v23 = vpop.f32.mrf.mxu0 }
 0x23b   :  { %v2964_v24 = vpop.f32.mrf.mxu1 }
 0x23c   :  { %v3014_v13 = vpop.f32.mrf.mxu0 }
 0x23d   :  { %v3068_v9 = vpop.f32.mrf.mxu1 }
 0x23e   :  { %v3075_v38 = vadd.f32 %v3068_v9, %v3010_v34 }
 0x23f   :  { %v3070_v25 = vpop.f32.mrf.mxu1 }
 0x240   :  { %v3076_v43 = vadd.f32 %v3070_v25, %v3012_v35 }
 0x241   :  { %v3072_v8 = vpop.f32.mrf.mxu1  ;;  %v3129_v17 = vpop.f32.mrf.mxu0 }
 0x242   :  { %v3136_v47 = vadd.f32 %v3129_v17, %v3075_v38 }
 0x243   :  { %v3073_v22 = vpop.f32.mrf.mxu1  ;;  %v3131_v26 = vpop.f32.mrf.mxu0 }
 0x244   :  { %v3137_v48 = vadd.f32 %v3131_v26, %v3076_v43 }
 0x245   :  { %v3190_v27 = vpop.f32.mrf.mxu1  ;;  %v3133_v28 = vpop.f32.mrf.mxu0 }
 0x246   :  { %v3197_v50 = vadd.f32 %v3190_v27, %v3136_v47 }
 0x247   :  { %v3192_v29 = vpop.f32.mrf.mxu1  ;;  %v3134_v30 = vpop.f32.mrf.mxu0 }
 0x248   :  { %v3198_v51 = vadd.f32 %v3192_v29, %v3137_v48 }
 0x249   :  { %v3194_v31 = vpop.f32.mrf.mxu1 }
 0x24b   :  { %v3195_v32 = vpop.f32.mrf.mxu1 }
 0x24d   :  { %v3251_v33 = vpop.f32.mrf.mxu0 }
 0x24e   :  { %v3258_v15 = vadd.f32 %v3251_v33, %v3197_v50 }
 0x24f   :  { %v3253_v7 = vpop.f32.mrf.mxu0 }
 0x250   :  { %v3259_v52 = vadd.f32 %v3253_v7, %v3198_v51 }
 0x251   :  { %v3312_v36 = vpop.f32.mrf.mxu1  ;;  %v3255_v37 = vpop.f32.mrf.mxu0 }
 0x252   :  { %v3319_v54 = vadd.f32 %v3312_v36, %v3258_v15 }
 0x253   :  { %v3314_v41 = vpop.f32.mrf.mxu1  ;;  %v3256_v42 = vpop.f32.mrf.mxu0 }
 0x254   :  { %v3320_v55 = vadd.f32 %v3314_v41, %v3259_v52 }
 0x255   :  { %v3316_v44 = vpop.f32.mrf.mxu1 }
 0x257   :  { %v3317_v49 = vpop.f32.mrf.mxu1 }
 0x259   :  { %v3373_v16 = vpop.f32.mrf.mxu0 }
 0x25a   :  { %v3380_v58 = vadd.f32 %v3373_v16, %v3319_v54 }
 0x25b   :  { %v3375_v53 = vpop.f32.mrf.mxu0 }
 0x25c   :  { %v3381_v59 = vadd.f32 %v3375_v53, %v3320_v55 }
 0x25d   :  { %v3434_v21 = vpop.f32.mrf.mxu1  ;;  %v3377_v57 = vpop.f32.mrf.mxu0 }
 0x25e   :  { %v3441_v62 = vadd.f32 %v3434_v21, %v3380_v58 }
 0x25f   :  { %v3436_v60 = vpop.f32.mrf.mxu1  ;;  %v3378_v61 = vpop.f32.mrf.mxu0 }
 0x260   :  { %v3442_v46 = vadd.f32 %v3436_v60, %v3381_v59 }
 0x261   :  { %v3438_v63 = vpop.f32.mrf.mxu1 }
 0x262   :  { %v3635_v40 = vpack.c.bf16 %v3442_v46, %v3441_v62 }
 0x263   :  { %v3439_v45 = vpop.f32.mrf.mxu1 }
 0x264   :  { %3629 = vst [vmem:[%s4548_s3 + $0x8] sm:$0xff] %v3635_v40 }

</bundles_post_ra>
